<compile_context>
chip_gen: v7x
topology: tpu7x:2x2x1
jax: 0.10.0
libtpu: 0.0.40
codegen_flags: <defaults>
</compile_context>

<pallas_src>
import functools

import jax
import jax.numpy as jnp
from jax import lax
from jax.experimental import pallas as pl
from jax.experimental.pallas import tpu as pltpu

LANE = 128


# ----------------------------- Pallas kernel --------------------------------

def cnn_fused_kernel(a1_ref, w1_ref, scl1_ref, t2_ref, scl2_ref,
                     wf_ref, bf_ref, out_ref, lhs_ref):
    """Fused conv1+BN+ReLU+pool -> conv2+BN+ReLU+pool -> fc1·fc2 for one 8-row batch tile.

    a1_ref  : (64, 384)   bf16  8-phase im2col; row = r*8 + b, lane = (j, tap, cin)
    w1_ref  : (384, 512)  bf16  block-diag conv1 weight; out lane = (j, cout1)
    scl1_ref: (2, 512)    f32   rows = folded (bias+BN) scale / shift, layer 1
    t2_ref  : (1536, 896) bf16  3 per-tap block-diag conv2 weights stacked along K
    scl2_ref: (2, 896)    f32   rows = folded scale / shift, layer 2
    wf_ref  : (896, 128)  bf16  folded fc1·fc2 weight (NCL-flatten perm included)
    bf_ref  : (1, 128)    f32   folded fc1·fc2 bias
    out_ref : (8, 128)    f32   logits; valid region [0:B, 0:num_classes]
    lhs_ref : (16, 1536)  f32   scratch: layer-2 LHS (rows 0-7 even, 8-15 odd)
    """
    f32 = jnp.float32
    n1 = w1_ref.shape[1]

    # ---- layer 1: all 8 conv phases x 8 batch slots in ONE matmul ----
    y1 = jnp.dot(a1_ref[...], w1_ref[...], preferred_element_type=f32)   # (64, 512)
    s1 = scl1_ref[0:1, :]
    h1 = scl1_ref[1:2, :]

    # BN affine + MaxPool1d(2,2) + ReLU (hoisted outside the max), per phase-pair.
    def pool1(k):
        a = y1[16 * k:16 * k + 8] * s1 + h1
        b = y1[16 * k + 8:16 * k + 16] * s1 + h1
        return jnp.maximum(jnp.maximum(a, b), 0.0)

    p01 = pool1(0)   # pooled layer-1 output at positions 2j
    p23 = pool1(1)   # ... 2j+1
    p45 = pool1(2)   # ... 2j+2
    p67 = pool1(3)   # ... 2j+3

    # ---- layer 2: one stacked-K matmul (M=16).  All stores below are
    #      8-sublane / 128-lane aligned plain stores into the VMEM scratch. ----
    lhs_ref[0:8, 0:n1] = p01
    lhs_ref[0:8, n1:2 * n1] = p23
    lhs_ref[0:8, 2 * n1:3 * n1] = p45
    lhs_ref[8:16, 0:n1] = p23
    lhs_ref[8:16, n1:2 * n1] = p45
    lhs_ref[8:16, 2 * n1:3 * n1] = p67
    z = jnp.dot(lhs_ref[...].astype(jnp.bfloat16), t2_ref[...],
                preferred_element_type=f32)                              # (16, 896)

    s2 = scl2_ref[0:1, :]
    h2 = scl2_ref[1:2, :]
    # BN affine (even/odd conv2 positions), MaxPool1d(2,2), single hoisted ReLU.
    feat = jnp.maximum(jnp.maximum(z[0:8] * s2 + h2, z[8:16] * s2 + h2), 0.0)

    # ---- fc1·fc2 folded into a single matmul (no activation between them) ----
    out_ref[...] = jnp.dot(feat.astype(jnp.bfloat16), wf_ref[...],
                           preferred_element_type=f32) + bf_ref[...]


# --------------------------- parameter preparation --------------------------

def _pad_axis(a, axis, size):
    pad = [(0, 0)] * a.ndim
    pad[axis] = (0, size - a.shape[axis])
    return jnp.pad(a, pad)


def _rup(n, m=LANE):
    return ((n + m - 1) // m) * m


def prepare_params(p, eps=1e-5):
    """One-time re-layout / folding of PyTorch-style params for the fused kernel."""
    cout1, cin, _ = p["w1"].shape                  # (16, Cin, 3)
    cout2 = p["w2"].shape[0]                       # 32
    nj2 = p["fc1_w"].shape[0] // cout2             # 26 pooled positions after layer 2
    nj1 = nj2 + 1                                  # 27 position groups for layer 1
    nh = p["fc1_w"].shape[1]                       # 100
    ncls = p["fc2_w"].shape[1]

    k1 = _rup(nj1 * 3 * cin)                       # 384
    n1 = _rup(nj1 * cout1)                         # 512
    n2 = _rup(nj2 * cout2)                         # 896
    nh_p = _rup(nh)                                # 128
    nc_p = _rup(ncls)                              # 128

    # layer 1: fold conv bias + eval BN; block-diagonal per-position-group weight.
    sc1 = p["g1"] / jnp.sqrt(p["v1"] + eps)
    sh1 = (p["b1"] - p["m1"]) * sc1 + p["bt1"]
    w1_flat = jnp.transpose(p["w1"], (2, 1, 0)).reshape(3 * cin, cout1)   # (t*cin+ci, co)
    w1_big = jnp.kron(jnp.eye(nj1, dtype=jnp.float32), w1_flat)           # (324, 432)
    w1_big = _pad_axis(_pad_axis(w1_big, 0, k1), 1, n1).astype(jnp.bfloat16)
    scl1 = jnp.stack([_pad_axis(jnp.tile(sc1, nj1), 0, n1),
                      _pad_axis(jnp.tile(sh1, nj1), 0, n1)]).astype(jnp.float32)  # (2, n1)

    # layer 2: per-tap block-diagonal weights, concatenated along K -> ONE matmul.
    sc2 = p["g2"] / jnp.sqrt(p["v2"] + eps)
    sh2 = (p["b2"] - p["m2"]) * sc2 + p["bt2"]
    eye_jn = jnp.eye(nj1, nj2, dtype=jnp.float32)                         # (27, 26)
    taps = []
    for t in range(3):
        w2t = p["w2"][:, :, t].T                                          # (16, 32)
        m = jnp.kron(eye_jn, w2t)                                         # (432, 832)
        taps.append(_pad_axis(_pad_axis(m, 0, n1), 1, n2))
    t2 = jnp.concatenate(taps, axis=0).astype(jnp.bfloat16)               # (1536, 896)
    scl2 = jnp.stack([_pad_axis(jnp.tile(sc2, nj2), 0, n2),
                      _pad_axis(jnp.tile(sh2, nj2), 0, n2)]).astype(jnp.float32)  # (2, n2)

    # fc1·fc2 folded (no activation between them); torch NCL flatten (c*26 + l)
    # folded into a row permutation of fc1's weight.
    wf1 = p["fc1_w"].reshape(cout2, nj2, nh).transpose(1, 0, 2).reshape(cout2 * nj2, nh)
    wf1 = _pad_axis(_pad_axis(wf1, 0, n2), 1, nh_p)                       # (896, 128) f32
    wf2 = _pad_axis(_pad_axis(p["fc2_w"], 0, nh_p), 1, nc_p)              # (128, 128) f32
    wf12 = (wf1 @ wf2).astype(jnp.bfloat16)                               # (896, 128)
    bf1 = _pad_axis(p["fc1_b"], 0, nh_p).reshape(1, nh_p)
    bf2 = _pad_axis(p["fc2_b"], 0, nc_p).reshape(1, nc_p)
    bf12 = (bf1 @ wf2 + bf2).astype(jnp.float32)                          # (1, 128)

    tensors = dict(w1=w1_big, scl1=scl1, t2=t2, scl2=scl2, wf12=wf12, bf12=bf12)
    meta = dict(nj1=nj1, num_classes=ncls)
    return tensors, meta


# ------------------------------ forward pass --------------------------------

@functools.partial(jax.jit, static_argnames=("nj1", "num_classes"))
def _forward_padded(x, tp, *, nj1, num_classes):
    B, cin, L = x.shape
    k1, n1 = tp["w1"].shape
    out_lanes = tp["wf12"].shape[1]
    nt = (B + 7) // 8                                 # batch tiles of 8 rows

    # ---- input glue: single-gather 8-phase im2col (one XLA fusion) ----
    lpad = 4 * nj1 + 10
    xcl = jnp.transpose(x, (0, 2, 1))                                    # (B, L, Cin)
    xcl = jnp.pad(xcl, ((0, 8 * nt - B), (1, lpad - L - 1), (0, 0)))     # (8nt, lpad, Cin)
    # idx[r, j, t] = 4*j + r + t  (conv1 padding=1 baked into the left pad)
    idx = (jnp.arange(8)[:, None, None]
           + 4 * jnp.arange(nj1)[None, :, None]
           + jnp.arange(3)[None, None, :]).reshape(-1).astype(jnp.int32)
    a1 = jnp.take(xcl, idx, axis=1)                                      # (8nt, 8*nj1*3, Cin)
    a1 = a1.reshape(nt, 8, 8, nj1, 3, cin).transpose(0, 2, 1, 3, 4, 5)   # (t, r, b, j, tap, ci)
    a1 = a1.reshape(nt * 64, nj1 * 3 * cin)
    a1 = _pad_axis(a1, 1, k1).astype(jnp.bfloat16)                       # (nt*64, k1)

    const = lambda i: (0, 0)   # weight blocks: constant index -> DMA'd once, VMEM-resident
    grid_spec = pltpu.PrefetchScalarGridSpec(
        num_scalar_prefetch=0,
        grid=(nt,),
        in_specs=[
            pl.BlockSpec((64, k1), lambda i: (i, 0)),     # activations: streamed per tile
            pl.BlockSpec(tp["w1"].shape, const),
            pl.BlockSpec(tp["scl1"].shape, const),
            pl.BlockSpec(tp["t2"].shape, const),
            pl.BlockSpec(tp["scl2"].shape, const),
            pl.BlockSpec(tp["wf12"].shape, const),
            pl.BlockSpec(tp["bf12"].shape, const),
        ],
        out_specs=pl.BlockSpec((8, out_lanes), lambda i: (i, 0)),
        scratch_shapes=[pltpu.VMEM((16, 3 * n1), jnp.float32)],
    )
    out = pl.pallas_call(
        cnn_fused_kernel,
        out_shape=jax.ShapeDtypeStruct((nt * 8, out_lanes), jnp.float32),
        grid_spec=grid_spec,
        compiler_params=pltpu.CompilerParams(
            dimension_semantics=("parallel",)),           # v7x: batch tiles across both TCs
    )(a1, tp["w1"], tp["scl1"], tp["t2"], tp["scl2"], tp["wf12"], tp["bf12"])
    return out[:B, :num_classes]


def cnn_forward(x, prep):
    tensors, meta = prep
    assert x.shape[2] == 4 * meta["nj1"], "input length inconsistent with fc1 size"
    return _forward_padded(x, tensors, nj1=meta["nj1"],
                           num_classes=meta["num_classes"])


# ---------------------------- pure-JAX reference ----------------------------

def reference_forward(x, p, eps=1e-5):
    def layer(x, w, b, g, bt, m, v, pad):
        y = lax.conv_general_dilated(x, w, (1,), [(pad, pad)],
                                     dimension_numbers=("NCH", "OIH", "NCH"))
        y = y + b[None, :, None]
        y = (y - m[None, :, None]) / jnp.sqrt(v[None, :, None] + eps)
        y = y * g[None, :, None] + bt[None, :, None]
        y = jnp.maximum(y, 0.0)
        B, C, L = y.shape
        return y[:, :, :(L // 2) * 2].reshape(B, C, L // 2, 2).max(axis=-1)

    out = layer(x, p["w1"], p["b1"], p["g1"], p["bt1"], p["m1"], p["v1"], 1)
    out = layer(out, p["w2"], p["b2"], p["g2"], p["bt2"], p["m2"], p["v2"], 0)
    feat = out.reshape(out.shape[0], -1)
    h = feat @ p["fc1_w"] + p["fc1_b"]
    return h @ p["fc2_w"] + p["fc2_b"]


# ----------------------------------- main ------------------------------------

if __name__ == "__main__":
    # fc1 expects 32*26 features -> input length L = 108
    # (108 -pad1 conv-> 108, pool -> 54, conv no-pad -> 52, pool -> 26).
    B, Cin, L, num_classes = 2, 4, 108, 10
    ks = jax.random.split(jax.random.PRNGKey(0), 17)

    def rnd(k, shape, s=0.1):
        return (s * jax.random.normal(k, shape)).astype(jnp.float32)

    params = dict(
        # layer1: Conv1d(Cin, 16, 3, pad=1) + BatchNorm1d(16)
        w1=rnd(ks[0], (16, Cin, 3)), b1=rnd(ks[1], (16,)),
        g1=(1.0 + 0.1 * jax.random.normal(ks[2], (16,))).astype(jnp.float32),
        bt1=rnd(ks[3], (16,)),
        m1=rnd(ks[4], (16,)),
        v1=(0.5 + jax.random.uniform(ks[5], (16,))).astype(jnp.float32),
        # layer2: Conv1d(16, 32, 3, pad=0) + BatchNorm1d(32)
        w2=rnd(ks[6], (32, 16, 3)), b2=rnd(ks[7], (32,)),
        g2=(1.0 + 0.1 * jax.random.normal(ks[8], (32,))).astype(jnp.float32),
        bt2=rnd(ks[9], (32,)),
        m2=rnd(ks[10], (32,)),
        v2=(0.5 + jax.random.uniform(ks[11], (32,))).astype(jnp.float32),
        # fc1: Linear(32*26, 100); fc2: Linear(100, num_classes) (stored as (in, out))
        fc1_w=rnd(ks[12], (32 * 26, 100), s=0.05), fc1_b=rnd(ks[13], (100,)),
        fc2_w=rnd(ks[14], (100, num_classes), s=0.05), fc2_b=rnd(ks[15], (num_classes,)),
    )

    x = jax.random.normal(ks[16], (B, Cin, L), dtype=jnp.float32)

    prep = prepare_params(params)                 # one-time weight folding / re-layout
    out = jax.block_until_ready(cnn_forward(x, prep))
    ref = reference_forward(x, params)

    assert out.shape == (B, num_classes), out.shape
    err = float(jnp.max(jnp.abs(out - ref)))
    assert jnp.allclose(out, ref, atol=2e-2, rtol=2e-2), f"max abs err {err}"
    print("KERNEL_OK")
</pallas_src>

<mosaic_0001>
module attributes {stable_mosaic.version = 11 : i64} {
  func.func @cnn_fused_kernel(%arg0: i32, %arg1: memref<64x384xbf16, #tpu.memory_space<vmem>>, %arg2: memref<384x512xbf16, #tpu.memory_space<vmem>>, %arg3: memref<2x512xf32, #tpu.memory_space<vmem>>, %arg4: memref<1536x896xbf16, #tpu.memory_space<vmem>>, %arg5: memref<2x896xf32, #tpu.memory_space<vmem>>, %arg6: memref<896x128xbf16, #tpu.memory_space<vmem>>, %arg7: memref<1x128xf32, #tpu.memory_space<vmem>>, %arg8: memref<8x128xf32, #tpu.memory_space<vmem>>, %arg9: memref<16x1536xf32, #tpu.memory_space<vmem>>) attributes {dimension_semantics = [#tpu.dimension_semantics<parallel>], iteration_bounds = array<i64: 1>, scalar_prefetch = 0 : i64, scratch_operands = 1 : i64, tpu.core_type = #tpu.core_type<tc>, window_params = [{transform_indices = @transform_0, window_bounds = array<i64: 64, 384>}, {pipeline_mode = #tpu.pipeline_mode<synchronous>, transform_indices = @transform_1, window_bounds = array<i64: 384, 512>}, {pipeline_mode = #tpu.pipeline_mode<synchronous>, transform_indices = @transform_2, window_bounds = array<i64: 2, 512>}, {pipeline_mode = #tpu.pipeline_mode<synchronous>, transform_indices = @transform_3, window_bounds = array<i64: 1536, 896>}, {pipeline_mode = #tpu.pipeline_mode<synchronous>, transform_indices = @transform_4, window_bounds = array<i64: 2, 896>}, {pipeline_mode = #tpu.pipeline_mode<synchronous>, transform_indices = @transform_5, window_bounds = array<i64: 896, 128>}, {pipeline_mode = #tpu.pipeline_mode<synchronous>, transform_indices = @transform_6, window_bounds = array<i64: 1, 128>}, {transform_indices = @transform_7, window_bounds = array<i64: 8, 128>}]} {
    %c0 = arith.constant 0 : index
    %c0_0 = arith.constant 0 : index
    %0 = vector.load %arg1[%c0, %c0_0] : memref<64x384xbf16, #tpu.memory_space<vmem>>, vector<64x384xbf16>
    %c0_1 = arith.constant 0 : index
    %c0_2 = arith.constant 0 : index
    %1 = vector.load %arg2[%c0_1, %c0_2] : memref<384x512xbf16, #tpu.memory_space<vmem>>, vector<384x512xbf16>
    %cst = arith.constant dense<0.000000e+00> : vector<64x512xf32>
    %2 = tpu.matmul %0, %1, %cst {dimension_numbers = #tpu.dot_dimension_numbers<[1], [0], [0], [1], [0, 0, 1, 1], [], []>} : vector<64x384xbf16>, vector<384x512xbf16>, vector<64x512xf32> -> vector<64x512xf32>
    %c0_3 = arith.constant 0 : index
    %c0_4 = arith.constant 0 : index
    %3 = vector.load %arg3[%c0_3, %c0_4] : memref<2x512xf32, #tpu.memory_space<vmem>>, vector<1x512xf32>
    %c1 = arith.constant 1 : index
    %c0_5 = arith.constant 0 : index
    %4 = vector.load %arg3[%c1, %c0_5] : memref<2x512xf32, #tpu.memory_space<vmem>>, vector<1x512xf32>
    %5 = vector.extract_strided_slice %2 {offsets = [0, 0], sizes = [8, 512], strides = [1, 1]} : vector<64x512xf32> to vector<8x512xf32>
    %6 = vector.broadcast %3 : vector<1x512xf32> to vector<8x512xf32>
    %7 = arith.mulf %5, %6 : vector<8x512xf32>
    %8 = vector.broadcast %4 : vector<1x512xf32> to vector<8x512xf32>
    %9 = arith.addf %7, %8 : vector<8x512xf32>
    %10 = vector.extract_strided_slice %2 {offsets = [8, 0], sizes = [8, 512], strides = [1, 1]} : vector<64x512xf32> to vector<8x512xf32>
    %11 = vector.broadcast %3 : vector<1x512xf32> to vector<8x512xf32>
    %12 = arith.mulf %10, %11 : vector<8x512xf32>
    %13 = vector.broadcast %4 : vector<1x512xf32> to vector<8x512xf32>
    %14 = arith.addf %12, %13 : vector<8x512xf32>
    %15 = arith.maximumf %9, %14 : vector<8x512xf32>
    %cst_6 = arith.constant 0.000000e+00 : f32
    %16 = vector.broadcast %cst_6 : f32 to vector<8x512xf32>
    %17 = arith.maximumf %15, %16 : vector<8x512xf32>
    %18 = vector.extract_strided_slice %2 {offsets = [16, 0], sizes = [8, 512], strides = [1, 1]} : vector<64x512xf32> to vector<8x512xf32>
    %19 = vector.broadcast %3 : vector<1x512xf32> to vector<8x512xf32>
    %20 = arith.mulf %18, %19 : vector<8x512xf32>
    %21 = vector.broadcast %4 : vector<1x512xf32> to vector<8x512xf32>
    %22 = arith.addf %20, %21 : vector<8x512xf32>
    %23 = vector.extract_strided_slice %2 {offsets = [24, 0], sizes = [8, 512], strides = [1, 1]} : vector<64x512xf32> to vector<8x512xf32>
    %24 = vector.broadcast %3 : vector<1x512xf32> to vector<8x512xf32>
    %25 = arith.mulf %23, %24 : vector<8x512xf32>
    %26 = vector.broadcast %4 : vector<1x512xf32> to vector<8x512xf32>
    %27 = arith.addf %25, %26 : vector<8x512xf32>
    %28 = arith.maximumf %22, %27 : vector<8x512xf32>
    %cst_7 = arith.constant 0.000000e+00 : f32
    %29 = vector.broadcast %cst_7 : f32 to vector<8x512xf32>
    %30 = arith.maximumf %28, %29 : vector<8x512xf32>
    %31 = vector.extract_strided_slice %2 {offsets = [32, 0], sizes = [8, 512], strides = [1, 1]} : vector<64x512xf32> to vector<8x512xf32>
    %32 = vector.broadcast %3 : vector<1x512xf32> to vector<8x512xf32>
    %33 = arith.mulf %31, %32 : vector<8x512xf32>
    %34 = vector.broadcast %4 : vector<1x512xf32> to vector<8x512xf32>
    %35 = arith.addf %33, %34 : vector<8x512xf32>
    %36 = vector.extract_strided_slice %2 {offsets = [40, 0], sizes = [8, 512], strides = [1, 1]} : vector<64x512xf32> to vector<8x512xf32>
    %37 = vector.broadcast %3 : vector<1x512xf32> to vector<8x512xf32>
    %38 = arith.mulf %36, %37 : vector<8x512xf32>
    %39 = vector.broadcast %4 : vector<1x512xf32> to vector<8x512xf32>
    %40 = arith.addf %38, %39 : vector<8x512xf32>
    %41 = arith.maximumf %35, %40 : vector<8x512xf32>
    %cst_8 = arith.constant 0.000000e+00 : f32
    %42 = vector.broadcast %cst_8 : f32 to vector<8x512xf32>
    %43 = arith.maximumf %41, %42 : vector<8x512xf32>
    %44 = vector.extract_strided_slice %2 {offsets = [48, 0], sizes = [8, 512], strides = [1, 1]} : vector<64x512xf32> to vector<8x512xf32>
    %45 = vector.broadcast %3 : vector<1x512xf32> to vector<8x512xf32>
    %46 = arith.mulf %44, %45 : vector<8x512xf32>
    %47 = vector.broadcast %4 : vector<1x512xf32> to vector<8x512xf32>
    %48 = arith.addf %46, %47 : vector<8x512xf32>
    %49 = vector.extract_strided_slice %2 {offsets = [56, 0], sizes = [8, 512], strides = [1, 1]} : vector<64x512xf32> to vector<8x512xf32>
    %50 = vector.broadcast %3 : vector<1x512xf32> to vector<8x512xf32>
    %51 = arith.mulf %49, %50 : vector<8x512xf32>
    %52 = vector.broadcast %4 : vector<1x512xf32> to vector<8x512xf32>
    %53 = arith.addf %51, %52 : vector<8x512xf32>
    %54 = arith.maximumf %48, %53 : vector<8x512xf32>
    %cst_9 = arith.constant 0.000000e+00 : f32
    %55 = vector.broadcast %cst_9 : f32 to vector<8x512xf32>
    %56 = arith.maximumf %54, %55 : vector<8x512xf32>
    %c0_10 = arith.constant 0 : index
    %c0_11 = arith.constant 0 : index
    %57 = vector.load %arg9[%c0_10, %c0_11] : memref<16x1536xf32, #tpu.memory_space<vmem>>, vector<8x512xf32>
    tpu.vector_store %arg9[%c0_10, %c0_11], %17 {strides = array<i32>} : memref<16x1536xf32, #tpu.memory_space<vmem>>, vector<8x512xf32>,
    %c0_12 = arith.constant 0 : index
    %c512 = arith.constant 512 : index
    %58 = vector.load %arg9[%c0_12, %c512] : memref<16x1536xf32, #tpu.memory_space<vmem>>, vector<8x512xf32>
    tpu.vector_store %arg9[%c0_12, %c512], %30 {strides = array<i32>} : memref<16x1536xf32, #tpu.memory_space<vmem>>, vector<8x512xf32>,
    %c0_13 = arith.constant 0 : index
    %c1024 = arith.constant 1024 : index
    %59 = vector.load %arg9[%c0_13, %c1024] : memref<16x1536xf32, #tpu.memory_space<vmem>>, vector<8x512xf32>
    tpu.vector_store %arg9[%c0_13, %c1024], %43 {strides = array<i32>} : memref<16x1536xf32, #tpu.memory_space<vmem>>, vector<8x512xf32>,
    %c8 = arith.constant 8 : index
    %c0_14 = arith.constant 0 : index
    %60 = vector.load %arg9[%c8, %c0_14] : memref<16x1536xf32, #tpu.memory_space<vmem>>, vector<8x512xf32>
    tpu.vector_store %arg9[%c8, %c0_14], %30 {strides = array<i32>} : memref<16x1536xf32, #tpu.memory_space<vmem>>, vector<8x512xf32>,
    %c8_15 = arith.constant 8 : index
    %c512_16 = arith.constant 512 : index
    %61 = vector.load %arg9[%c8_15, %c512_16] : memref<16x1536xf32, #tpu.memory_space<vmem>>, vector<8x512xf32>
    tpu.vector_store %arg9[%c8_15, %c512_16], %43 {strides = array<i32>} : memref<16x1536xf32, #tpu.memory_space<vmem>>, vector<8x512xf32>,
    %c8_17 = arith.constant 8 : index
    %c1024_18 = arith.constant 1024 : index
    %62 = vector.load %arg9[%c8_17, %c1024_18] : memref<16x1536xf32, #tpu.memory_space<vmem>>, vector<8x512xf32>
    tpu.vector_store %arg9[%c8_17, %c1024_18], %56 {strides = array<i32>} : memref<16x1536xf32, #tpu.memory_space<vmem>>, vector<8x512xf32>,
    %c0_19 = arith.constant 0 : index
    %c0_20 = arith.constant 0 : index
    %63 = vector.load %arg9[%c0_19, %c0_20] : memref<16x1536xf32, #tpu.memory_space<vmem>>, vector<16x1536xf32>
    %64 = arith.truncf %63 : vector<16x1536xf32> to vector<16x1536xbf16>
    %c0_21 = arith.constant 0 : index
    %c0_22 = arith.constant 0 : index
    %65 = vector.load %arg4[%c0_21, %c0_22] : memref<1536x896xbf16, #tpu.memory_space<vmem>>, vector<1536x896xbf16>
    %cst_23 = arith.constant dense<0.000000e+00> : vector<16x896xf32>
    %66 = tpu.matmul %64, %65, %cst_23 {dimension_numbers = #tpu.dot_dimension_numbers<[1], [0], [0], [1], [0, 0, 1, 1], [], []>} : vector<16x1536xbf16>, vector<1536x896xbf16>, vector<16x896xf32> -> vector<16x896xf32>
    %c0_24 = arith.constant 0 : index
    %c0_25 = arith.constant 0 : index
    %67 = vector.load %arg5[%c0_24, %c0_25] : memref<2x896xf32, #tpu.memory_space<vmem>>, vector<1x896xf32>
    %c1_26 = arith.constant 1 : index
    %c0_27 = arith.constant 0 : index
    %68 = vector.load %arg5[%c1_26, %c0_27] : memref<2x896xf32, #tpu.memory_space<vmem>>, vector<1x896xf32>
    %69 = vector.extract_strided_slice %66 {offsets = [0, 0], sizes = [8, 896], strides = [1, 1]} : vector<16x896xf32> to vector<8x896xf32>
    %70 = vector.broadcast %67 : vector<1x896xf32> to vector<8x896xf32>
    %71 = arith.mulf %69, %70 : vector<8x896xf32>
    %72 = vector.broadcast %68 : vector<1x896xf32> to vector<8x896xf32>
    %73 = arith.addf %71, %72 : vector<8x896xf32>
    %74 = vector.extract_strided_slice %66 {offsets = [8, 0], sizes = [8, 896], strides = [1, 1]} : vector<16x896xf32> to vector<8x896xf32>
    %75 = vector.broadcast %67 : vector<1x896xf32> to vector<8x896xf32>
    %76 = arith.mulf %74, %75 : vector<8x896xf32>
    %77 = vector.broadcast %68 : vector<1x896xf32> to vector<8x896xf32>
    %78 = arith.addf %76, %77 : vector<8x896xf32>
    %79 = arith.maximumf %73, %78 : vector<8x896xf32>
    %cst_28 = arith.constant 0.000000e+00 : f32
    %80 = vector.broadcast %cst_28 : f32 to vector<8x896xf32>
    %81 = arith.maximumf %79, %80 : vector<8x896xf32>
    %82 = arith.truncf %81 : vector<8x896xf32> to vector<8x896xbf16>
    %c0_29 = arith.constant 0 : index
    %c0_30 = arith.constant 0 : index
    %83 = vector.load %arg6[%c0_29, %c0_30] : memref<896x128xbf16, #tpu.memory_space<vmem>>, vector<896x128xbf16>
    %cst_31 = arith.constant dense<0.000000e+00> : vector<8x128xf32>
    %84 = tpu.matmul %82, %83, %cst_31 {dimension_numbers = #tpu.dot_dimension_numbers<[1], [0], [0], [1], [0, 0, 1, 1], [], []>} : vector<8x896xbf16>, vector<896x128xbf16>, vector<8x128xf32> -> vector<8x128xf32>
    %c0_32 = arith.constant 0 : index
    %c0_33 = arith.constant 0 : index
    %85 = vector.load %arg7[%c0_32, %c0_33] : memref<1x128xf32, #tpu.memory_space<vmem>>, vector<1x128xf32>
    %86 = vector.broadcast %85 : vector<1x128xf32> to vector<8x128xf32>
    %87 = arith.addf %84, %86 : vector<8x128xf32>
    %c0_34 = arith.constant 0 : index
    %c0_35 = arith.constant 0 : index
    %88 = vector.load %arg8[%c0_34, %c0_35] : memref<8x128xf32, #tpu.memory_space<vmem>>, vector<8x128xf32>
    tpu.vector_store %arg8[%c0_34, %c0_35], %87 {strides = array<i32>} : memref<8x128xf32, #tpu.memory_space<vmem>>, vector<8x128xf32>,
    return
  }
  func.func @transform_0(%arg0: i32) -> (i32, i32) {
    %c0_i32 = arith.constant 0 : i32
    %c0_i32_0 = arith.constant 0 : i32
    return %arg0, %c0_i32 : i32, i32
  }
  func.func @transform_1(%arg0: i32) -> (i32, i32) {
    %c0_i32 = arith.constant 0 : i32
    %c0_i32_0 = arith.constant 0 : i32
    %c0_i32_1 = arith.constant 0 : i32
    return %c0_i32, %c0_i32_0 : i32, i32
  }
  func.func @transform_2(%arg0: i32) -> (i32, i32) {
    %c0_i32 = arith.constant 0 : i32
    %c0_i32_0 = arith.constant 0 : i32
    %c0_i32_1 = arith.constant 0 : i32
    return %c0_i32, %c0_i32_0 : i32, i32
  }
  func.func @transform_3(%arg0: i32) -> (i32, i32) {
    %c0_i32 = arith.constant 0 : i32
    %c0_i32_0 = arith.constant 0 : i32
    %c0_i32_1 = arith.constant 0 : i32
    return %c0_i32, %c0_i32_0 : i32, i32
  }
  func.func @transform_4(%arg0: i32) -> (i32, i32) {
    %c0_i32 = arith.constant 0 : i32
    %c0_i32_0 = arith.constant 0 : i32
    %c0_i32_1 = arith.constant 0 : i32
    return %c0_i32, %c0_i32_0 : i32, i32
  }
  func.func @transform_5(%arg0: i32) -> (i32, i32) {
    %c0_i32 = arith.constant 0 : i32
    %c0_i32_0 = arith.constant 0 : i32
    %c0_i32_1 = arith.constant 0 : i32
    return %c0_i32, %c0_i32_0 : i32, i32
  }
  func.func @transform_6(%arg0: i32) -> (i32, i32) {
    %c0_i32 = arith.constant 0 : i32
    %c0_i32_0 = arith.constant 0 : i32
    %c0_i32_1 = arith.constant 0 : i32
    return %c0_i32, %c0_i32_0 : i32, i32
  }
  func.func @transform_7(%arg0: i32) -> (i32, i32) {
    %c0_i32 = arith.constant 0 : i32
    %c0_i32_0 = arith.constant 0 : i32
    return %arg0, %c0_i32 : i32, i32
  }
}

</mosaic_0001>

<bundles_post_ra>
// kernel: _forward_padded.1
= control target key start
LH: loop header
LB: loop body
LE: loop exit
PB: predicated region body
PF: predicated region fallthrough
CT: control target
= control target key end

     0   :  { %v9501_v1 = vmov 0   ;;  %vm9503_vm0 = vmmov 0   ;;  %s12342_s1 = inlined_call_operand.vmem [shape: bf16[384,512], index: 1, kind: input, shape index: {}]   ;;  %s12343_s0 = inlined_call_operand.vmem [shape: bf16[64,384], index: 0, kind: input, shape index: {}]   ;;  %s12344_s3 = inlined_call_operand.vmem [shape: bf16[1536,896], index: 3, kind: input, shape index: {}]   ;;  %s12345_s2 = inlined_call_operand.vmem [shape: f32[2,512], index: 2, kind: input, shape index: {}]   ;;  %s12346_s5 = inlined_call_operand.vmem [shape: bf16[896,128], index: 5, kind: input, shape index: {}]   ;;  %s12347_s4 = inlined_call_operand.vmem [shape: f32[2,896], index: 4, kind: input, shape index: {}]   ;;  %s12348_s6 = inlined_call_operand.vmem [shape: f32[1,128], index: 6, kind: input, shape index: {}]   ;;  %s12349_s7 = inlined_call_operand.vmem [shape: f32[8,128], index: 7, kind: output, shape index: {}]  }
   0x1   :  { %v8325_v0 = vld [vmem:[%s12342_s1 + $0x4] ss:$16 sps:$4 sm:$0xff]   ;;  %788 = vmatprep.mubr.bf16.mxu1 %v9501_v1  ;;  %v8329_v3 = vld [vmem:[%s12342_s1] ss:$16 sps:$4 sm:$0xff]   ;;  %v8378_v34 = vld [vmem:[%s12342_s1 + $0xc] ss:$16 sps:$4 sm:$0xff]  }
   0x2   :  { %v8327_v2 = vld [vmem:[%s12342_s1 + $0x204] ss:$16 sps:$4 sm:$0xff]   ;;  %683 = vmatprep.subr.bf16.mxu0 %v8325_v0  ;;  %v8330_v4 = vld [vmem:[%s12342_s1 + $0x200] ss:$16 sps:$4 sm:$0xff]   ;;  %v8376_v36 = vld [vmem:[%s12342_s1 + $0x8] ss:$16 sps:$4 sm:$0xff]  }
   0x3   :  { %756 = vmatprep.subr.bf16.mxu1 %v8327_v2  ;;  %v8331_v5 = vld [vmem:[%s12342_s1 + $0x24] ss:$16 sps:$4 sm:$0xff]   ;;  %684 = vmatpush1.bf16.msra.mxu0 %v8329_v3  ;;  %v8335_v7 = vld [vmem:[%s12342_s1 + $0x20] ss:$16 sps:$4 sm:$0xff]   ;;  %v8384_v39 = vld [vmem:[%s12342_s1 + $0x2c] ss:$16 sps:$4 sm:$0xff]  }
   0x4   :  { %757 = vmatpush1.bf16.msra.mxu1 %v8330_v4  ;;  %v8333_v6 = vld [vmem:[%s12342_s1 + $0x224] ss:$16 sps:$4 sm:$0xff]   ;;  %685 = vmatprep.subr.bf16.mxu0 %v8331_v5  ;;  %v8336_v8 = vld [vmem:[%s12342_s1 + $0x220] ss:$16 sps:$4 sm:$0xff]   ;;  %v8382_v40 = vld [vmem:[%s12342_s1 + $0x28] ss:$16 sps:$4 sm:$0xff]  }
   0x5   :  { %758 = vmatprep.subr.bf16.mxu1 %v8333_v6  ;;  %v8337_v9 = vld [vmem:[%s12342_s1 + $0x44] ss:$16 sps:$4 sm:$0xff]   ;;  %v8341_v11 = vld [vmem:[%s12342_s1 + $0x40] ss:$16 sps:$4 sm:$0xff]   ;;  %v8390_v43 = vld [vmem:[%s12342_s1 + $0x4c] ss:$16 sps:$4 sm:$0xff]  }
   0x6   :  { %v8339_v10 = vld [vmem:[%s12342_s1 + $0x244] ss:$16 sps:$4 sm:$0xff]   ;;  %v8342_v12 = vld [vmem:[%s12342_s1 + $0x240] ss:$16 sps:$4 sm:$0xff]   ;;  %v8388_v44 = vld [vmem:[%s12342_s1 + $0x48] ss:$16 sps:$4 sm:$0xff]  }
   0x7   :  { %686 = vmatpush1.bf16.msra.mxu0 %v8335_v7  ;;  %v8343_v13 = vld [vmem:[%s12342_s1 + $0x64] ss:$16 sps:$4 sm:$0xff]   ;;  %v8347_v15 = vld [vmem:[%s12342_s1 + $0x60] ss:$16 sps:$4 sm:$0xff]   ;;  %v8396_v47 = vld [vmem:[%s12342_s1 + $0x6c] ss:$16 sps:$4 sm:$0xff]  }
   0x8   :  { %759 = vmatpush1.bf16.msra.mxu1 %v8336_v8  ;;  %687 = vmatprep.subr.bf16.mxu0 %v8337_v9  ;;  %v8345_v14 = vld [vmem:[%s12342_s1 + $0x264] ss:$16 sps:$4 sm:$0xff]   ;;  %v8348_v16 = vld [vmem:[%s12342_s1 + $0x260] ss:$16 sps:$4 sm:$0xff]   ;;  %v8394_v48 = vld [vmem:[%s12342_s1 + $0x68] ss:$16 sps:$4 sm:$0xff]  }
   0x9   :  { %760 = vmatprep.subr.bf16.mxu1 %v8339_v10  ;;  %v8349_v17 = vld [vmem:[%s12342_s1 + $0x84] ss:$16 sps:$4 sm:$0xff]   ;;  %v8353_v19 = vld [vmem:[%s12342_s1 + $0x80] ss:$16 sps:$4 sm:$0xff]   ;;  %v8402_v52 = vld [vmem:[%s12342_s1 + $0x8c] ss:$16 sps:$4 sm:$0xff]  }
   0xa   :  { %v8351_v18 = vld [vmem:[%s12342_s1 + $0x284] ss:$16 sps:$4 sm:$0xff]   ;;  %v8354_v20 = vld [vmem:[%s12342_s1 + $0x280] ss:$16 sps:$4 sm:$0xff]   ;;  %v8400_v53 = vld [vmem:[%s12342_s1 + $0x88] ss:$16 sps:$4 sm:$0xff]  }
   0xb   :  { %688 = vmatpush1.bf16.msra.mxu0 %v8341_v11  ;;  %v8355_v21 = vld [vmem:[%s12342_s1 + $0xa4] ss:$16 sps:$4 sm:$0xff]   ;;  %v8359_v23 = vld [vmem:[%s12342_s1 + $0xa0] ss:$16 sps:$4 sm:$0xff]   ;;  %v8408_v57 = vld [vmem:[%s12342_s1 + $0xac] ss:$16 sps:$4 sm:$0xff]  }
   0xc   :  { %761 = vmatpush1.bf16.msra.mxu1 %v8342_v12  ;;  %689 = vmatprep.subr.bf16.mxu0 %v8343_v13  ;;  %v8357_v22 = vld [vmem:[%s12342_s1 + $0x2a4] ss:$16 sps:$4 sm:$0xff]   ;;  %v8360_v24 = vld [vmem:[%s12342_s1 + $0x2a0] ss:$16 sps:$4 sm:$0xff]   ;;  %v8406_v58 = vld [vmem:[%s12342_s1 + $0xa8] ss:$16 sps:$4 sm:$0xff]  }
   0xd   :  { %762 = vmatprep.subr.bf16.mxu1 %v8345_v14  ;;  %v8361_v25 = vld [vmem:[%s12342_s1 + $0xc4] ss:$16 sps:$4 sm:$0xff]   ;;  %v8365_v27 = vld [vmem:[%s12342_s1 + $0xc0] ss:$16 sps:$4 sm:$0xff]   ;;  %v8414_v61 = vld [vmem:[%s12342_s1 + $0xcc] ss:$16 sps:$4 sm:$0xff]  }
   0xe   :  { %v8363_v26 = vld [vmem:[%s12342_s1 + $0x2c4] ss:$16 sps:$4 sm:$0xff]   ;;  %v8366_v28 = vld [vmem:[%s12342_s1 + $0x2c0] ss:$16 sps:$4 sm:$0xff]   ;;  %v8412_v63 = vld [vmem:[%s12342_s1 + $0xc8] ss:$16 sps:$4 sm:$0xff]  }
   0xf   :  { %690 = vmatpush1.bf16.msra.mxu0 %v8347_v15  ;;  %v8367_v29 = vld [vmem:[%s12342_s1 + $0xe4] ss:$16 sps:$4 sm:$0xff]   ;;  %v8371_v31 = vld [vmem:[%s12342_s1 + $0xe0] ss:$16 sps:$4 sm:$0xff]   ;;  %v8420_v3 = vld [vmem:[%s12342_s1 + $0xec] ss:$16 sps:$4 sm:$0xff]  }
  0x10   :  { %763 = vmatpush1.bf16.msra.mxu1 %v8348_v16  ;;  %691 = vmatprep.subr.bf16.mxu0 %v8349_v17  ;;  %v8369_v30 = vld [vmem:[%s12342_s1 + $0x2e4] ss:$16 sps:$4 sm:$0xff]   ;;  %v8372_v32 = vld [vmem:[%s12342_s1 + $0x2e0] ss:$16 sps:$4 sm:$0xff]   ;;  %v8418_v4 = vld [vmem:[%s12342_s1 + $0xe8] ss:$16 sps:$4 sm:$0xff]  }
  0x11   :  { %764 = vmatprep.subr.bf16.mxu1 %v8351_v18  ;;  %v8373_v33 = vld [vmem:[%s12342_s1 + $0x104] ss:$16 sps:$4 sm:$0xff]   ;;  %v8379_v37 = vld [vmem:[%s12342_s1 + $0x100] ss:$16 sps:$4 sm:$0xff]   ;;  %v8427_v6 = vld [vmem:[%s12342_s1 + $0x10c] ss:$16 sps:$4 sm:$0xff]  }
  0x12   :  { %v9650_v35 = vld [vmem:[%s12343_s0 + $0x8] ss:$12 sps:$4 sm:$0xff]   ;;  %v8385_v41 = vld [vmem:[%s12342_s1 + $0x120] ss:$16 sps:$4 sm:$0xff]   ;;  %v9739_v62 = vld [vmem:[%s12343_s0 + $0x38] ss:$12 sps:$4 sm:$0xff]  }
  0x13   :  { %692 = vmatpush1.bf16.msra.mxu0 %v8353_v19  ;;  %v8380_v38 = vld [vmem:[%s12342_s1 + $0x124] ss:$16 sps:$4 sm:$0xff]   ;;  %v8391_v45 = vld [vmem:[%s12342_s1 + $0x140] ss:$16 sps:$4 sm:$0xff]   ;;  %v8425_v9 = vld [vmem:[%s12342_s1 + $0x108] ss:$16 sps:$4 sm:$0xff]  }
  0x14   :  { %765 = vmatpush1.bf16.msra.mxu1 %v8354_v20  ;;  %693 = vmatprep.subr.bf16.mxu0 %v8355_v21  ;;  %v8386_v42 = vld [vmem:[%s12342_s1 + $0x144] ss:$16 sps:$4 sm:$0xff]   ;;  %v8397_v49 = vld [vmem:[%s12342_s1 + $0x160] ss:$16 sps:$4 sm:$0xff]   ;;  %v8432_v10 = vld [vmem:[%s12343_s0 + $0x1c] ss:$12 sps:$4 sm:$0xff]  }
  0x15   :  { %766 = vmatprep.subr.bf16.mxu1 %v8357_v22  ;;  %v8392_v46 = vld [vmem:[%s12342_s1 + $0x164] ss:$16 sps:$4 sm:$0xff]   ;;  %v8403_v54 = vld [vmem:[%s12342_s1 + $0x180] ss:$16 sps:$4 sm:$0xff]   ;;  %v8430_v11 = vld [vmem:[%s12342_s1 + $0x12c] ss:$16 sps:$4 sm:$0xff]  }
  0x16   :  { %v8398_v50 = vld [vmem:[%s12342_s1 + $0x184] ss:$16 sps:$4 sm:$0xff]   ;;  %v9714_v55 = vld [vmem:[%s12343_s0 + $0x20] ss:$12 sps:$4 sm:$0xff]   ;;  %v9767_v7 = vld [vmem:[%s12343_s0 + $0x50] ss:$12 sps:$4 sm:$0xff]  }
  0x17   :  { %694 = vmatpush1.bf16.msra.mxu0 %v8359_v23  ;;  %v8424_v51 = vld [vmem:[%s12343_s0 + $0x4] ss:$12 sps:$4 sm:$0xff]   ;;  %v8422_v8 = vld [vmem:[%s12343_s0] ss:$12 sps:$4 sm:$0xff]   ;;  %v8428_v12 = vld [vmem:[%s12342_s1 + $0x128] ss:$16 sps:$4 sm:$0xff]  }
  0x18   :  { %767 = vmatpush1.bf16.msra.mxu1 %v8360_v24  ;;  %695 = vmatprep.subr.bf16.mxu0 %v8361_v25  ;;  %v8404_v56 = vld [vmem:[%s12342_s1 + $0x1a4] ss:$16 sps:$4 sm:$0xff]   ;;  %v8409_v59 = vld [vmem:[%s12342_s1 + $0x1a0] ss:$16 sps:$4 sm:$0xff]   ;;  %v8437_v13 = vld [vmem:[%s12342_s1 + $0x14c] ss:$16 sps:$4 sm:$0xff]  }
  0x19   :  { %768 = vmatprep.subr.bf16.mxu1 %v8363_v26  ;;  %715 = vmatprep.mubr.bf16.mxu0 %v8424_v51  ;;  %v8410_v60 = vld [vmem:[%s12342_s1 + $0x1c4] ss:$16 sps:$4 sm:$0xff]   ;;  %v8415_v0 = vld [vmem:[%s12342_s1 + $0x1c0] ss:$16 sps:$4 sm:$0xff]   ;;  %v8435_v15 = vld [vmem:[%s12342_s1 + $0x148] ss:$16 sps:$4 sm:$0xff]  }
  0x1a   :  { %v8416_v2 = vld [vmem:[%s12342_s1 + $0x1e4] ss:$16 sps:$4 sm:$0xff]   ;;  %v8421_v5 = vld [vmem:[%s12342_s1 + $0x1e0] ss:$16 sps:$4 sm:$0xff]   ;;  %v8440_v17 = vld [vmem:[%s12342_s1 + $0x16c] ss:$16 sps:$4 sm:$0xff]  }
  0x1b   :  { %696 = vmatpush1.bf16.msra.mxu0 %v8365_v27  ;;  %v8434_v14 = vld [vmem:[%s12343_s0 + $0x18] ss:$12 sps:$4 sm:$0xff]   ;;  %v8441_v16 = vld [vmem:[%s12343_s0 + $0x34] ss:$12 sps:$4 sm:$0xff]   ;;  %v8447_v21 = vld [vmem:[%s12342_s1 + $0x18c] ss:$16 sps:$4 sm:$0xff]  }
  0x1c   :  { %769 = vmatpush1.bf16.msra.mxu1 %v8366_v28  ;;  %697 = vmatprep.subr.bf16.mxu0 %v8367_v29  ;;  %v8485_v18 = vld [vmem:[%s12344_s3] ss:$28 sps:$4 sm:$0xff]   ;;  %v8438_v20 = vld [vmem:[%s12342_s1 + $0x168] ss:$16 sps:$4 sm:$0xff]  }
  0x1d   :  { %770 = vmatprep.subr.bf16.mxu1 %v8369_v30  ;;  %v8487_v19 = vld [vmem:[%s12344_s3 + $0x4] ss:$28 sps:$4 sm:$0xff]   ;;  %v8444_v22 = vld [vmem:[%s12343_s0 + $0x30] ss:$12 sps:$4 sm:$0xff]   ;;  %v8445_v24 = vld [vmem:[%s12342_s1 + $0x188] ss:$16 sps:$4 sm:$0xff]  }
  0x1e   :  { %v8493_v23 = vld [vmem:[%s12344_s3 + $0x3c] ss:$28 sps:$4 sm:$0xff]   ;;  %v8454_v30 = vld [vmem:[%s12343_s0 + $0x48] ss:$12 sps:$4 sm:$0xff]  }
  0x1f   :  { %698 = vmatpush1.bf16.msra.mxu0 %v8371_v31  ;;  %v8451_v25 = vld [vmem:[%s12343_s0 + $0x4c] ss:$12 sps:$4 sm:$0xff]  }
  0x20   :  { %771 = vmatpush1.bf16.msra.mxu1 %v8372_v32  ;;  %699 = vmatprep.subr.bf16.mxu0 %v8373_v33  ;;  %v8491_v26 = vld [vmem:[%s12344_s3 + $0x38] ss:$28 sps:$4 sm:$0xff]   ;;  %v8450_v27 = vld [vmem:[%s12342_s1 + $0x1ac] ss:$16 sps:$4 sm:$0xff]  }
  0x21   :  { %829 = vmatprep.subr.bf16.mxu1 %v8378_v34  ;;  %v8448_v28 = vld [vmem:[%s12342_s1 + $0x1a8] ss:$16 sps:$4 sm:$0xff]   ;;  %v8457_v29 = vld [vmem:[%s12342_s1 + $0x1cc] ss:$16 sps:$4 sm:$0xff]  }
  0x22   :  { %v8455_v31 = vld [vmem:[%s12342_s1 + $0x1c8] ss:$16 sps:$4 sm:$0xff]   ;;  %v8460_v32 = vld [vmem:[%s12342_s1 + $0x1ec] ss:$16 sps:$4 sm:$0xff]  }
  0x23   :  { %789 = vmatmul.mubr.bf16.vlgmr.msra.gmra.mrb[0].mxu1 %v9650_v35  ;;  %700 = vmatpush1.bf16.msra.mxu0 %v8379_v37  ;;  %v8458_v33 = vld [vmem:[%s12342_s1 + $0x1e8] ss:$16 sps:$4 sm:$0xff]   ;;  %v8463_v34 = vld [vmem:[%s12342_s1 + $0x20c] ss:$16 sps:$4 sm:$0xff]  }
  0x24   :  { %830 = vmatpush1.bf16.msra.mxu1 %v8376_v36  ;;  %701 = vmatprep.subr.bf16.mxu0 %v8380_v38  ;;  %v8461_v36 = vld [vmem:[%s12342_s1 + $0x208] ss:$16 sps:$4 sm:$0xff]   ;;  %v8466_v37 = vld [vmem:[%s12342_s1 + $0x22c] ss:$16 sps:$4 sm:$0xff]  }
  0x25   :  { %831 = vmatprep.subr.bf16.mxu1 %v8384_v39  ;;  %798 = vmatprep.mubr.bf16.mxu1 %v9501_v1  ;;  %v8464_v38 = vld [vmem:[%s12342_s1 + $0x228] ss:$16 sps:$4 sm:$0xff]   ;;  %v8469_v39 = vld [vmem:[%s12342_s1 + $0x24c] ss:$16 sps:$4 sm:$0xff]  }
  0x27   :  { %702 = vmatpush1.bf16.msra.mxu0 %v8385_v41  ;;  %v8472_v41 = vld [vmem:[%s12342_s1 + $0x26c] ss:$16 sps:$4 sm:$0xff]  }
  0x28   :  { %832 = vmatpush1.bf16.msra.mxu1 %v8382_v40  ;;  %703 = vmatprep.subr.bf16.mxu0 %v8386_v42  ;;  %v8467_v40 = vld [vmem:[%s12342_s1 + $0x248] ss:$16 sps:$4 sm:$0xff]  }
  0x29   :  { %833 = vmatprep.subr.bf16.mxu1 %v8390_v43  ;;  %v8470_v42 = vld [vmem:[%s12342_s1 + $0x268] ss:$16 sps:$4 sm:$0xff]   ;;  %v8475_v43 = vld [vmem:[%s12342_s1 + $0x28c] ss:$16 sps:$4 sm:$0xff]  }
  0x2b   :  { %704 = vmatpush1.bf16.msra.mxu0 %v8391_v45  ;;  %799 = vmatmul.mubr.bf16.gmra.mrb[4].mxu1 %v9714_v55  ;;  %v8478_v45 = vld [vmem:[%s12342_s1 + $0x2ac] ss:$16 sps:$4 sm:$0xff]  }
  0x2c   :  { %834 = vmatpush1.bf16.msra.mxu1 %v8388_v44  ;;  %705 = vmatprep.subr.bf16.mxu0 %v8392_v46  ;;  %v8473_v44 = vld [vmem:[%s12342_s1 + $0x288] ss:$16 sps:$4 sm:$0xff]  }
  0x2d   :  { %835 = vmatprep.subr.bf16.mxu1 %v8396_v47  ;;  %808 = vmatprep.mubr.bf16.mxu1 %v9501_v1  ;;  %v8476_v46 = vld [vmem:[%s12342_s1 + $0x2a8] ss:$16 sps:$4 sm:$0xff]   ;;  %v8499_v47 = vld [vmem:[%s12344_s3 + $0x74] ss:$28 sps:$4 sm:$0xff]  }
  0x2f   :  { %706 = vmatpush1.bf16.msra.mxu0 %v8397_v49  ;;  %v8497_v49 = vld [vmem:[%s12344_s3 + $0x70] ss:$28 sps:$4 sm:$0xff]  }
  0x30   :  { %836 = vmatpush1.bf16.msra.mxu1 %v8394_v48  ;;  %707 = vmatprep.subr.bf16.mxu0 %v8398_v50  ;;  %v8481_v48 = vld [vmem:[%s12342_s1 + $0x2cc] ss:$16 sps:$4 sm:$0xff]   ;;  %v8479_v50 = vld [vmem:[%s12342_s1 + $0x2c8] ss:$16 sps:$4 sm:$0xff]  }
  0x31   :  { %837 = vmatprep.subr.bf16.mxu1 %v8402_v52  ;;  %v8484_v52 = vld [vmem:[%s12342_s1 + $0x2ec] ss:$16 sps:$4 sm:$0xff]  }
  0x33   :  { %708 = vmatpush1.bf16.msra.mxu0 %v8403_v54  ;;  %809 = vmatmul.mubr.bf16.gmra.mrb[8].mxu1 %v9739_v62  ;;  %v8511_v54 = vld [vmem:[%s12344_s3 + $0xe4] ss:$28 sps:$4 sm:$0xff]  }
  0x34   :  { %838 = vmatpush1.bf16.msra.mxu1 %v8400_v53  ;;  %709 = vmatprep.subr.bf16.mxu0 %v8404_v56  ;;  %v8503_v53 = vld [vmem:[%s12344_s3 + $0xa8] ss:$28 sps:$4 sm:$0xff]   ;;  %v8509_v56 = vld [vmem:[%s12344_s3 + $0xe0] ss:$28 sps:$4 sm:$0xff]  }
  0x35   :  { %839 = vmatprep.subr.bf16.mxu1 %v8408_v57  ;;  %818 = vmatprep.mubr.bf16.mxu1 %v9501_v1  ;;  %v8482_v57 = vld [vmem:[%s12342_s1 + $0x2e8] ss:$16 sps:$4 sm:$0xff]  }
  0x37   :  { %710 = vmatpush1.bf16.msra.mxu0 %v8409_v59  ;;  %v8490_v59 = vld [vmem:[%s12344_s3 + $0xc] ss:$28 sps:$4 sm:$0xff]  }
  0x38   :  { %840 = vmatpush1.bf16.msra.mxu1 %v8406_v58  ;;  %711 = vmatprep.subr.bf16.mxu0 %v8410_v60  ;;  %v8517_v58 = vld [vmem:[%s12344_s3 + $0x11c] ss:$28 sps:$4 sm:$0xff]  }
  0x39   :  { %841 = vmatprep.subr.bf16.mxu1 %v8414_v61  ;;  %v8515_v60 = vld [vmem:[%s12344_s3 + $0x118] ss:$28 sps:$4 sm:$0xff]   ;;  %v8488_v61 = vld [vmem:[%s12344_s3 + $0x8] ss:$28 sps:$4 sm:$0xff]  }
  0x3b   :  { %712 = vmatpush1.bf16.msra.mxu0 %v8415_v0  ;;  %819 = vmatmul.mubr.bf16.gmra.mrb[12].mxu1 %v9767_v7  ;;  %v8521_v0 = vld [vmem:[%s12344_s3 + $0x150] ss:$28 sps:$4 sm:$0xff]  }
  0x3c   :  { %842 = vmatpush1.bf16.msra.mxu1 %v8412_v63  ;;  %713 = vmatprep.subr.bf16.mxu0 %v8416_v2  ;;  %v8496_v63 = vld [vmem:[%s12344_s3 + $0x44] ss:$28 sps:$4 sm:$0xff]   ;;  %v8523_v2 = vld [vmem:[%s12344_s3 + $0x154] ss:$28 sps:$4 sm:$0xff]  }
  0x3d   :  { %843 = vmatprep.subr.bf16.mxu1 %v8420_v3  ;;  %861 = vmatprep.mubr.bf16.mxu1 %v8424_v51  ;;  %v8505_v51 = vld [vmem:[%s12344_s3 + $0xac] ss:$28 sps:$4 sm:$0xff]   ;;  %v8494_v3 = vld [vmem:[%s12344_s3 + $0x40] ss:$28 sps:$4 sm:$0xff]  }
  0x3f   :  { %714 = vmatpush1.bf16.msra.mxu0 %v8421_v5  ;;  %v8502_v5 = vld [vmem:[%s12344_s3 + $0x7c] ss:$28 sps:$4 sm:$0xff]  }
  0x40   :  { %844 = vmatpush1.bf16.msra.mxu1 %v8418_v4  ;;  %5400 = vmatprep.subr.bf16.mxu0 %v8487_v19  ;;  %v8529_v4 = vld [vmem:[%s12344_s3 + $0x18c] ss:$28 sps:$4 sm:$0xff]  }
  0x41   :  { %845 = vmatprep.subr.bf16.mxu1 %v8427_v6  ;;  %v8527_v6 = vld [vmem:[%s12344_s3 + $0x188] ss:$28 sps:$4 sm:$0xff]  }
  0x42   :  { %716 = vmatmul.mubr.bf16.vlgmr.msra.gmra.mrb[0].mxu0 %v8422_v8  ;;  %v8553_v19 = vld [vmem:[%s12344_s3 + $0x26c] ss:$28 sps:$4 sm:$0xff]  }
  0x43   :  { %725 = vmatprep.mubr.bf16.mxu0 %v8432_v10  ;;  %5401 = vmatpush1.bf16.msra.mxu0 %v8485_v18  ;;  %v8526_v18 = vld [vmem:[%s12344_s3 + $0x15c] ss:$28 sps:$4 sm:$0xff]  }
  0x44   :  { %846 = vmatpush1.bf16.msra.mxu1 %v8425_v9  ;;  %5402 = vmatprep.subr.bf16.mxu0 %v8493_v23  ;;  %v8535_v9 = vld [vmem:[%s12344_s3 + $0x1c4] ss:$28 sps:$4 sm:$0xff]  }
  0x45   :  { %847 = vmatprep.subr.bf16.mxu1 %v8430_v11  ;;  %v8506_v11 = vld [vmem:[%s12344_s3 + $0xb0] ss:$28 sps:$4 sm:$0xff]   ;;  %v8559_v23 = vld [vmem:[%s12344_s3 + $0x2a4] ss:$28 sps:$4 sm:$0xff]  }
  0x47   :  { %5403 = vmatpush1.bf16.msra.mxu0 %v8491_v26  ;;  %v8565_v26 = vld [vmem:[%s12344_s3 + $0x2dc] ss:$28 sps:$4 sm:$0xff]  }
  0x48   :  { %848 = vmatpush1.bf16.msra.mxu1 %v8428_v12  ;;  %5404 = vmatprep.subr.bf16.mxu0 %v8499_v47  ;;  %v8541_v12 = vld [vmem:[%s12344_s3 + $0x1fc] ss:$28 sps:$4 sm:$0xff]   ;;  %v8578_v47 = vld [vmem:[%s12344_s3 + $0x350] ss:$28 sps:$4 sm:$0xff]  }
  0x49   :  { %849 = vmatprep.subr.bf16.mxu1 %v8437_v13  ;;  %v8514_v13 = vld [vmem:[%s12344_s3 + $0xec] ss:$28 sps:$4 sm:$0xff]  }
  0x4a   :  { %726 = vmatmul.mubr.bf16.gmra.mrb[4].mxu0 %v8434_v14 }
  0x4b   :  { %735 = vmatprep.mubr.bf16.mxu0 %v8441_v16  ;;  %5405 = vmatpush1.bf16.msra.mxu0 %v8497_v49 }
  0x4c   :  { %850 = vmatpush1.bf16.msra.mxu1 %v8435_v15  ;;  %5406 = vmatprep.subr.bf16.mxu0 %v8505_v51  ;;  %v8512_v15 = vld [vmem:[%s12344_s3 + $0xe8] ss:$28 sps:$4 sm:$0xff]  }
  0x4d   :  { %851 = vmatprep.subr.bf16.mxu1 %v8440_v17  ;;  %v8547_v17 = vld [vmem:[%s12344_s3 + $0x234] ss:$28 sps:$4 sm:$0xff]  }
  0x4f   :  { %5407 = vmatpush1.bf16.msra.mxu0 %v8503_v53 }
  0x50   :  { %852 = vmatpush1.bf16.msra.mxu1 %v8438_v20  ;;  %5408 = vmatprep.subr.bf16.mxu0 %v8511_v54  ;;  %v8532_v20 = vld [vmem:[%s12344_s3 + $0x194] ss:$28 sps:$4 sm:$0xff]  }
  0x51   :  { %853 = vmatprep.subr.bf16.mxu1 %v8447_v21  ;;  %v8551_v21 = vld [vmem:[%s12344_s3 + $0x268] ss:$28 sps:$4 sm:$0xff]  }
  0x52   :  { %736 = vmatmul.mubr.bf16.gmra.mrb[8].mxu0 %v8444_v22 }
  0x53   :  { %745 = vmatprep.mubr.bf16.mxu0 %v8451_v25  ;;  %5409 = vmatpush1.bf16.msra.mxu0 %v8509_v56 }
  0x54   :  { %854 = vmatpush1.bf16.msra.mxu1 %v8445_v24  ;;  %5410 = vmatprep.subr.bf16.mxu0 %v8517_v58  ;;  %v8538_v24 = vld [vmem:[%s12344_s3 + $0x1cc] ss:$28 sps:$4 sm:$0xff]   ;;  %v979_v58 = vlaneseq }
  0x55   :  { %855 = vmatprep.subr.bf16.mxu1 %v8450_v27  ;;  %v8544_v27 = vld [vmem:[%s12344_s3 + $0x204] ss:$28 sps:$4 sm:$0xff]  }
  0x57   :  { %5411 = vmatpush1.bf16.msra.mxu0 %v8515_v60 }
  0x58   :  { %856 = vmatpush1.bf16.msra.mxu1 %v8448_v28  ;;  %5412 = vmatprep.subr.bf16.mxu0 %v8523_v2  ;;  %v8563_v28 = vld [vmem:[%s12344_s3 + $0x2d8] ss:$28 sps:$4 sm:$0xff]   ;;  %v10095_v2 = vld [vmem:[%s12345_s2] ss:$2 sm:$0xf] }
  0x59   :  { %857 = vmatprep.subr.bf16.mxu1 %v8457_v29  ;;  %v8542_v29 = vld [vmem:[%s12344_s3 + $0x200] ss:$28 sps:$4 sm:$0xff]  }
  0x5a   :  { %746 = vmatmul.mubr.bf16.gmra.mrb[12].mxu0 %v8454_v30 }
  0x5b   :  { %5413 = vmatpush1.bf16.msra.mxu0 %v8521_v0 }
  0x5c   :  { %858 = vmatpush1.bf16.msra.mxu1 %v8455_v31  ;;  %5414 = vmatprep.subr.bf16.mxu0 %v8529_v4  ;;  %v8550_v31 = vld [vmem:[%s12344_s3 + $0x23c] ss:$28 sps:$4 sm:$0xff]  }
  0x5d   :  { %859 = vmatprep.subr.bf16.mxu1 %v8460_v32  ;;  %v8569_v32 = vld [vmem:[%s12344_s3 + $0x310] ss:$28 sps:$4 sm:$0xff]  }
  0x5f   :  { %5415 = vmatpush1.bf16.msra.mxu0 %v8527_v6 }
  0x60   :  { %860 = vmatpush1.bf16.msra.mxu1 %v8458_v33  ;;  %5416 = vmatprep.subr.bf16.mxu0 %v8535_v9  ;;  %v8548_v33 = vld [vmem:[%s12344_s3 + $0x238] ss:$28 sps:$4 sm:$0xff]  }
  0x61   :  { %902 = vmatprep.subr.bf16.mxu1 %v8463_v34  ;;  %v8577_v34 = vld [vmem:[%s12344_s3 + $0x34c] ss:$28 sps:$4 sm:$0xff]  }
  0x63   :  { %862 = vmatmul.mubr.bf16.vlgmr.msra.gmra.mrb[16].mxu1 %v8422_v8  ;;  %v8500_v8 = vld [vmem:[%s12344_s3 + $0x78] ss:$28 sps:$4 sm:$0xff]  }
  0x64   :  { %903 = vmatpush1.bf16.msra.mxu1 %v8461_v36  ;;  %871 = vmatprep.mubr.bf16.mxu1 %v8432_v10  ;;  %v8533_v10 = vld [vmem:[%s12344_s3 + $0x1c0] ss:$28 sps:$4 sm:$0xff]   ;;  %v8556_v36 = vld [vmem:[%s12344_s3 + $0x274] ss:$28 sps:$4 sm:$0xff]  }
  0x65   :  { %904 = vmatprep.subr.bf16.mxu1 %v8466_v37  ;;  %5417 = vmatpush1.bf16.msra.mxu0 %v8533_v10  ;;  %v8575_v37 = vld [vmem:[%s12344_s3 + $0x348] ss:$28 sps:$4 sm:$0xff]  }
  0x66   :  { %5418 = vmatprep.subr.bf16.mxu0 %v8541_v12 }
  0x68   :  { %905 = vmatpush1.bf16.msra.mxu1 %v8464_v38  ;;  %v8554_v38 = vld [vmem:[%s12344_s3 + $0x270] ss:$28 sps:$4 sm:$0xff]  }
  0x69   :  { %906 = vmatprep.subr.bf16.mxu1 %v8469_v39  ;;  %v8583_v39 = vld [vmem:[%s12344_s3 + $0x384] ss:$28 sps:$4 sm:$0xff]  }
  0x6b   :  { %872 = vmatmul.mubr.bf16.gmra.mrb[20].mxu1 %v8434_v14  ;;  %v8539_v14 = vld [vmem:[%s12344_s3 + $0x1f8] ss:$28 sps:$4 sm:$0xff]  }
  0x6c   :  { %907 = vmatpush1.bf16.msra.mxu1 %v8467_v40  ;;  %881 = vmatprep.mubr.bf16.mxu1 %v8441_v16  ;;  %v8518_v16 = vld [vmem:[%s12344_s3 + $0x120] ss:$28 sps:$4 sm:$0xff]   ;;  %v8562_v40 = vld [vmem:[%s12344_s3 + $0x2ac] ss:$28 sps:$4 sm:$0xff]  }
  0x6d   :  { %908 = vmatprep.subr.bf16.mxu1 %v8472_v41  ;;  %5419 = vmatpush1.bf16.msra.mxu0 %v8539_v14  ;;  %v8560_v41 = vld [vmem:[%s12344_s3 + $0x2a8] ss:$28 sps:$4 sm:$0xff]  }
  0x6e   :  { %5420 = vmatprep.subr.bf16.mxu0 %v8547_v17 }
  0x70   :  { %909 = vmatpush1.bf16.msra.mxu1 %v8470_v42  ;;  %v8568_v42 = vld [vmem:[%s12344_s3 + $0x2e4] ss:$28 sps:$4 sm:$0xff]  }
  0x71   :  { %910 = vmatprep.subr.bf16.mxu1 %v8475_v43  ;;  %v8566_v43 = vld [vmem:[%s12344_s3 + $0x2e0] ss:$28 sps:$4 sm:$0xff]  }
  0x73   :  { %882 = vmatmul.mubr.bf16.gmra.mrb[24].mxu1 %v8444_v22  ;;  %v8530_v22 = vld [vmem:[%s12344_s3 + $0x190] ss:$28 sps:$4 sm:$0xff]  }
  0x74   :  { %911 = vmatpush1.bf16.msra.mxu1 %v8473_v44  ;;  %891 = vmatprep.mubr.bf16.mxu1 %v8451_v25  ;;  %v8557_v25 = vld [vmem:[%s12344_s3 + $0x2a0] ss:$28 sps:$4 sm:$0xff]  }
  0x75   :  { %912 = vmatprep.subr.bf16.mxu1 %v8478_v45  ;;  %v8574_v44 = vld [vmem:[%s12344_s3 + $0x31c] ss:$28 sps:$4 sm:$0xff]  }
  0x76   :  { %v8572_v45 = vld [vmem:[%s12344_s3 + $0x318] ss:$28 sps:$4 sm:$0xff]  }
  0x78   :  { %913 = vmatpush1.bf16.msra.mxu1 %v8476_v46  ;;  %v8580_v46 = vld [vmem:[%s12344_s3 + $0x354] ss:$28 sps:$4 sm:$0xff]  }
  0x79   :  { %914 = vmatprep.subr.bf16.mxu1 %v8481_v48  ;;  %v8586_v48 = vld [vmem:[%s12344_s3 + $0x38c] ss:$28 sps:$4 sm:$0xff]  }
  0x7b   :  { %892 = vmatmul.mubr.bf16.gmra.mrb[28].mxu1 %v8454_v30  ;;  %v8571_v30 = vld [vmem:[%s12344_s3 + $0x314] ss:$28 sps:$4 sm:$0xff]  }
  0x7c   :  { %915 = vmatpush1.bf16.msra.mxu1 %v8479_v50  ;;  %934 = vmatprep.mubr.bf16.mxu1 %v9501_v1 }
  0x7d   :  { %916 = vmatprep.subr.bf16.mxu1 %v8484_v52 }
  0x80   :  { %917 = vmatpush1.bf16.msra.mxu1 %v8482_v57 }
  0x81   :  { %5658 = vmatprep.subr.bf16.mxu1 %v8490_v59  ;;  %v10090_v59 = vshrl.u32 %v979_v58, 7 }
  0x83   :  { %935 = vmatmul.mubr.bf16.vlgmr.msra.gmra.mrb[16].mxu1 %v9650_v35  ;;  %v8508_v35 = vld [vmem:[%s12344_s3 + $0xb4] ss:$28 sps:$4 sm:$0xff]   ;;  %v10101_v4 = vsub.s32 1, %v10090_v59 }
  0x84   :  { %944 = vmatprep.mubr.bf16.mxu1 %v9501_v1  ;;  %5659 = vmatpush1.bf16.msra.mxu1 %v8488_v61 }
  0x85   :  { %5660 = vmatprep.subr.bf16.mxu1 %v8496_v63  ;;  %v10116_v9 = vrot.slane %v10095_v2, %v10101_v4 }
  0x88   :  { %5661 = vmatpush1.bf16.msra.mxu1 %v8494_v3  ;;  %v10098_v3 = vsub.s32 0, %v10090_v59 }
  0x89   :  { %5662 = vmatprep.subr.bf16.mxu1 %v8502_v5 }
  0x8a   :  { %v10105_v5 = vrot.slane %v10095_v2, %v10098_v3 }
  0x8b   :  { %945 = vmatmul.mubr.bf16.gmra.mrb[20].mxu1 %v9714_v55  ;;  %v8520_v55 = vld [vmem:[%s12344_s3 + $0x124] ss:$28 sps:$4 sm:$0xff]  }
  0x8c   :  { %954 = vmatprep.mubr.bf16.mxu1 %v9501_v1  ;;  %5663 = vmatpush1.bf16.msra.mxu1 %v8500_v8 }
  0x8d   :  { %5664 = vmatprep.subr.bf16.mxu1 %v8508_v35  ;;  %v10112_v35 = vld [vmem:[%s12345_s2 + $0x1] ss:$2 sm:$0xf] }
  0x8e   :  { %v10127_v17 = vrot.slane %v10112_v35, %v10098_v3 }
  0x90   :  { %5665 = vmatpush1.bf16.msra.mxu1 %v8506_v11 }
  0x91   :  { %5666 = vmatprep.subr.bf16.mxu1 %v8514_v13 }
  0x93   :  { %955 = vmatmul.mubr.bf16.gmra.mrb[24].mxu1 %v9739_v62  ;;  %v8545_v62 = vld [vmem:[%s12344_s3 + $0x230] ss:$28 sps:$4 sm:$0xff]  }
  0x94   :  { %964 = vmatprep.mubr.bf16.mxu1 %v9501_v1  ;;  %5667 = vmatpush1.bf16.msra.mxu1 %v8512_v15  ;;  %v8524_v1 = vld [vmem:[%s12344_s3 + $0x158] ss:$28 sps:$4 sm:$0xff]  }
  0x95   :  { %5668 = vmatprep.subr.bf16.mxu1 %v8520_v55  ;;  %5421 = vmatpush1.bf16.msra.mxu0 %v8545_v62 }
  0x96   :  { %5422 = vmatprep.subr.bf16.mxu0 %v8553_v19  ;;  %v10132_v19 = vrot.slane %v10112_v35, %v10101_v4 }
  0x98   :  { %5669 = vmatpush1.bf16.msra.mxu1 %v8518_v16 }
  0x99   :  { %5670 = vmatprep.subr.bf16.mxu1 %v8526_v18  ;;  %5423 = vmatpush1.bf16.msra.mxu0 %v8551_v21 }
  0x9a   :  { %5424 = vmatprep.subr.bf16.mxu0 %v8559_v23 }
  0x9b   :  { %965 = vmatmul.mubr.bf16.gmra.mrb[28].mxu1 %v9767_v7  ;;  %v8536_v7 = vld [vmem:[%s12344_s3 + $0x1c8] ss:$28 sps:$4 sm:$0xff]  }
  0x9c   :  { %5671 = vmatpush1.bf16.msra.mxu1 %v8524_v1 }
  0x9d   :  { %5672 = vmatprep.subr.bf16.mxu1 %v8532_v20  ;;  %5425 = vmatpush1.bf16.msra.mxu0 %v8557_v25 }
  0x9e   :  { %5426 = vmatprep.subr.bf16.mxu0 %v8565_v26 }
  0xa0   :  { %5673 = vmatpush1.bf16.msra.mxu1 %v8530_v22 }
  0xa1   :  { %5674 = vmatprep.subr.bf16.mxu1 %v8538_v24  ;;  %5427 = vmatpush1.bf16.msra.mxu0 %v8563_v28 }
  0xa2   :  { %5428 = vmatprep.subr.bf16.mxu0 %v8571_v30 }
  0xa4   :  { %5675 = vmatpush1.bf16.msra.mxu1 %v8536_v7 }
  0xa5   :  { %5676 = vmatprep.subr.bf16.mxu1 %v8544_v27  ;;  %5429 = vmatpush1.bf16.msra.mxu0 %v8569_v32 }
  0xa6   :  { %5430 = vmatprep.subr.bf16.mxu0 %v8577_v34 }
  0xa8   :  { %5677 = vmatpush1.bf16.msra.mxu1 %v8542_v29 }
  0xa9   :  { %5678 = vmatprep.subr.bf16.mxu1 %v8550_v31  ;;  %5431 = vmatpush1.bf16.msra.mxu0 %v8575_v37 }
  0xaa   :  { %5443 = vmatprep.subr.bf16.mxu0 %v8583_v39 }
  0xac   :  { %5679 = vmatpush1.bf16.msra.mxu1 %v8548_v33 }
  0xad   :  { %5680 = vmatprep.subr.bf16.mxu1 %v8556_v36 }
  0xb0   :  { %5681 = vmatpush1.bf16.msra.mxu1 %v8554_v38 }
  0xb1   :  { %5682 = vmatprep.subr.bf16.mxu1 %v8562_v40 }
  0xb4   :  { %5683 = vmatpush1.bf16.msra.mxu1 %v8560_v41 }
  0xb5   :  { %5684 = vmatprep.subr.bf16.mxu1 %v8568_v42 }
  0xb8   :  { %5685 = vmatpush1.bf16.msra.mxu1 %v8566_v43 }
  0xb9   :  { %5686 = vmatprep.subr.bf16.mxu1 %v8574_v44 }
  0xbc   :  { %5687 = vmatpush1.bf16.msra.mxu1 %v8572_v45 }
  0xbd   :  { %5688 = vmatprep.subr.bf16.mxu1 %v8580_v46 }
  0xc0   :  { %5689 = vmatpush1.bf16.msra.mxu1 %v8578_v47 }
  0xc1   :  { %5701 = vmatprep.subr.bf16.mxu1 %v8586_v48 }
  0xf6   :  { %v790_v49 = vpop.f32.mrb[0].mxu1 }
  0xf7   :  { %v792_v50 = vpop.f32.mrb[1].mxu1 }
  0xf8   :  { %v794_v51 = vpop.f32.mrb[2].mxu1 }
  0xf9   :  { %v796_v52 = vpop.f32.mrb[3].mxu1 }
  0xfe   :  { %v800_v53 = vpop.f32.mrb[4].mxu1 }
  0xff   :  { %v802_v54 = vpop.f32.mrb[5].mxu1 }
 0x100   :  { %v804_v56 = vpop.f32.mrb[6].mxu1 }
 0x101   :  { %v806_v57 = vpop.f32.mrb[7].mxu1 }
 0x106   :  { %v810_v60 = vpop.f32.mrb[8].mxu1 }
 0x107   :  { %v812_v61 = vpop.f32.mrb[9].mxu1 }
 0x108   :  { %v814_v63 = vpop.f32.mrb[10].mxu1 }
 0x109   :  { %v816_v0 = vpop.f32.mrb[11].mxu1 }
 0x10e   :  { %v10107_v6 = vpop.f32.mrb[12].mxu1 }
 0x10f   :  { %v10118_v10 = vpop.f32.mrb[13].mxu1 }
 0x110   :  { %v10120_v13 = vpop.f32.mrb[14].mxu1 }
 0x111   :  { %v10122_v55 = vpop.f32.mrb[15].mxu1 }
 0x115   :  { %v717_v8 = vpop.f32.mrb[0].mxu0 }
 0x116   :  { %v791_v11 = vadd.f32 %v790_v49, %v717_v8  ;;  %v719_v12 = vpop.f32.mrb[1].mxu0 }
 0x117   :  { %v793_v14 = vadd.f32 %v792_v50, %v719_v12  ;;  %v721_v15 = vpop.f32.mrb[2].mxu0 }
 0x118   :  { %v999_v16 = vmul.f32 %v10105_v5, %v791_v11  ;;  %v795_v18 = vadd.f32 %v794_v51, %v721_v15  ;;  %v723_v62 = vpop.f32.mrb[3].mxu0 }
 0x119   :  { %v1000_v1 = vmul.f32 %v10116_v9, %v793_v14  ;;  %v797_v20 = vadd.f32 %v796_v52, %v723_v62  ;;  %v8581_v14 = vld [vmem:[%s12344_s3 + $0x380] ss:$28 sps:$4 sm:$0xff]  }
 0x11a   :  { %v1028_v21 = vmul.f32 %v10105_v5, %v795_v18  ;;  %v1024_v23 = vadd.f32 %v10127_v17, %v999_v16  ;;  %v8589_v16 = vld [vmem:[%s12344_s3 + $0x3bc] ss:$28 sps:$4 sm:$0xff]  }
 0x11b   :  { %v1029_v22 = vmul.f32 %v10116_v9, %v797_v20  ;;  %v1025_v25 = vadd.f32 %v10132_v19, %v1000_v1 }
 0x11c   :  { %v1032_v24 = vadd.f32 %v1028_v21, %v10127_v17 }
 0x11d   :  { %v1033_v7 = vadd.f32 %v1029_v22, %v10132_v19  ;;  %v727_v26 = vpop.f32.mrb[4].mxu0 }
 0x11e   :  { %v1036_v27 = vmax.f32 %v1024_v23, %v1032_v24  ;;  %v801_v28 = vadd.f32 %v800_v53, %v727_v26  ;;  %v729_v29 = vpop.f32.mrb[5].mxu0  ;;  %v8587_v23 = vld [vmem:[%s12344_s3 + $0x3b8] ss:$28 sps:$4 sm:$0xff]   ;;  %v8590_v24 = vld [vmem:[%s12344_s3 + $0x3c0] ss:$28 sps:$4 sm:$0xff]  }
 0x11f   :  { %v1037_v30 = vmax.f32 %v1025_v25, %v1033_v7  ;;  %v803_v31 = vadd.f32 %v802_v54, %v729_v29  ;;  %v731_v32 = vpop.f32.mrb[6].mxu0 }
 0x120   :  { %v1044_v33 = vmul.f32 %v10105_v5, %v801_v28  ;;  %v805_v34 = vadd.f32 %v804_v56, %v731_v32  ;;  %v733_v36 = vpop.f32.mrb[7].mxu0  ;;  %v1040_v52 = vmax.f32 %v1036_v27, 0.0  ;;  %v8595_v27 = vld [vmem:[%s12344_s3 + $0x3f4] ss:$28 sps:$4 sm:$0xff]   ;;  %v8598_v28 = vld [vmem:[%s12344_s3 + $0x3fc] ss:$28 sps:$4 sm:$0xff]  }
 0x121   :  { %v1045_v37 = vmul.f32 %v10116_v9, %v803_v31  ;;  %v807_v38 = vadd.f32 %v806_v57, %v733_v36  ;;  %v1041_v58 = vmax.f32 %v1037_v30, 0.0 }
 0x122   :  { %v1052_v39 = vmul.f32 %v10105_v5, %v805_v34  ;;  %v1048_v41 = vadd.f32 %v1044_v33, %v10127_v17 }
 0x123   :  { %v1053_v40 = vmul.f32 %v10116_v9, %v807_v38  ;;  %v1049_v43 = vadd.f32 %v1045_v37, %v10132_v19 }
 0x124   :  { %v1056_v42 = vadd.f32 %v1052_v39, %v10127_v17 }
 0x125   :  { %v1057_v44 = vadd.f32 %v1053_v40, %v10132_v19  ;;  %v737_v45 = vpop.f32.mrb[8].mxu0  ;;  %v8593_v40 = vld [vmem:[%s12344_s3 + $0x3f0] ss:$28 sps:$4 sm:$0xff]  }
 0x126   :  { %v1060_v46 = vmax.f32 %v1048_v41, %v1056_v42  ;;  %v811_v47 = vadd.f32 %v810_v60, %v737_v45  ;;  %v739_v48 = vpop.f32.mrb[9].mxu0  ;;  %v8584_v60 = vld [vmem:[%s12344_s3 + $0x388] ss:$28 sps:$4 sm:$0xff]   ;;  %v8604_v45 = vld [vmem:[%s12344_s3 + $0x434] ss:$28 sps:$4 sm:$0xff]  }
 0x127   :  { %v1061_v49 = vmax.f32 %v1049_v43, %v1057_v44  ;;  %v813_v50 = vadd.f32 %v812_v61, %v739_v48  ;;  %v741_v51 = vpop.f32.mrb[10].mxu0  ;;  %v8601_v44 = vld [vmem:[%s12344_s3 + $0x42c] ss:$28 sps:$4 sm:$0xff]  }
 0x128   :  { %v1064_v53 = vmax.f32 %v1060_v46, 0.0  ;;  %v1068_v54 = vmul.f32 %v10105_v5, %v811_v47  ;;  %v815_v56 = vadd.f32 %v814_v63, %v741_v51  ;;  %v743_v57 = vpop.f32.mrb[11].mxu0 }
 0x129   :  { %v1065_v8 = vmax.f32 %v1061_v49, 0.0  ;;  %v1069_v11 = vmul.f32 %v10116_v9, %v813_v50  ;;  %v817_v12 = vadd.f32 %v816_v0, %v743_v57  ;;  %v8592_v0 = vld [vmem:[%s12344_s3 + $0x3c4] ss:$28 sps:$4 sm:$0xff]   ;;  %v8613_v57 = vld [vmem:[%s12344_s3 + $0x49c] ss:$28 sps:$4 sm:$0xff]  }
 0x12a   :  { %v10156_v61 = vpack.c.bf16 %v1064_v53, %v1040_v52  ;;  %v1072_v15 = vadd.f32 %v1068_v54, %v10127_v17  ;;  %v1076_v63 = vmul.f32 %v10105_v5, %v815_v56  ;;  %v8607_v50 = vld [vmem:[%s12344_s3 + $0x464] ss:$28 sps:$4 sm:$0xff]  }
 0x12b   :  { %v1073_v18 = vadd.f32 %v1069_v11, %v10132_v19  ;;  %v1077_v62 = vmul.f32 %v10116_v9, %v817_v12  ;;  %v10168_v1 = vpack.c.bf16 %v1065_v8, %v1041_v58  ;;  %v8605_v52 = vld [vmem:[%s12344_s3 + $0x460] ss:$28 sps:$4 sm:$0xff]   ;;  %v8619_v12 = vld [vmem:[%s12344_s3 + $0x4d4] ss:$28 sps:$4 sm:$0xff]  }
 0x12c   :  { %v1080_v20 = vadd.f32 %v1076_v63, %v10127_v17  ;;  %v8616_v58 = vld [vmem:[%s12344_s3 + $0x4a4] ss:$28 sps:$4 sm:$0xff]   ;;  %v8625_v63 = vld [vmem:[%s12344_s3 + $0x50c] ss:$28 sps:$4 sm:$0xff]  }
 0x12d   :  { %v1081_v21 = vadd.f32 %v1077_v62, %v10132_v19  ;;  %v747_v22 = vpop.f32.mrb[12].mxu0  ;;  %5432 = vmatprep.mubr.bf16.mxu0 %v10168_v1  ;;  %5690 = vmatprep.mubr.bf16.mxu1 %v10168_v1  ;;  %v8614_v11 = vld [vmem:[%s12344_s3 + $0x4a0] ss:$28 sps:$4 sm:$0xff]  }
 0x12e   :  { %v1084_v25 = vmax.f32 %v1072_v15, %v1080_v20  ;;  %v821_v7 = vadd.f32 %v10107_v6, %v747_v22  ;;  %v749_v26 = vpop.f32.mrb[13].mxu0  ;;  %5433 = vmatmul.mubr.bf16.vlgmr.msra.gmra.mrb[16].mxu0 %v10156_v61  ;;  %5691 = vmatmul.mubr.bf16.vlgmr.msra.gmra.mrb[32].mxu1 %v10156_v61  ;;  %v8620_v15 = vld [vmem:[%s12344_s3 + $0x4d8] ss:$28 sps:$4 sm:$0xff]   ;;  %v8631_v62 = vld [vmem:[%s12344_s3 + $0x544] ss:$28 sps:$4 sm:$0xff]  }
 0x12f   :  { %v1085_v29 = vmax.f32 %v1073_v18, %v1081_v21  ;;  %v823_v30 = vadd.f32 %v10118_v10, %v749_v26  ;;  %5444 = vmatpush1.bf16.msra.mxu0 %v8581_v14  ;;  %5702 = vmatpush1.bf16.msra.mxu1 %v8584_v60  ;;  %v751_v31 = vpop.f32.mrb[14].mxu0  ;;  %v8622_v14 = vld [vmem:[%s12344_s3 + $0x4dc] ss:$28 sps:$4 sm:$0xff]   ;;  %v8617_v60 = vld [vmem:[%s12344_s3 + $0x4d0] ss:$28 sps:$4 sm:$0xff]   ;;  %v10299_v26 = vsub.s32 2, %v10090_v59 }
 0x130   :  { %v1088_v6 = vmax.f32 %v1084_v25, 0.0  ;;  %v1092_v32 = vmul.f32 %v10105_v5, %v821_v7  ;;  %v825_v33 = vadd.f32 %v10120_v13, %v751_v31  ;;  %v753_v34 = vpop.f32.mrb[15].mxu0  ;;  %5445 = vmatprep.subr.bf16.mxu0 %v8589_v16  ;;  %5703 = vmatprep.subr.bf16.mxu1 %v8592_v0  ;;  %v8596_v13 = vld [vmem:[%s12344_s3 + $0x3f8] ss:$28 sps:$4 sm:$0xff]   ;;  %v8623_v0 = vld [vmem:[%s12344_s3 + $0x508] ss:$28 sps:$4 sm:$0xff]  }
 0x131   :  { %v1089_v36 = vmax.f32 %v1085_v29, 0.0  ;;  %v1093_v37 = vmul.f32 %v10116_v9, %v823_v30  ;;  %v827_v38 = vadd.f32 %v10122_v55, %v753_v34  ;;  %v8628_v16 = vld [vmem:[%s12344_s3 + $0x514] ss:$28 sps:$4 sm:$0xff]   ;;  %v8634_v20 = vld [vmem:[%s12344_s3 + $0x54c] ss:$28 sps:$4 sm:$0xff]  }
 0x132   :  { %v1096_v39 = vadd.f32 %v1092_v32, %v10127_v17  ;;  %v1100_v10 = vmul.f32 %v10105_v5, %v825_v33  ;;  %v10202_v41 = vpack.c.bf16 %v1088_v6, %v1064_v53  ;;  %v8608_v53 = vld [vmem:[%s12344_s3 + $0x468] ss:$28 sps:$4 sm:$0xff]   ;;  %v8626_v18 = vld [vmem:[%s12344_s3 + $0x510] ss:$28 sps:$4 sm:$0xff]   ;;  %v8629_v21 = vld [vmem:[%s12344_s3 + $0x540] ss:$28 sps:$4 sm:$0xff]   ;;  %v10326_v33 = vrot.slane %v10112_v35, %v10299_v26 }
 0x133   :  { %v1097_v42 = vadd.f32 %v1093_v37, %v10132_v19  ;;  %v1101_v43 = vmul.f32 %v10116_v9, %v827_v38  ;;  %5446 = vmatpush1.bf16.msra.mxu0 %v8587_v23  ;;  %5704 = vmatpush1.bf16.msra.mxu1 %v8590_v24  ;;  %v10206_v55 = vpack.c.bf16 %v1089_v36, %v1065_v8  ;;  %v8599_v9 = vld [vmem:[%s12344_s3 + $0x428] ss:$28 sps:$4 sm:$0xff]   ;;  %v8611_v8 = vld [vmem:[%s12344_s3 + $0x498] ss:$28 sps:$4 sm:$0xff]   ;;  %v8638_v7 = vld [vmem:[%s12344_s3 + $0x580] ss:$28 sps:$4 sm:$0xff]  }
 0x134   :  { %v1104_v5 = vadd.f32 %v1100_v10, %v10127_v17  ;;  %5447 = vmatprep.subr.bf16.mxu0 %v8595_v27  ;;  %5705 = vmatprep.subr.bf16.mxu1 %v8598_v28  ;;  %v8602_v17 = vld [vmem:[%s12344_s3 + $0x430] ss:$28 sps:$4 sm:$0xff]   ;;  %v8632_v22 = vld [vmem:[%s12344_s3 + $0x548] ss:$28 sps:$4 sm:$0xff]   ;;  %v8637_v23 = vld [vmem:[%s12344_s3 + $0x57c] ss:$28 sps:$4 sm:$0xff]  }
 0x135   :  { %v1105_v46 = vadd.f32 %v1101_v43, %v10132_v19  ;;  %v8610_v19 = vld [vmem:[%s12344_s3 + $0x46c] ss:$28 sps:$4 sm:$0xff]   ;;  %v8640_v24 = vld [vmem:[%s12344_s3 + $0x584] ss:$28 sps:$4 sm:$0xff]   ;;  %v8635_v25 = vld [vmem:[%s12344_s3 + $0x578] ss:$28 sps:$4 sm:$0xff]  }
 0x136   :  { %v1108_v47 = vmax.f32 %v1096_v39, %v1104_v5  ;;  %v10302_v27 = vsub.s32 3, %v10090_v59  ;;  %v8643_v28 = vld [vmem:[%s12344_s3 + $0x5b4] ss:$28 sps:$4 sm:$0xff]   ;;  %v8646_v29 = vld [vmem:[%s12344_s3 + $0x5bc] ss:$28 sps:$4 sm:$0xff]  }
 0x137   :  { %v1109_v48 = vmax.f32 %v1097_v42, %v1105_v46  ;;  %5448 = vmatpush1.bf16.msra.mxu0 %v8593_v40  ;;  %5706 = vmatpush1.bf16.msra.mxu1 %v8596_v13  ;;  %v8641_v30 = vld [vmem:[%s12344_s3 + $0x5b0] ss:$28 sps:$4 sm:$0xff]   ;;  %v8644_v31 = vld [vmem:[%s12344_s3 + $0x5b8] ss:$28 sps:$4 sm:$0xff]  }
 0x138   :  { %v1112_v49 = vmax.f32 %v1108_v47, 0.0  ;;  %5449 = vmatprep.subr.bf16.mxu0 %v8601_v44  ;;  %5707 = vmatprep.subr.bf16.mxu1 %v8604_v45  ;;  %v10322_v32 = vrot.slane %v10095_v2, %v10302_v27  ;;  %v8649_v34 = vld [vmem:[%s12344_s3 + $0x5ec] ss:$28 sps:$4 sm:$0xff]   ;;  %v10344_v13 = vrot.slane %v10112_v35, %v10302_v27  ;;  %v8655_v45 = vld [vmem:[%s12344_s3 + $0x624] ss:$28 sps:$4 sm:$0xff]  }
 0x139   :  { %v1113_v51 = vmax.f32 %v1109_v48, 0.0  ;;  %v8650_v38 = vld [vmem:[%s12344_s3 + $0x5f0] ss:$28 sps:$4 sm:$0xff]  }
 0x13a   :  { %v10234_v54 = vpack.c.bf16 %v1112_v49, %v1088_v6  ;;  %v10318_v6 = vrot.slane %v10095_v2, %v10299_v26  ;;  %v8647_v2 = vld [vmem:[%s12344_s3 + $0x5e8] ss:$28 sps:$4 sm:$0xff]  }
 0x13b   :  { %5450 = vmatpush1.bf16.msra.mxu0 %v8599_v9  ;;  %5708 = vmatpush1.bf16.msra.mxu1 %v8602_v17  ;;  %v10236_v56 = vpack.c.bf16 %v1113_v51, %v1089_v36  ;;  %v8652_v36 = vld [vmem:[%s12344_s3 + $0x5f4] ss:$28 sps:$4 sm:$0xff]   ;;  %v8658_v46 = vld [vmem:[%s12344_s3 + $0x62c] ss:$28 sps:$4 sm:$0xff]   ;;  %v8653_v9 = vld [vmem:[%s12344_s3 + $0x620] ss:$28 sps:$4 sm:$0xff]  }
 0x13c   :  { %5451 = vmatprep.subr.bf16.mxu0 %v8607_v50  ;;  %5709 = vmatprep.subr.bf16.mxu1 %v8610_v19  ;;  %v8656_v17 = vld [vmem:[%s12344_s3 + $0x628] ss:$28 sps:$4 sm:$0xff]   ;;  %v8661_v19 = vld [vmem:[%s12344_s3 + $0x65c] ss:$28 sps:$4 sm:$0xff]  }
 0x13d   :  { %v8664_v51 = vld [vmem:[%s12344_s3 + $0x664] ss:$28 sps:$4 sm:$0xff]  }
 0x13f   :  { %5452 = vmatpush1.bf16.msra.mxu0 %v8605_v52  ;;  %5710 = vmatpush1.bf16.msra.mxu1 %v8608_v53 }
 0x140   :  { %5453 = vmatprep.subr.bf16.mxu0 %v8613_v57  ;;  %5711 = vmatprep.subr.bf16.mxu1 %v8616_v58  ;;  %v8659_v57 = vld [vmem:[%s12344_s3 + $0x658] ss:$28 sps:$4 sm:$0xff]   ;;  %v8662_v58 = vld [vmem:[%s12344_s3 + $0x660] ss:$28 sps:$4 sm:$0xff]  }
 0x143   :  { %5454 = vmatpush1.bf16.msra.mxu0 %v8611_v8  ;;  %5712 = vmatpush1.bf16.msra.mxu1 %v8614_v11 }
 0x144   :  { %5455 = vmatprep.subr.bf16.mxu0 %v8619_v12  ;;  %5713 = vmatprep.subr.bf16.mxu1 %v8622_v14 }
 0x147   :  { %5456 = vmatpush1.bf16.msra.mxu0 %v8617_v60  ;;  %5714 = vmatpush1.bf16.msra.mxu1 %v8620_v15 }
 0x148   :  { %5457 = vmatprep.subr.bf16.mxu0 %v8625_v63  ;;  %5715 = vmatprep.subr.bf16.mxu1 %v8628_v16  ;;  %v8667_v16 = vld [vmem:[%s12344_s3 + $0x694] ss:$28 sps:$4 sm:$0xff]  }
 0x14b   :  { %5458 = vmatpush1.bf16.msra.mxu0 %v8623_v0  ;;  %5716 = vmatpush1.bf16.msra.mxu1 %v8626_v18  ;;  %v8670_v0 = vld [vmem:[%s12344_s3 + $0x69c] ss:$28 sps:$4 sm:$0xff]  }
 0x14c   :  { %5459 = vmatprep.subr.bf16.mxu0 %v8631_v62  ;;  %5717 = vmatprep.subr.bf16.mxu1 %v8634_v20  ;;  %v8665_v62 = vld [vmem:[%s12344_s3 + $0x690] ss:$28 sps:$4 sm:$0xff]   ;;  %v8668_v20 = vld [vmem:[%s12344_s3 + $0x698] ss:$28 sps:$4 sm:$0xff]  }
 0x14f   :  { %5460 = vmatpush1.bf16.msra.mxu0 %v8629_v21  ;;  %5718 = vmatpush1.bf16.msra.mxu1 %v8632_v22 }
 0x150   :  { %5461 = vmatprep.subr.bf16.mxu0 %v8637_v23  ;;  %5719 = vmatprep.subr.bf16.mxu1 %v8640_v24 }
 0x153   :  { %5462 = vmatpush1.bf16.msra.mxu0 %v8635_v25  ;;  %5720 = vmatpush1.bf16.msra.mxu1 %v8638_v7  ;;  %v8673_v25 = vld [vmem:[%s12344_s3 + $0x6cc] ss:$28 sps:$4 sm:$0xff]   ;;  %v8676_v7 = vld [vmem:[%s12344_s3 + $0x6d4] ss:$28 sps:$4 sm:$0xff]  }
 0x154   :  { %5463 = vmatprep.subr.bf16.mxu0 %v8643_v28  ;;  %5721 = vmatprep.subr.bf16.mxu1 %v8646_v29 }
 0x156   :  { %v936_v37 = vpop.f32.mrb[16].mxu1 }
 0x157   :  { %v1001_v39 = vmul.f32 %v10318_v6, %v936_v37  ;;  %v938_v10 = vpop.f32.mrb[17].mxu1  ;;  %5464 = vmatpush1.bf16.msra.mxu0 %v8641_v30  ;;  %5722 = vmatpush1.bf16.msra.mxu1 %v8644_v31 }
 0x158   :  { %v1002_v40 = vmul.f32 %v10322_v32, %v938_v10  ;;  %v940_v42 = vpop.f32.mrb[18].mxu1  ;;  %5465 = vmatprep.subr.bf16.mxu0 %v8649_v34  ;;  %5723 = vmatprep.subr.bf16.mxu1 %v8652_v36  ;;  %v8671_v34 = vld [vmem:[%s12344_s3 + $0x6c8] ss:$28 sps:$4 sm:$0xff]   ;;  %v8674_v36 = vld [vmem:[%s12344_s3 + $0x6d0] ss:$28 sps:$4 sm:$0xff]  }
 0x159   :  { %v1026_v43 = vadd.f32 %v10326_v33, %v1001_v39  ;;  %v1030_v5 = vmul.f32 %v10318_v6, %v940_v42  ;;  %v942_v44 = vpop.f32.mrb[19].mxu1 }
 0x15a   :  { %v1031_v35 = vmul.f32 %v10322_v32, %v942_v44  ;;  %v1027_v48 = vadd.f32 %v10344_v13, %v1002_v40 }
 0x15b   :  { %v1034_v47 = vadd.f32 %v1030_v5, %v10326_v33  ;;  %5466 = vmatpush1.bf16.msra.mxu0 %v8647_v2  ;;  %5724 = vmatpush1.bf16.msra.mxu1 %v8650_v38 }
 0x15c   :  { %v1035_v49 = vadd.f32 %v1031_v35, %v10344_v13  ;;  %5467 = vmatprep.subr.bf16.mxu0 %v8655_v45  ;;  %5725 = vmatprep.subr.bf16.mxu1 %v8658_v46  ;;  %v8679_v45 = vld [vmem:[%s12344_s3 + $0x704] ss:$28 sps:$4 sm:$0xff]  }
 0x15d   :  { %v1038_v50 = vmax.f32 %v1026_v43, %v1034_v47  ;;  %v8682_v47 = vld [vmem:[%s12344_s3 + $0x70c] ss:$28 sps:$4 sm:$0xff]  }
 0x15e   :  { %v1039_v52 = vmax.f32 %v1027_v48, %v1035_v49  ;;  %v946_v53 = vpop.f32.mrb[20].mxu1  ;;  %v8680_v49 = vld [vmem:[%s12344_s3 + $0x708] ss:$28 sps:$4 sm:$0xff]  }
 0x15f   :  { %v1046_v8 = vmul.f32 %v10318_v6, %v946_v53  ;;  %v948_v11 = vpop.f32.mrb[21].mxu1  ;;  %5468 = vmatpush1.bf16.msra.mxu0 %v8653_v9  ;;  %5726 = vmatpush1.bf16.msra.mxu1 %v8656_v17  ;;  %v1042_v28 = vmax.f32 %v1038_v50, 0.0  ;;  %v8677_v17 = vld [vmem:[%s12344_s3 + $0x700] ss:$28 sps:$4 sm:$0xff]  }
 0x160   :  { %v1047_v12 = vmul.f32 %v10322_v32, %v948_v11  ;;  %v950_v14 = vpop.f32.mrb[22].mxu1  ;;  %5469 = vmatprep.subr.bf16.mxu0 %v8661_v19  ;;  %5727 = vmatprep.subr.bf16.mxu1 %v8664_v51  ;;  %v1043_v29 = vmax.f32 %v1039_v52, 0.0  ;;  %v8685_v19 = vld [vmem:[%s12344_s3 + $0x73c] ss:$28 sps:$4 sm:$0xff]   ;;  %v8688_v51 = vld [vmem:[%s12344_s3 + $0x744] ss:$28 sps:$4 sm:$0xff]  }
 0x161   :  { %v1050_v60 = vadd.f32 %v1046_v8, %v10326_v33  ;;  %v1054_v15 = vmul.f32 %v10318_v6, %v950_v14  ;;  %v952_v63 = vpop.f32.mrb[23].mxu1 }
 0x162   :  { %v1055_v18 = vmul.f32 %v10322_v32, %v952_v63  ;;  %v1051_v22 = vadd.f32 %v1047_v12, %v10344_v13  ;;  %v8683_v12 = vld [vmem:[%s12344_s3 + $0x738] ss:$28 sps:$4 sm:$0xff]   ;;  %v8686_v63 = vld [vmem:[%s12344_s3 + $0x740] ss:$28 sps:$4 sm:$0xff]  }
 0x163   :  { %v1058_v21 = vadd.f32 %v1054_v15, %v10326_v33  ;;  %5470 = vmatpush1.bf16.msra.mxu0 %v8659_v57  ;;  %5728 = vmatpush1.bf16.msra.mxu1 %v8662_v58 }
 0x164   :  { %v1059_v23 = vadd.f32 %v1055_v18, %v10344_v13  ;;  %5471 = vmatprep.subr.bf16.mxu0 %v8667_v16  ;;  %5729 = vmatprep.subr.bf16.mxu1 %v8670_v0  ;;  %v8691_v16 = vld [vmem:[%s12344_s3 + $0x774] ss:$28 sps:$4 sm:$0xff]  }
 0x165   :  { %v1062_v24 = vmax.f32 %v1050_v60, %v1058_v21 }
 0x166   :  { %v1063_v30 = vmax.f32 %v1051_v22, %v1059_v23  ;;  %v956_v31 = vpop.f32.mrb[24].mxu1 }
 0x167   :  { %v1066_v37 = vmax.f32 %v1062_v24, 0.0  ;;  %v1070_v2 = vmul.f32 %v10318_v6, %v956_v31  ;;  %v958_v38 = vpop.f32.mrb[25].mxu1  ;;  %5472 = vmatpush1.bf16.msra.mxu0 %v8665_v62  ;;  %5730 = vmatpush1.bf16.msra.mxu1 %v8668_v20  ;;  %v8694_v24 = vld [vmem:[%s12344_s3 + $0x77c] ss:$28 sps:$4 sm:$0xff]  }
 0x168   :  { %v1067_v39 = vmax.f32 %v1063_v30, 0.0  ;;  %v1071_v10 = vmul.f32 %v10322_v32, %v958_v38  ;;  %v960_v40 = vpop.f32.mrb[26].mxu1  ;;  %5473 = vmatprep.subr.bf16.mxu0 %v8673_v25  ;;  %5731 = vmatprep.subr.bf16.mxu1 %v8676_v7  ;;  %v8689_v7 = vld [vmem:[%s12344_s3 + $0x770] ss:$28 sps:$4 sm:$0xff]  }
 0x169   :  { %v10410_v42 = vpack.c.bf16 %v1066_v37, %v1042_v28  ;;  %v1074_v43 = vadd.f32 %v1070_v2, %v10326_v33  ;;  %v1078_v5 = vmul.f32 %v10318_v6, %v960_v40  ;;  %v962_v44 = vpop.f32.mrb[27].mxu1  ;;  %v8703_v2 = vld [vmem:[%s12344_s3 + $0x7e4] ss:$28 sps:$4 sm:$0xff]  }
 0x16a   :  { %v10417_v46 = vpack.c.bf16 %v1067_v39, %v1043_v29  ;;  %v1075_v35 = vadd.f32 %v1071_v10, %v10344_v13  ;;  %v1079_v9 = vmul.f32 %v10322_v32, %v962_v44  ;;  %v8697_v29 = vld [vmem:[%s12344_s3 + $0x7ac] ss:$28 sps:$4 sm:$0xff]   ;;  %v8712_v44 = vld [vmem:[%s12344_s3 + $0x824] ss:$28 sps:$4 sm:$0xff]  }
 0x16b   :  { %v1082_v48 = vadd.f32 %v1078_v5, %v10326_v33  ;;  %5474 = vmatpush1.bf16.msra.mxu0 %v8671_v34  ;;  %5732 = vmatpush1.bf16.msra.mxu1 %v8674_v36  ;;  %v8706_v10 = vld [vmem:[%s12344_s3 + $0x7ec] ss:$28 sps:$4 sm:$0xff]   ;;  %v8707_v5 = vld [vmem:[%s12344_s3 + $0x818] ss:$28 sps:$4 sm:$0xff]  }
 0x16c   :  { %v1083_v50 = vadd.f32 %v1079_v9, %v10344_v13  ;;  %5475 = vmatprep.mubr.bf16.mxu0 %v10417_v46  ;;  %5733 = vmatprep.mubr.bf16.mxu1 %v10417_v46  ;;  %v8704_v40 = vld [vmem:[%s12344_s3 + $0x7e8] ss:$28 sps:$4 sm:$0xff]   ;;  %v8713_v9 = vld [vmem:[%s12344_s3 + $0x850] ss:$28 sps:$4 sm:$0xff]  }
 0x16d   :  { %v1086_v52 = vmax.f32 %v1074_v43, %v1082_v48  ;;  %5486 = vmatprep.subr.bf16.mxu0 %v8679_v45  ;;  %5744 = vmatprep.subr.bf16.mxu1 %v8682_v47  ;;  %v8709_v43 = vld [vmem:[%s12344_s3 + $0x81c] ss:$28 sps:$4 sm:$0xff]   ;;  %v8721_v48 = vld [vmem:[%s12344_s3 + $0x88c] ss:$28 sps:$4 sm:$0xff]  }
 0x16e   :  { %v1087_v53 = vmax.f32 %v1075_v35, %v1083_v50  ;;  %v966_v57 = vpop.f32.mrb[28].mxu1  ;;  %5476 = vmatmul.mubr.bf16.vlgmr.msra.gmra.mrb[16].mxu0 %v10410_v42  ;;  %5734 = vmatmul.mubr.bf16.vlgmr.msra.gmra.mrb[32].mxu1 %v10410_v42  ;;  %v8710_v45 = vld [vmem:[%s12344_s3 + $0x820] ss:$28 sps:$4 sm:$0xff]   ;;  %v8715_v35 = vld [vmem:[%s12344_s3 + $0x854] ss:$28 sps:$4 sm:$0xff]  }
 0x16f   :  { %v1090_v58 = vmax.f32 %v1086_v52, 0.0  ;;  %v1094_v8 = vmul.f32 %v10318_v6, %v966_v57  ;;  %v968_v11 = vpop.f32.mrb[29].mxu1  ;;  %5487 = vmatpush1.bf16.msra.mxu0 %v8677_v17  ;;  %5518 = vmatprep.mubr.bf16.mxu0 %v10206_v55  ;;  %v8718_v17 = vld [vmem:[%s12344_s3 + $0x85c] ss:$28 sps:$4 sm:$0xff]   ;;  %v8724_v50 = vld [vmem:[%s12344_s3 + $0x894] ss:$28 sps:$4 sm:$0xff]  }
 0x170   :  { %v1091_v14 = vmax.f32 %v1087_v53, 0.0  ;;  %v1095_v60 = vmul.f32 %v10322_v32, %v968_v11  ;;  %v970_v15 = vpop.f32.mrb[30].mxu1  ;;  %5745 = vmatpush1.bf16.msra.mxu1 %v8680_v49  ;;  %5776 = vmatprep.mubr.bf16.mxu1 %v10206_v55  ;;  %v8716_v47 = vld [vmem:[%s12344_s3 + $0x858] ss:$28 sps:$4 sm:$0xff]   ;;  %v8719_v49 = vld [vmem:[%s12344_s3 + $0x888] ss:$28 sps:$4 sm:$0xff]  }
 0x171   :  { %v10454_v0 = vpack.c.bf16 %v1090_v58, %v1066_v37  ;;  %v1098_v18 = vadd.f32 %v1094_v8, %v10326_v33  ;;  %v1102_v62 = vmul.f32 %v10318_v6, %v970_v15  ;;  %v972_v20 = vpop.f32.mrb[31].mxu1  ;;  %5488 = vmatprep.subr.bf16.mxu0 %v8685_v19  ;;  %5746 = vmatprep.subr.bf16.mxu1 %v8688_v51  ;;  %v8698_v37 = vld [vmem:[%s12344_s3 + $0x7b0] ss:$28 sps:$4 sm:$0xff]   ;;  %v8727_v51 = vld [vmem:[%s12344_s3 + $0x8c4] ss:$28 sps:$4 sm:$0xff]  }
 0x172   :  { %v10459_v21 = vpack.c.bf16 %v1091_v14, %v1067_v39  ;;  %v1099_v22 = vadd.f32 %v1095_v60, %v10344_v13  ;;  %v1103_v23 = vmul.f32 %v10322_v32, %v972_v20  ;;  %v8692_v32 = vld [vmem:[%s12344_s3 + $0x778] ss:$28 sps:$4 sm:$0xff]   ;;  %v8701_v39 = vld [vmem:[%s12344_s3 + $0x7e0] ss:$28 sps:$4 sm:$0xff]   ;;  %v8722_v19 = vld [vmem:[%s12344_s3 + $0x890] ss:$28 sps:$4 sm:$0xff]  }
 0x173   :  { %v1106_v25 = vadd.f32 %v1102_v62, %v10326_v33  ;;  %5489 = vmatpush1.bf16.msra.mxu0 %v8683_v12  ;;  %v8695_v33 = vld [vmem:[%s12344_s3 + $0x7a8] ss:$28 sps:$4 sm:$0xff]   ;;  %v8725_v52 = vld [vmem:[%s12344_s3 + $0x8c0] ss:$28 sps:$4 sm:$0xff]   ;;  %v8731_v8 = vld [vmem:[%s12344_s3 + $0x8f8] ss:$28 sps:$4 sm:$0xff]  }
 0x174   :  { %v1107_v6 = vadd.f32 %v1103_v23, %v10344_v13  ;;  %5747 = vmatpush1.bf16.msra.mxu1 %v8686_v63  ;;  %5490 = vmatprep.subr.bf16.mxu0 %v8691_v16  ;;  %v8700_v13 = vld [vmem:[%s12344_s3 + $0x7b4] ss:$28 sps:$4 sm:$0xff]   ;;  %v8730_v53 = vld [vmem:[%s12344_s3 + $0x8cc] ss:$28 sps:$4 sm:$0xff]   ;;  %v8736_v11 = vld [vmem:[%s12344_s3 + $0x904] ss:$28 sps:$4 sm:$0xff]  }
 0x175   :  { %v1110_v28 = vmax.f32 %v1098_v18, %v1106_v25  ;;  %5748 = vmatprep.subr.bf16.mxu1 %v8694_v24  ;;  %v8728_v57 = vld [vmem:[%s12344_s3 + $0x8c8] ss:$28 sps:$4 sm:$0xff]   ;;  %v8734_v12 = vld [vmem:[%s12344_s3 + $0x900] ss:$28 sps:$4 sm:$0xff]   ;;  %v8737_v60 = vld [vmem:[%s12344_s3 + $0x930] ss:$28 sps:$4 sm:$0xff]  }
 0x176   :  { %v1111_v30 = vmax.f32 %v1099_v22, %v1107_v6  ;;  %v8742_v15 = vld [vmem:[%s12344_s3 + $0x93c] ss:$28 sps:$4 sm:$0xff]   ;;  %v8745_v16 = vld [vmem:[%s12344_s3 + $0x96c] ss:$28 sps:$4 sm:$0xff]   ;;  %v8748_v62 = vld [vmem:[%s12344_s3 + $0x974] ss:$28 sps:$4 sm:$0xff]  }
 0x177   :  { %v1114_v31 = vmax.f32 %v1110_v28, 0.0  ;;  %5491 = vmatpush1.bf16.msra.mxu0 %v8689_v7  ;;  %v8740_v63 = vld [vmem:[%s12344_s3 + $0x938] ss:$28 sps:$4 sm:$0xff]   ;;  %v8743_v18 = vld [vmem:[%s12344_s3 + $0x968] ss:$28 sps:$4 sm:$0xff]  }
 0x178   :  { %v1115_v34 = vmax.f32 %v1111_v30, 0.0  ;;  %5749 = vmatpush1.bf16.msra.mxu1 %v8692_v32  ;;  %5492 = vmatprep.subr.bf16.mxu0 %v8697_v29  ;;  %v8746_v20 = vld [vmem:[%s12344_s3 + $0x970] ss:$28 sps:$4 sm:$0xff]   ;;  %v8751_v22 = vld [vmem:[%s12344_s3 + $0x9a4] ss:$28 sps:$4 sm:$0xff]  }
 0x179   :  { %v10483_v36 = vpack.c.bf16 %v1114_v31, %v1090_v58  ;;  %5750 = vmatprep.subr.bf16.mxu1 %v8700_v13  ;;  %v8733_v58 = vld [vmem:[%s12344_s3 + $0x8fc] ss:$28 sps:$4 sm:$0xff]   ;;  %v8754_v24 = vld [vmem:[%s12344_s3 + $0x9ac] ss:$28 sps:$4 sm:$0xff]   ;;  %v8760_v28 = vld [vmem:[%s12344_s3 + $0x9e4] ss:$28 sps:$4 sm:$0xff]  }
 0x17a   :  { %v10491_v38 = vpack.c.bf16 %v1115_v34, %v1091_v14  ;;  %v8739_v14 = vld [vmem:[%s12344_s3 + $0x934] ss:$28 sps:$4 sm:$0xff]   ;;  %v8749_v23 = vld [vmem:[%s12344_s3 + $0x9a0] ss:$28 sps:$4 sm:$0xff]   ;;  %v8752_v25 = vld [vmem:[%s12344_s3 + $0x9a8] ss:$28 sps:$4 sm:$0xff]  }
 0x17b   :  { %5493 = vmatpush1.bf16.msra.mxu0 %v8695_v33  ;;  %v8757_v7 = vld [vmem:[%s12344_s3 + $0x9dc] ss:$28 sps:$4 sm:$0xff]   ;;  %v8763_v29 = vld [vmem:[%s12344_s3 + $0xa14] ss:$28 sps:$4 sm:$0xff]   ;;  %v8769_v31 = vld [vmem:[%s12344_s3 + $0xa4c] ss:$28 sps:$4 sm:$0xff]  }
 0x17c   :  { %5751 = vmatpush1.bf16.msra.mxu1 %v8698_v37  ;;  %5494 = vmatprep.subr.bf16.mxu0 %v8703_v2  ;;  %v8755_v6 = vld [vmem:[%s12344_s3 + $0x9d8] ss:$28 sps:$4 sm:$0xff]   ;;  %v8758_v32 = vld [vmem:[%s12344_s3 + $0x9e0] ss:$28 sps:$4 sm:$0xff]   ;;  %v8761_v30 = vld [vmem:[%s12344_s3 + $0xa10] ss:$28 sps:$4 sm:$0xff]  }
 0x17d   :  { %5752 = vmatprep.subr.bf16.mxu1 %v8706_v10  ;;  %v8766_v33 = vld [vmem:[%s12344_s3 + $0xa1c] ss:$28 sps:$4 sm:$0xff]   ;;  %v8767_v34 = vld [vmem:[%s12344_s3 + $0xa48] ss:$28 sps:$4 sm:$0xff]   ;;  %v8772_v37 = vld [vmem:[%s12344_s3 + $0xa54] ss:$28 sps:$4 sm:$0xff]  }
 0x17e   :  { %v8764_v13 = vld [vmem:[%s12344_s3 + $0xa18] ss:$28 sps:$4 sm:$0xff]   ;;  %v8770_v2 = vld [vmem:[%s12344_s3 + $0xa50] ss:$28 sps:$4 sm:$0xff]  }
 0x17f   :  { %5495 = vmatpush1.bf16.msra.mxu0 %v8701_v39  ;;  %v8775_v39 = vld [vmem:[%s12344_s3 + $0xa84] ss:$28 sps:$4 sm:$0xff]   ;;  %v8778_v10 = vld [vmem:[%s12344_s3 + $0xa8c] ss:$28 sps:$4 sm:$0xff]  }
 0x180   :  { %5753 = vmatpush1.bf16.msra.mxu1 %v8704_v40  ;;  %5496 = vmatprep.subr.bf16.mxu0 %v8709_v43  ;;  %v8773_v40 = vld [vmem:[%s12344_s3 + $0xa80] ss:$28 sps:$4 sm:$0xff]   ;;  %v8776_v43 = vld [vmem:[%s12344_s3 + $0xa88] ss:$28 sps:$4 sm:$0xff]  }
 0x181   :  { %5754 = vmatprep.subr.bf16.mxu1 %v8712_v44  ;;  %v8779_v44 = vld [vmem:[%s12344_s3 + $0xab8] ss:$28 sps:$4 sm:$0xff]  }
 0x183   :  { %5497 = vmatpush1.bf16.msra.mxu0 %v8707_v5  ;;  %v8781_v5 = vld [vmem:[%s12344_s3 + $0xabc] ss:$28 sps:$4 sm:$0xff]  }
 0x184   :  { %5755 = vmatpush1.bf16.msra.mxu1 %v8710_v45  ;;  %5498 = vmatprep.subr.bf16.mxu0 %v8715_v35  ;;  %v8782_v45 = vld [vmem:[%s12344_s3 + $0xac0] ss:$28 sps:$4 sm:$0xff]  }
 0x185   :  { %5756 = vmatprep.subr.bf16.mxu1 %v8718_v17  ;;  %v8784_v35 = vld [vmem:[%s12344_s3 + $0xac4] ss:$28 sps:$4 sm:$0xff]   ;;  %v8790_v17 = vld [vmem:[%s12344_s3 + $0xafc] ss:$28 sps:$4 sm:$0xff]  }
 0x187   :  { %5499 = vmatpush1.bf16.msra.mxu0 %v8713_v9  ;;  %v8787_v9 = vld [vmem:[%s12344_s3 + $0xaf4] ss:$28 sps:$4 sm:$0xff]  }
 0x188   :  { %5757 = vmatpush1.bf16.msra.mxu1 %v8716_v47  ;;  %5500 = vmatprep.subr.bf16.mxu0 %v8721_v48  ;;  %v8785_v47 = vld [vmem:[%s12344_s3 + $0xaf0] ss:$28 sps:$4 sm:$0xff]   ;;  %v8788_v48 = vld [vmem:[%s12344_s3 + $0xaf8] ss:$28 sps:$4 sm:$0xff]  }
 0x189   :  { %5758 = vmatprep.subr.bf16.mxu1 %v8724_v50  ;;  %v8791_v50 = vld [vmem:[%s12344_s3 + $0xb28] ss:$28 sps:$4 sm:$0xff]  }
 0x18b   :  { %5501 = vmatpush1.bf16.msra.mxu0 %v8719_v49  ;;  %v8793_v49 = vld [vmem:[%s12344_s3 + $0xb2c] ss:$28 sps:$4 sm:$0xff]  }
 0x18c   :  { %5759 = vmatpush1.bf16.msra.mxu1 %v8722_v19  ;;  %5502 = vmatprep.subr.bf16.mxu0 %v8727_v51  ;;  %v8796_v19 = vld [vmem:[%s12344_s3 + $0xb34] ss:$28 sps:$4 sm:$0xff]  }
 0x18d   :  { %5760 = vmatprep.subr.bf16.mxu1 %v8730_v53  ;;  %v8794_v51 = vld [vmem:[%s12344_s3 + $0xb30] ss:$28 sps:$4 sm:$0xff]   ;;  %v8797_v53 = vld [vmem:[%s12344_s3 + $0xb60] ss:$28 sps:$4 sm:$0xff]  }
 0x18f   :  { %5503 = vmatpush1.bf16.msra.mxu0 %v8725_v52  ;;  %v8799_v52 = vld [vmem:[%s12344_s3 + $0xb64] ss:$28 sps:$4 sm:$0xff]  }
 0x190   :  { %5761 = vmatpush1.bf16.msra.mxu1 %v8728_v57  ;;  %5504 = vmatprep.subr.bf16.mxu0 %v8733_v58  ;;  %v8802_v57 = vld [vmem:[%s12344_s3 + $0xb6c] ss:$28 sps:$4 sm:$0xff]  }
 0x191   :  { %5762 = vmatprep.subr.bf16.mxu1 %v8736_v11  ;;  %v8800_v58 = vld [vmem:[%s12344_s3 + $0xb68] ss:$28 sps:$4 sm:$0xff]  }
 0x192   :  { %v8808_v11 = vld [vmem:[%s12344_s3 + $0xba4] ss:$28 sps:$4 sm:$0xff]  }
 0x193   :  { %5505 = vmatpush1.bf16.msra.mxu0 %v8731_v8  ;;  %v8805_v8 = vld [vmem:[%s12344_s3 + $0xb9c] ss:$28 sps:$4 sm:$0xff]  }
 0x194   :  { %5763 = vmatpush1.bf16.msra.mxu1 %v8734_v12  ;;  %5506 = vmatprep.subr.bf16.mxu0 %v8739_v14  ;;  %v8803_v12 = vld [vmem:[%s12344_s3 + $0xb98] ss:$28 sps:$4 sm:$0xff]   ;;  %v8806_v14 = vld [vmem:[%s12344_s3 + $0xba0] ss:$28 sps:$4 sm:$0xff]  }
 0x195   :  { %5764 = vmatprep.subr.bf16.mxu1 %v8742_v15  ;;  %v8814_v15 = vld [vmem:[%s12344_s3 + $0xbdc] ss:$28 sps:$4 sm:$0xff]  }
 0x197   :  { %5507 = vmatpush1.bf16.msra.mxu0 %v8737_v60  ;;  %v8811_v60 = vld [vmem:[%s12344_s3 + $0xbd4] ss:$28 sps:$4 sm:$0xff]  }
 0x198   :  { %5765 = vmatpush1.bf16.msra.mxu1 %v8740_v63  ;;  %5508 = vmatprep.subr.bf16.mxu0 %v8745_v16  ;;  %v8809_v63 = vld [vmem:[%s12344_s3 + $0xbd0] ss:$28 sps:$4 sm:$0xff]   ;;  %v8812_v16 = vld [vmem:[%s12344_s3 + $0xbd8] ss:$28 sps:$4 sm:$0xff]  }
 0x199   :  { %5766 = vmatprep.subr.bf16.mxu1 %v8748_v62  ;;  %v8820_v62 = vld [vmem:[%s12344_s3 + $0xc14] ss:$28 sps:$4 sm:$0xff]  }
 0x19b   :  { %5509 = vmatpush1.bf16.msra.mxu0 %v8743_v18  ;;  %v8817_v18 = vld [vmem:[%s12344_s3 + $0xc0c] ss:$28 sps:$4 sm:$0xff]  }
 0x19c   :  { %5767 = vmatpush1.bf16.msra.mxu1 %v8746_v20  ;;  %5510 = vmatprep.subr.bf16.mxu0 %v8751_v22  ;;  %v8815_v20 = vld [vmem:[%s12344_s3 + $0xc08] ss:$28 sps:$4 sm:$0xff]   ;;  %v8818_v22 = vld [vmem:[%s12344_s3 + $0xc10] ss:$28 sps:$4 sm:$0xff]  }
 0x19d   :  { %5768 = vmatprep.subr.bf16.mxu1 %v8754_v24  ;;  %v8826_v24 = vld [vmem:[%s12344_s3 + $0xc4c] ss:$28 sps:$4 sm:$0xff]  }
 0x19f   :  { %5511 = vmatpush1.bf16.msra.mxu0 %v8749_v23  ;;  %v8823_v23 = vld [vmem:[%s12344_s3 + $0xc44] ss:$28 sps:$4 sm:$0xff]  }
 0x1a0   :  { %5769 = vmatpush1.bf16.msra.mxu1 %v8752_v25  ;;  %5512 = vmatprep.subr.bf16.mxu0 %v8757_v7  ;;  %v8821_v25 = vld [vmem:[%s12344_s3 + $0xc40] ss:$28 sps:$4 sm:$0xff]   ;;  %v8824_v7 = vld [vmem:[%s12344_s3 + $0xc48] ss:$28 sps:$4 sm:$0xff]  }
 0x1a1   :  { %5770 = vmatprep.subr.bf16.mxu1 %v8760_v28  ;;  %v8832_v28 = vld [vmem:[%s12344_s3 + $0xc84] ss:$28 sps:$4 sm:$0xff]  }
 0x1a3   :  { %5513 = vmatpush1.bf16.msra.mxu0 %v8755_v6  ;;  %v8829_v6 = vld [vmem:[%s12344_s3 + $0xc7c] ss:$28 sps:$4 sm:$0xff]  }
 0x1a4   :  { %5771 = vmatpush1.bf16.msra.mxu1 %v8758_v32  ;;  %5514 = vmatprep.subr.bf16.mxu0 %v8763_v29  ;;  %v8827_v32 = vld [vmem:[%s12344_s3 + $0xc78] ss:$28 sps:$4 sm:$0xff]   ;;  %v8830_v29 = vld [vmem:[%s12344_s3 + $0xc80] ss:$28 sps:$4 sm:$0xff]  }
 0x1a5   :  { %5772 = vmatprep.subr.bf16.mxu1 %v8766_v33  ;;  %v8838_v33 = vld [vmem:[%s12344_s3 + $0xcbc] ss:$28 sps:$4 sm:$0xff]  }
 0x1a7   :  { %5515 = vmatpush1.bf16.msra.mxu0 %v8761_v30  ;;  %v8835_v30 = vld [vmem:[%s12344_s3 + $0xcb4] ss:$28 sps:$4 sm:$0xff]  }
 0x1a8   :  { %5773 = vmatpush1.bf16.msra.mxu1 %v8764_v13  ;;  %5516 = vmatprep.subr.bf16.mxu0 %v8769_v31  ;;  %v8833_v13 = vld [vmem:[%s12344_s3 + $0xcb0] ss:$28 sps:$4 sm:$0xff]   ;;  %v8836_v31 = vld [vmem:[%s12344_s3 + $0xcb8] ss:$28 sps:$4 sm:$0xff]  }
 0x1a9   :  { %5774 = vmatprep.subr.bf16.mxu1 %v8772_v37  ;;  %v8844_v37 = vld [vmem:[%s12344_s3 + $0xcf4] ss:$28 sps:$4 sm:$0xff]  }
 0x1ab   :  { %5517 = vmatpush1.bf16.msra.mxu0 %v8767_v34  ;;  %v8841_v34 = vld [vmem:[%s12344_s3 + $0xcec] ss:$28 sps:$4 sm:$0xff]  }
 0x1ac   :  { %5775 = vmatpush1.bf16.msra.mxu1 %v8770_v2  ;;  %5529 = vmatprep.subr.bf16.mxu0 %v8775_v39  ;;  %v8839_v2 = vld [vmem:[%s12344_s3 + $0xce8] ss:$28 sps:$4 sm:$0xff]   ;;  %v8842_v39 = vld [vmem:[%s12344_s3 + $0xcf0] ss:$28 sps:$4 sm:$0xff]  }
 0x1ad   :  { %5787 = vmatprep.subr.bf16.mxu1 %v8778_v10  ;;  %v8847_v10 = vld [vmem:[%s12344_s3 + $0xd24] ss:$28 sps:$4 sm:$0xff]  }
 0x1ae   :  { %5519 = vmatmul.mubr.bf16.vlgmr.msra.gmra.mrb[16].mxu0 %v10202_v41 }
 0x1af   :  { %5777 = vmatmul.mubr.bf16.vlgmr.msra.gmra.mrb[32].mxu1 %v10202_v41  ;;  %5530 = vmatpush1.bf16.msra.mxu0 %v8773_v40  ;;  %v8850_v40 = vld [vmem:[%s12344_s3 + $0xd2c] ss:$28 sps:$4 sm:$0xff]  }
 0x1b0   :  { %5561 = vmatprep.mubr.bf16.mxu0 %v10459_v21  ;;  %5788 = vmatpush1.bf16.msra.mxu1 %v8776_v43  ;;  %v8845_v43 = vld [vmem:[%s12344_s3 + $0xd20] ss:$28 sps:$4 sm:$0xff]  }
 0x1b1   :  { %5819 = vmatprep.mubr.bf16.mxu1 %v10459_v21  ;;  %5531 = vmatprep.subr.bf16.mxu0 %v8781_v5  ;;  %v8848_v5 = vld [vmem:[%s12344_s3 + $0xd28] ss:$28 sps:$4 sm:$0xff]  }
 0x1b2   :  { %5789 = vmatprep.subr.bf16.mxu1 %v8784_v35  ;;  %v8851_v35 = vld [vmem:[%s12344_s3 + $0xd58] ss:$28 sps:$4 sm:$0xff]  }
 0x1b3   :  { %5532 = vmatpush1.bf16.msra.mxu0 %v8779_v44  ;;  %v8853_v44 = vld [vmem:[%s12344_s3 + $0xd5c] ss:$28 sps:$4 sm:$0xff]  }
 0x1b4   :  { %5790 = vmatpush1.bf16.msra.mxu1 %v8782_v45  ;;  %5533 = vmatprep.subr.bf16.mxu0 %v8787_v9  ;;  %v8856_v45 = vld [vmem:[%s12344_s3 + $0xd64] ss:$28 sps:$4 sm:$0xff]  }
 0x1b5   :  { %5791 = vmatprep.subr.bf16.mxu1 %v8790_v17  ;;  %v8854_v9 = vld [vmem:[%s12344_s3 + $0xd60] ss:$28 sps:$4 sm:$0xff]   ;;  %v8859_v17 = vld [vmem:[%s12344_s3 + $0xd94] ss:$28 sps:$4 sm:$0xff]  }
 0x1b7   :  { %5534 = vmatpush1.bf16.msra.mxu0 %v8785_v47  ;;  %v8862_v47 = vld [vmem:[%s12344_s3 + $0xd9c] ss:$28 sps:$4 sm:$0xff]  }
 0x1b8   :  { %5792 = vmatpush1.bf16.msra.mxu1 %v8788_v48  ;;  %5535 = vmatprep.subr.bf16.mxu0 %v8793_v49  ;;  %v8857_v48 = vld [vmem:[%s12344_s3 + $0xd90] ss:$28 sps:$4 sm:$0xff]   ;;  %v8860_v49 = vld [vmem:[%s12344_s3 + $0xd98] ss:$28 sps:$4 sm:$0xff]  }
 0x1b9   :  { %5793 = vmatprep.subr.bf16.mxu1 %v8796_v19  ;;  %v8868_v19 = vld [vmem:[%s12344_s3 + $0xdd4] ss:$28 sps:$4 sm:$0xff]  }
 0x1bb   :  { %5536 = vmatpush1.bf16.msra.mxu0 %v8791_v50  ;;  %v8865_v50 = vld [vmem:[%s12344_s3 + $0xdcc] ss:$28 sps:$4 sm:$0xff]  }
 0x1bc   :  { %5794 = vmatpush1.bf16.msra.mxu1 %v8794_v51  ;;  %5537 = vmatprep.subr.bf16.mxu0 %v8799_v52  ;;  %v8863_v51 = vld [vmem:[%s12344_s3 + $0xdc8] ss:$28 sps:$4 sm:$0xff]   ;;  %v8866_v52 = vld [vmem:[%s12344_s3 + $0xdd0] ss:$28 sps:$4 sm:$0xff]  }
 0x1bd   :  { %5795 = vmatprep.subr.bf16.mxu1 %v8802_v57  ;;  %v8874_v57 = vld [vmem:[%s12344_s3 + $0xe0c] ss:$28 sps:$4 sm:$0xff]  }
 0x1bf   :  { %5538 = vmatpush1.bf16.msra.mxu0 %v8797_v53  ;;  %v8871_v53 = vld [vmem:[%s12344_s3 + $0xe04] ss:$28 sps:$4 sm:$0xff]  }
 0x1c0   :  { %5796 = vmatpush1.bf16.msra.mxu1 %v8800_v58  ;;  %5539 = vmatprep.subr.bf16.mxu0 %v8805_v8  ;;  %v8869_v58 = vld [vmem:[%s12344_s3 + $0xe00] ss:$28 sps:$4 sm:$0xff]   ;;  %v8872_v8 = vld [vmem:[%s12344_s3 + $0xe08] ss:$28 sps:$4 sm:$0xff]  }
 0x1c1   :  { %5797 = vmatprep.subr.bf16.mxu1 %v8808_v11  ;;  %v8877_v11 = vld [vmem:[%s12344_s3 + $0xe3c] ss:$28 sps:$4 sm:$0xff]  }
 0x1c3   :  { %5540 = vmatpush1.bf16.msra.mxu0 %v8803_v12  ;;  %v8880_v12 = vld [vmem:[%s12344_s3 + $0xe44] ss:$28 sps:$4 sm:$0xff]  }
 0x1c4   :  { %5798 = vmatpush1.bf16.msra.mxu1 %v8806_v14  ;;  %5541 = vmatprep.subr.bf16.mxu0 %v8811_v60  ;;  %v8875_v14 = vld [vmem:[%s12344_s3 + $0xe38] ss:$28 sps:$4 sm:$0xff]   ;;  %v8878_v60 = vld [vmem:[%s12344_s3 + $0xe40] ss:$28 sps:$4 sm:$0xff]  }
 0x1c5   :  { %5799 = vmatprep.subr.bf16.mxu1 %v8814_v15  ;;  %v8883_v15 = vld [vmem:[%s12344_s3 + $0xe74] ss:$28 sps:$4 sm:$0xff]  }
 0x1c7   :  { %5542 = vmatpush1.bf16.msra.mxu0 %v8809_v63  ;;  %v8886_v63 = vld [vmem:[%s12344_s3 + $0xe7c] ss:$28 sps:$4 sm:$0xff]  }
 0x1c8   :  { %5800 = vmatpush1.bf16.msra.mxu1 %v8812_v16  ;;  %5543 = vmatprep.subr.bf16.mxu0 %v8817_v18  ;;  %v8881_v16 = vld [vmem:[%s12344_s3 + $0xe70] ss:$28 sps:$4 sm:$0xff]   ;;  %v8884_v18 = vld [vmem:[%s12344_s3 + $0xe78] ss:$28 sps:$4 sm:$0xff]  }
 0x1c9   :  { %5801 = vmatprep.subr.bf16.mxu1 %v8820_v62  ;;  %v8889_v62 = vld [vmem:[%s12344_s3 + $0xeac] ss:$28 sps:$4 sm:$0xff]  }
 0x1cb   :  { %5544 = vmatpush1.bf16.msra.mxu0 %v8815_v20  ;;  %v8892_v20 = vld [vmem:[%s12344_s3 + $0xeb4] ss:$28 sps:$4 sm:$0xff]  }
 0x1cc   :  { %5802 = vmatpush1.bf16.msra.mxu1 %v8818_v22  ;;  %5545 = vmatprep.subr.bf16.mxu0 %v8823_v23  ;;  %v8887_v22 = vld [vmem:[%s12344_s3 + $0xea8] ss:$28 sps:$4 sm:$0xff]   ;;  %v8890_v23 = vld [vmem:[%s12344_s3 + $0xeb0] ss:$28 sps:$4 sm:$0xff]  }
 0x1cd   :  { %5803 = vmatprep.subr.bf16.mxu1 %v8826_v24  ;;  %v8895_v24 = vld [vmem:[%s12344_s3 + $0xee4] ss:$28 sps:$4 sm:$0xff]  }
 0x1cf   :  { %5546 = vmatpush1.bf16.msra.mxu0 %v8821_v25  ;;  %v8898_v25 = vld [vmem:[%s12344_s3 + $0xeec] ss:$28 sps:$4 sm:$0xff]  }
 0x1d0   :  { %5804 = vmatpush1.bf16.msra.mxu1 %v8824_v7  ;;  %5547 = vmatprep.subr.bf16.mxu0 %v8829_v6  ;;  %v8893_v7 = vld [vmem:[%s12344_s3 + $0xee0] ss:$28 sps:$4 sm:$0xff]   ;;  %v8896_v6 = vld [vmem:[%s12344_s3 + $0xee8] ss:$28 sps:$4 sm:$0xff]  }
 0x1d1   :  { %5805 = vmatprep.subr.bf16.mxu1 %v8832_v28  ;;  %v8901_v28 = vld [vmem:[%s12344_s3 + $0xf1c] ss:$28 sps:$4 sm:$0xff]  }
 0x1d3   :  { %5548 = vmatpush1.bf16.msra.mxu0 %v8827_v32  ;;  %v8904_v32 = vld [vmem:[%s12344_s3 + $0xf24] ss:$28 sps:$4 sm:$0xff]  }
 0x1d4   :  { %5806 = vmatpush1.bf16.msra.mxu1 %v8830_v29  ;;  %5549 = vmatprep.subr.bf16.mxu0 %v8835_v30  ;;  %v8899_v29 = vld [vmem:[%s12344_s3 + $0xf18] ss:$28 sps:$4 sm:$0xff]   ;;  %v8902_v30 = vld [vmem:[%s12344_s3 + $0xf20] ss:$28 sps:$4 sm:$0xff]  }
 0x1d5   :  { %5807 = vmatprep.subr.bf16.mxu1 %v8838_v33  ;;  %v8907_v33 = vld [vmem:[%s12344_s3 + $0xf54] ss:$28 sps:$4 sm:$0xff]  }
 0x1d7   :  { %5550 = vmatpush1.bf16.msra.mxu0 %v8833_v13  ;;  %v8910_v13 = vld [vmem:[%s12344_s3 + $0xf5c] ss:$28 sps:$4 sm:$0xff]  }
 0x1d8   :  { %5808 = vmatpush1.bf16.msra.mxu1 %v8836_v31  ;;  %5551 = vmatprep.subr.bf16.mxu0 %v8841_v34  ;;  %v8905_v31 = vld [vmem:[%s12344_s3 + $0xf50] ss:$28 sps:$4 sm:$0xff]   ;;  %v8908_v34 = vld [vmem:[%s12344_s3 + $0xf58] ss:$28 sps:$4 sm:$0xff]  }
 0x1d9   :  { %5809 = vmatprep.subr.bf16.mxu1 %v8844_v37  ;;  %v8913_v37 = vld [vmem:[%s12344_s3 + $0xf8c] ss:$28 sps:$4 sm:$0xff]  }
 0x1db   :  { %5552 = vmatpush1.bf16.msra.mxu0 %v8839_v2  ;;  %v8916_v2 = vld [vmem:[%s12344_s3 + $0xf94] ss:$28 sps:$4 sm:$0xff]  }
 0x1dc   :  { %5810 = vmatpush1.bf16.msra.mxu1 %v8842_v39  ;;  %5553 = vmatprep.subr.bf16.mxu0 %v8847_v10  ;;  %v8911_v39 = vld [vmem:[%s12344_s3 + $0xf88] ss:$28 sps:$4 sm:$0xff]   ;;  %v8914_v10 = vld [vmem:[%s12344_s3 + $0xf90] ss:$28 sps:$4 sm:$0xff]  }
 0x1dd   :  { %5811 = vmatprep.subr.bf16.mxu1 %v8850_v40  ;;  %v8919_v40 = vld [vmem:[%s12344_s3 + $0xfc4] ss:$28 sps:$4 sm:$0xff]  }
 0x1df   :  { %5554 = vmatpush1.bf16.msra.mxu0 %v8845_v43  ;;  %v8922_v43 = vld [vmem:[%s12344_s3 + $0xfcc] ss:$28 sps:$4 sm:$0xff]  }
 0x1e0   :  { %5812 = vmatpush1.bf16.msra.mxu1 %v8848_v5  ;;  %5555 = vmatprep.subr.bf16.mxu0 %v8853_v44  ;;  %v8917_v5 = vld [vmem:[%s12344_s3 + $0xfc0] ss:$28 sps:$4 sm:$0xff]   ;;  %v8920_v44 = vld [vmem:[%s12344_s3 + $0xfc8] ss:$28 sps:$4 sm:$0xff]  }
 0x1e1   :  { %5813 = vmatprep.subr.bf16.mxu1 %v8856_v45  ;;  %v8925_v45 = vld [vmem:[%s12344_s3 + $0xffc] ss:$28 sps:$4 sm:$0xff]  }
 0x1e3   :  { %5556 = vmatpush1.bf16.msra.mxu0 %v8851_v35  ;;  %v8928_v35 = vld [vmem:[%s12344_s3 + $0x1004] ss:$28 sps:$4 sm:$0xff]  }
 0x1e4   :  { %5814 = vmatpush1.bf16.msra.mxu1 %v8854_v9  ;;  %5557 = vmatprep.subr.bf16.mxu0 %v8859_v17  ;;  %v8923_v9 = vld [vmem:[%s12344_s3 + $0xff8] ss:$28 sps:$4 sm:$0xff]   ;;  %v8926_v17 = vld [vmem:[%s12344_s3 + $0x1000] ss:$28 sps:$4 sm:$0xff]  }
 0x1e5   :  { %5815 = vmatprep.subr.bf16.mxu1 %v8862_v47  ;;  %v8931_v47 = vld [vmem:[%s12344_s3 + $0x1034] ss:$28 sps:$4 sm:$0xff]  }
 0x1e7   :  { %5558 = vmatpush1.bf16.msra.mxu0 %v8857_v48  ;;  %v8934_v48 = vld [vmem:[%s12344_s3 + $0x103c] ss:$28 sps:$4 sm:$0xff]  }
 0x1e8   :  { %5816 = vmatpush1.bf16.msra.mxu1 %v8860_v49  ;;  %5559 = vmatprep.subr.bf16.mxu0 %v8865_v50  ;;  %v8929_v49 = vld [vmem:[%s12344_s3 + $0x1030] ss:$28 sps:$4 sm:$0xff]   ;;  %v8932_v50 = vld [vmem:[%s12344_s3 + $0x1038] ss:$28 sps:$4 sm:$0xff]  }
 0x1e9   :  { %5817 = vmatprep.subr.bf16.mxu1 %v8868_v19  ;;  %v8937_v19 = vld [vmem:[%s12344_s3 + $0x106c] ss:$28 sps:$4 sm:$0xff]  }
 0x1eb   :  { %5560 = vmatpush1.bf16.msra.mxu0 %v8863_v51  ;;  %v8940_v51 = vld [vmem:[%s12344_s3 + $0x1074] ss:$28 sps:$4 sm:$0xff]  }
 0x1ec   :  { %5818 = vmatpush1.bf16.msra.mxu1 %v8866_v52  ;;  %5572 = vmatprep.subr.bf16.mxu0 %v8871_v53  ;;  %v8935_v52 = vld [vmem:[%s12344_s3 + $0x1068] ss:$28 sps:$4 sm:$0xff]   ;;  %v8938_v53 = vld [vmem:[%s12344_s3 + $0x1070] ss:$28 sps:$4 sm:$0xff]  }
 0x1ed   :  { %5830 = vmatprep.subr.bf16.mxu1 %v8874_v57  ;;  %v8943_v57 = vld [vmem:[%s12344_s3 + $0x10a4] ss:$28 sps:$4 sm:$0xff]  }
 0x1ee   :  { %5562 = vmatmul.mubr.bf16.vlgmr.msra.gmra.mrb[16].mxu0 %v10454_v0 }
 0x1ef   :  { %5820 = vmatmul.mubr.bf16.vlgmr.msra.gmra.mrb[32].mxu1 %v10454_v0  ;;  %5573 = vmatpush1.bf16.msra.mxu0 %v8869_v58  ;;  %v8946_v58 = vld [vmem:[%s12344_s3 + $0x10ac] ss:$28 sps:$4 sm:$0xff]  }
 0x1f0   :  { %5604 = vmatprep.mubr.bf16.mxu0 %v10236_v56  ;;  %5831 = vmatpush1.bf16.msra.mxu1 %v8872_v8  ;;  %v8941_v8 = vld [vmem:[%s12344_s3 + $0x10a0] ss:$28 sps:$4 sm:$0xff]  }
 0x1f1   :  { %5862 = vmatprep.mubr.bf16.mxu1 %v10236_v56  ;;  %5574 = vmatprep.subr.bf16.mxu0 %v8877_v11  ;;  %v8944_v11 = vld [vmem:[%s12344_s3 + $0x10a8] ss:$28 sps:$4 sm:$0xff]  }
 0x1f2   :  { %5832 = vmatprep.subr.bf16.mxu1 %v8880_v12  ;;  %v8949_v12 = vld [vmem:[%s12344_s3 + $0x10dc] ss:$28 sps:$4 sm:$0xff]  }
 0x1f3   :  { %5575 = vmatpush1.bf16.msra.mxu0 %v8875_v14  ;;  %v8952_v14 = vld [vmem:[%s12344_s3 + $0x10e4] ss:$28 sps:$4 sm:$0xff]  }
 0x1f4   :  { %5833 = vmatpush1.bf16.msra.mxu1 %v8878_v60  ;;  %5576 = vmatprep.subr.bf16.mxu0 %v8883_v15  ;;  %v8947_v60 = vld [vmem:[%s12344_s3 + $0x10d8] ss:$28 sps:$4 sm:$0xff]   ;;  %v8950_v15 = vld [vmem:[%s12344_s3 + $0x10e0] ss:$28 sps:$4 sm:$0xff]  }
 0x1f5   :  { %5834 = vmatprep.subr.bf16.mxu1 %v8886_v63  ;;  %v8955_v63 = vld [vmem:[%s12344_s3 + $0x1114] ss:$28 sps:$4 sm:$0xff]  }
 0x1f7   :  { %5577 = vmatpush1.bf16.msra.mxu0 %v8881_v16  ;;  %v8958_v16 = vld [vmem:[%s12344_s3 + $0x111c] ss:$28 sps:$4 sm:$0xff]  }
 0x1f8   :  { %5835 = vmatpush1.bf16.msra.mxu1 %v8884_v18  ;;  %5578 = vmatprep.subr.bf16.mxu0 %v8889_v62  ;;  %v8953_v18 = vld [vmem:[%s12344_s3 + $0x1110] ss:$28 sps:$4 sm:$0xff]   ;;  %v8956_v62 = vld [vmem:[%s12344_s3 + $0x1118] ss:$28 sps:$4 sm:$0xff]  }
 0x1f9   :  { %5836 = vmatprep.subr.bf16.mxu1 %v8892_v20  ;;  %v8961_v20 = vld [vmem:[%s12344_s3 + $0x114c] ss:$28 sps:$4 sm:$0xff]  }
 0x1fb   :  { %5579 = vmatpush1.bf16.msra.mxu0 %v8887_v22  ;;  %v8964_v22 = vld [vmem:[%s12344_s3 + $0x1154] ss:$28 sps:$4 sm:$0xff]  }
 0x1fc   :  { %5837 = vmatpush1.bf16.msra.mxu1 %v8890_v23  ;;  %5580 = vmatprep.subr.bf16.mxu0 %v8895_v24  ;;  %v8959_v23 = vld [vmem:[%s12344_s3 + $0x1148] ss:$28 sps:$4 sm:$0xff]   ;;  %v8962_v24 = vld [vmem:[%s12344_s3 + $0x1150] ss:$28 sps:$4 sm:$0xff]  }
 0x1fd   :  { %5838 = vmatprep.subr.bf16.mxu1 %v8898_v25  ;;  %v8967_v25 = vld [vmem:[%s12344_s3 + $0x1184] ss:$28 sps:$4 sm:$0xff]  }
 0x1ff   :  { %5581 = vmatpush1.bf16.msra.mxu0 %v8893_v7  ;;  %v8970_v7 = vld [vmem:[%s12344_s3 + $0x118c] ss:$28 sps:$4 sm:$0xff]  }
 0x200   :  { %5839 = vmatpush1.bf16.msra.mxu1 %v8896_v6  ;;  %5582 = vmatprep.subr.bf16.mxu0 %v8901_v28  ;;  %v8965_v6 = vld [vmem:[%s12344_s3 + $0x1180] ss:$28 sps:$4 sm:$0xff]   ;;  %v8968_v28 = vld [vmem:[%s12344_s3 + $0x1188] ss:$28 sps:$4 sm:$0xff]  }
 0x201   :  { %5840 = vmatprep.subr.bf16.mxu1 %v8904_v32  ;;  %v8973_v32 = vld [vmem:[%s12344_s3 + $0x11bc] ss:$28 sps:$4 sm:$0xff]  }
 0x203   :  { %5583 = vmatpush1.bf16.msra.mxu0 %v8899_v29  ;;  %v8976_v29 = vld [vmem:[%s12344_s3 + $0x11c4] ss:$28 sps:$4 sm:$0xff]  }
 0x204   :  { %5841 = vmatpush1.bf16.msra.mxu1 %v8902_v30  ;;  %5584 = vmatprep.subr.bf16.mxu0 %v8907_v33  ;;  %v8971_v30 = vld [vmem:[%s12344_s3 + $0x11b8] ss:$28 sps:$4 sm:$0xff]   ;;  %v8974_v33 = vld [vmem:[%s12344_s3 + $0x11c0] ss:$28 sps:$4 sm:$0xff]  }
 0x205   :  { %5842 = vmatprep.subr.bf16.mxu1 %v8910_v13  ;;  %v8979_v13 = vld [vmem:[%s12344_s3 + $0x11f4] ss:$28 sps:$4 sm:$0xff]  }
 0x207   :  { %5585 = vmatpush1.bf16.msra.mxu0 %v8905_v31  ;;  %v8982_v31 = vld [vmem:[%s12344_s3 + $0x11fc] ss:$28 sps:$4 sm:$0xff]  }
 0x208   :  { %5843 = vmatpush1.bf16.msra.mxu1 %v8908_v34  ;;  %5586 = vmatprep.subr.bf16.mxu0 %v8913_v37  ;;  %v8977_v34 = vld [vmem:[%s12344_s3 + $0x11f0] ss:$28 sps:$4 sm:$0xff]   ;;  %v8980_v37 = vld [vmem:[%s12344_s3 + $0x11f8] ss:$28 sps:$4 sm:$0xff]  }
 0x209   :  { %5844 = vmatprep.subr.bf16.mxu1 %v8916_v2  ;;  %v8985_v2 = vld [vmem:[%s12344_s3 + $0x122c] ss:$28 sps:$4 sm:$0xff]  }
 0x20b   :  { %5587 = vmatpush1.bf16.msra.mxu0 %v8911_v39  ;;  %v8988_v39 = vld [vmem:[%s12344_s3 + $0x1234] ss:$28 sps:$4 sm:$0xff]  }
 0x20c   :  { %5845 = vmatpush1.bf16.msra.mxu1 %v8914_v10  ;;  %5588 = vmatprep.subr.bf16.mxu0 %v8919_v40  ;;  %v8983_v10 = vld [vmem:[%s12344_s3 + $0x1228] ss:$28 sps:$4 sm:$0xff]   ;;  %v8986_v40 = vld [vmem:[%s12344_s3 + $0x1230] ss:$28 sps:$4 sm:$0xff]  }
 0x20d   :  { %5846 = vmatprep.subr.bf16.mxu1 %v8922_v43  ;;  %v8991_v43 = vld [vmem:[%s12344_s3 + $0x1264] ss:$28 sps:$4 sm:$0xff]  }
 0x20f   :  { %5589 = vmatpush1.bf16.msra.mxu0 %v8917_v5  ;;  %v8994_v5 = vld [vmem:[%s12344_s3 + $0x126c] ss:$28 sps:$4 sm:$0xff]  }
 0x210   :  { %5847 = vmatpush1.bf16.msra.mxu1 %v8920_v44  ;;  %5590 = vmatprep.subr.bf16.mxu0 %v8925_v45  ;;  %v8989_v44 = vld [vmem:[%s12344_s3 + $0x1260] ss:$28 sps:$4 sm:$0xff]   ;;  %v8992_v45 = vld [vmem:[%s12344_s3 + $0x1268] ss:$28 sps:$4 sm:$0xff]  }
 0x211   :  { %5848 = vmatprep.subr.bf16.mxu1 %v8928_v35  ;;  %v8997_v35 = vld [vmem:[%s12344_s3 + $0x129c] ss:$28 sps:$4 sm:$0xff]  }
 0x213   :  { %5591 = vmatpush1.bf16.msra.mxu0 %v8923_v9  ;;  %v9000_v9 = vld [vmem:[%s12344_s3 + $0x12a4] ss:$28 sps:$4 sm:$0xff]  }
 0x214   :  { %5849 = vmatpush1.bf16.msra.mxu1 %v8926_v17  ;;  %5592 = vmatprep.subr.bf16.mxu0 %v8931_v47  ;;  %v8995_v17 = vld [vmem:[%s12344_s3 + $0x1298] ss:$28 sps:$4 sm:$0xff]   ;;  %v8998_v47 = vld [vmem:[%s12344_s3 + $0x12a0] ss:$28 sps:$4 sm:$0xff]  }
 0x215   :  { %5850 = vmatprep.subr.bf16.mxu1 %v8934_v48  ;;  %v9003_v48 = vld [vmem:[%s12344_s3 + $0x12d4] ss:$28 sps:$4 sm:$0xff]  }
 0x217   :  { %5593 = vmatpush1.bf16.msra.mxu0 %v8929_v49  ;;  %v9006_v49 = vld [vmem:[%s12344_s3 + $0x12dc] ss:$28 sps:$4 sm:$0xff]  }
 0x218   :  { %5851 = vmatpush1.bf16.msra.mxu1 %v8932_v50  ;;  %5594 = vmatprep.subr.bf16.mxu0 %v8937_v19  ;;  %v9001_v50 = vld [vmem:[%s12344_s3 + $0x12d0] ss:$28 sps:$4 sm:$0xff]   ;;  %v9004_v19 = vld [vmem:[%s12344_s3 + $0x12d8] ss:$28 sps:$4 sm:$0xff]  }
 0x219   :  { %5852 = vmatprep.subr.bf16.mxu1 %v8940_v51  ;;  %v9009_v51 = vld [vmem:[%s12344_s3 + $0x130c] ss:$28 sps:$4 sm:$0xff]  }
 0x21b   :  { %5595 = vmatpush1.bf16.msra.mxu0 %v8935_v52  ;;  %v9012_v52 = vld [vmem:[%s12344_s3 + $0x1314] ss:$28 sps:$4 sm:$0xff]  }
 0x21c   :  { %5853 = vmatpush1.bf16.msra.mxu1 %v8938_v53  ;;  %5596 = vmatprep.subr.bf16.mxu0 %v8943_v57  ;;  %v9007_v53 = vld [vmem:[%s12344_s3 + $0x1308] ss:$28 sps:$4 sm:$0xff]   ;;  %v9010_v57 = vld [vmem:[%s12344_s3 + $0x1310] ss:$28 sps:$4 sm:$0xff]  }
 0x21d   :  { %5854 = vmatprep.subr.bf16.mxu1 %v8946_v58  ;;  %v9015_v58 = vld [vmem:[%s12344_s3 + $0x1344] ss:$28 sps:$4 sm:$0xff]  }
 0x21f   :  { %5597 = vmatpush1.bf16.msra.mxu0 %v8941_v8  ;;  %v9018_v8 = vld [vmem:[%s12344_s3 + $0x134c] ss:$28 sps:$4 sm:$0xff]  }
 0x220   :  { %5855 = vmatpush1.bf16.msra.mxu1 %v8944_v11  ;;  %5598 = vmatprep.subr.bf16.mxu0 %v8949_v12  ;;  %v9013_v11 = vld [vmem:[%s12344_s3 + $0x1340] ss:$28 sps:$4 sm:$0xff]   ;;  %v9016_v12 = vld [vmem:[%s12344_s3 + $0x1348] ss:$28 sps:$4 sm:$0xff]  }
 0x221   :  { %5856 = vmatprep.subr.bf16.mxu1 %v8952_v14  ;;  %v9021_v14 = vld [vmem:[%s12344_s3 + $0x137c] ss:$28 sps:$4 sm:$0xff]  }
 0x223   :  { %5599 = vmatpush1.bf16.msra.mxu0 %v8947_v60  ;;  %v9024_v60 = vld [vmem:[%s12344_s3 + $0x1384] ss:$28 sps:$4 sm:$0xff]  }
 0x224   :  { %5857 = vmatpush1.bf16.msra.mxu1 %v8950_v15  ;;  %5600 = vmatprep.subr.bf16.mxu0 %v8955_v63  ;;  %v9019_v15 = vld [vmem:[%s12344_s3 + $0x1378] ss:$28 sps:$4 sm:$0xff]   ;;  %v9022_v63 = vld [vmem:[%s12344_s3 + $0x1380] ss:$28 sps:$4 sm:$0xff]  }
 0x225   :  { %5858 = vmatprep.subr.bf16.mxu1 %v8958_v16  ;;  %v9027_v16 = vld [vmem:[%s12344_s3 + $0x13b4] ss:$28 sps:$4 sm:$0xff]  }
 0x227   :  { %5601 = vmatpush1.bf16.msra.mxu0 %v8953_v18  ;;  %v9030_v18 = vld [vmem:[%s12344_s3 + $0x13bc] ss:$28 sps:$4 sm:$0xff]  }
 0x228   :  { %5859 = vmatpush1.bf16.msra.mxu1 %v8956_v62  ;;  %5602 = vmatprep.subr.bf16.mxu0 %v8961_v20  ;;  %v9025_v62 = vld [vmem:[%s12344_s3 + $0x13b0] ss:$28 sps:$4 sm:$0xff]   ;;  %v9028_v20 = vld [vmem:[%s12344_s3 + $0x13b8] ss:$28 sps:$4 sm:$0xff]  }
 0x229   :  { %5860 = vmatprep.subr.bf16.mxu1 %v8964_v22  ;;  %v9033_v22 = vld [vmem:[%s12344_s3 + $0x13ec] ss:$28 sps:$4 sm:$0xff]  }
 0x22b   :  { %5603 = vmatpush1.bf16.msra.mxu0 %v8959_v23  ;;  %v9036_v23 = vld [vmem:[%s12344_s3 + $0x13f4] ss:$28 sps:$4 sm:$0xff]  }
 0x22c   :  { %5861 = vmatpush1.bf16.msra.mxu1 %v8962_v24  ;;  %5615 = vmatprep.subr.bf16.mxu0 %v8967_v25  ;;  %v9031_v24 = vld [vmem:[%s12344_s3 + $0x13e8] ss:$28 sps:$4 sm:$0xff]   ;;  %v9034_v25 = vld [vmem:[%s12344_s3 + $0x13f0] ss:$28 sps:$4 sm:$0xff]  }
 0x22d   :  { %5873 = vmatprep.subr.bf16.mxu1 %v8970_v7  ;;  %v9039_v7 = vld [vmem:[%s12344_s3 + $0x1424] ss:$28 sps:$4 sm:$0xff]  }
 0x22e   :  { %5605 = vmatmul.mubr.bf16.vlgmr.msra.gmra.mrb[16].mxu0 %v10234_v54 }
 0x22f   :  { %5863 = vmatmul.mubr.bf16.vlgmr.msra.gmra.mrb[32].mxu1 %v10234_v54  ;;  %5616 = vmatpush1.bf16.msra.mxu0 %v8965_v6  ;;  %v9042_v6 = vld [vmem:[%s12344_s3 + $0x142c] ss:$28 sps:$4 sm:$0xff]  }
 0x230   :  { %5647 = vmatprep.mubr.bf16.mxu0 %v10491_v38  ;;  %5874 = vmatpush1.bf16.msra.mxu1 %v8968_v28  ;;  %v9037_v28 = vld [vmem:[%s12344_s3 + $0x1420] ss:$28 sps:$4 sm:$0xff]  }
 0x231   :  { %5905 = vmatprep.mubr.bf16.mxu1 %v10491_v38  ;;  %5617 = vmatprep.subr.bf16.mxu0 %v8973_v32  ;;  %v9040_v32 = vld [vmem:[%s12344_s3 + $0x1428] ss:$28 sps:$4 sm:$0xff]  }
 0x232   :  { %5875 = vmatprep.subr.bf16.mxu1 %v8976_v29  ;;  %v9045_v29 = vld [vmem:[%s12344_s3 + $0x145c] ss:$28 sps:$4 sm:$0xff]  }
 0x233   :  { %5618 = vmatpush1.bf16.msra.mxu0 %v8971_v30  ;;  %v9048_v30 = vld [vmem:[%s12344_s3 + $0x1464] ss:$28 sps:$4 sm:$0xff]  }
 0x234   :  { %5876 = vmatpush1.bf16.msra.mxu1 %v8974_v33  ;;  %5619 = vmatprep.subr.bf16.mxu0 %v8979_v13  ;;  %v9043_v33 = vld [vmem:[%s12344_s3 + $0x1458] ss:$28 sps:$4 sm:$0xff]   ;;  %v9046_v13 = vld [vmem:[%s12344_s3 + $0x1460] ss:$28 sps:$4 sm:$0xff]  }
 0x235   :  { %5877 = vmatprep.subr.bf16.mxu1 %v8982_v31  ;;  %v9051_v31 = vld [vmem:[%s12344_s3 + $0x1494] ss:$28 sps:$4 sm:$0xff]  }
 0x237   :  { %5620 = vmatpush1.bf16.msra.mxu0 %v8977_v34  ;;  %v9054_v34 = vld [vmem:[%s12344_s3 + $0x149c] ss:$28 sps:$4 sm:$0xff]  }
 0x238   :  { %5878 = vmatpush1.bf16.msra.mxu1 %v8980_v37  ;;  %5621 = vmatprep.subr.bf16.mxu0 %v8985_v2  ;;  %v9049_v37 = vld [vmem:[%s12344_s3 + $0x1490] ss:$28 sps:$4 sm:$0xff]   ;;  %v9052_v2 = vld [vmem:[%s12344_s3 + $0x1498] ss:$28 sps:$4 sm:$0xff]  }
 0x239   :  { %5879 = vmatprep.subr.bf16.mxu1 %v8988_v39  ;;  %v9057_v39 = vld [vmem:[%s12344_s3 + $0x14cc] ss:$28 sps:$4 sm:$0xff]  }
 0x23b   :  { %5622 = vmatpush1.bf16.msra.mxu0 %v8983_v10  ;;  %v9060_v10 = vld [vmem:[%s12344_s3 + $0x14d4] ss:$28 sps:$4 sm:$0xff]  }
 0x23c   :  { %5880 = vmatpush1.bf16.msra.mxu1 %v8986_v40  ;;  %5623 = vmatprep.subr.bf16.mxu0 %v8991_v43  ;;  %v9055_v40 = vld [vmem:[%s12344_s3 + $0x14c8] ss:$28 sps:$4 sm:$0xff]   ;;  %v9058_v43 = vld [vmem:[%s12344_s3 + $0x14d0] ss:$28 sps:$4 sm:$0xff]  }
 0x23d   :  { %5881 = vmatprep.subr.bf16.mxu1 %v8994_v5  ;;  %v9063_v5 = vld [vmem:[%s12344_s3 + $0x14] ss:$28 sps:$4 sm:$0xff]  }
 0x23f   :  { %5624 = vmatpush1.bf16.msra.mxu0 %v8989_v44  ;;  %v9064_v44 = vld [vmem:[%s12344_s3 + $0x1d8] ss:$28 sps:$4 sm:$0xff]  }
 0x240   :  { %5882 = vmatpush1.bf16.msra.mxu1 %v8992_v45  ;;  %5625 = vmatprep.subr.bf16.mxu0 %v8997_v35  ;;  %v9061_v45 = vld [vmem:[%s12344_s3 + $0x10] ss:$28 sps:$4 sm:$0xff]   ;;  %v9065_v35 = vld [vmem:[%s12344_s3 + $0x18] ss:$28 sps:$4 sm:$0xff]  }
 0x241   :  { %5883 = vmatprep.subr.bf16.mxu1 %v9000_v9  ;;  %v9068_v9 = vld [vmem:[%s12344_s3 + $0x4c] ss:$28 sps:$4 sm:$0xff]  }
 0x243   :  { %5626 = vmatpush1.bf16.msra.mxu0 %v8995_v17  ;;  %v9069_v17 = vld [vmem:[%s12344_s3 + $0x210] ss:$28 sps:$4 sm:$0xff]  }
 0x244   :  { %5884 = vmatpush1.bf16.msra.mxu1 %v8998_v47  ;;  %5627 = vmatprep.subr.bf16.mxu0 %v9003_v48  ;;  %v9066_v47 = vld [vmem:[%s12344_s3 + $0x48] ss:$28 sps:$4 sm:$0xff]   ;;  %v9070_v48 = vld [vmem:[%s12344_s3 + $0x50] ss:$28 sps:$4 sm:$0xff]  }
 0x245   :  { %5885 = vmatprep.subr.bf16.mxu1 %v9006_v49  ;;  %v9073_v49 = vld [vmem:[%s12344_s3 + $0x84] ss:$28 sps:$4 sm:$0xff]  }
 0x247   :  { %5628 = vmatpush1.bf16.msra.mxu0 %v9001_v50  ;;  %v9074_v50 = vld [vmem:[%s12344_s3 + $0x248] ss:$28 sps:$4 sm:$0xff]  }
 0x248   :  { %5886 = vmatpush1.bf16.msra.mxu1 %v9004_v19  ;;  %5629 = vmatprep.subr.bf16.mxu0 %v9009_v51  ;;  %v9071_v19 = vld [vmem:[%s12344_s3 + $0x80] ss:$28 sps:$4 sm:$0xff]   ;;  %v9075_v51 = vld [vmem:[%s12344_s3 + $0x88] ss:$28 sps:$4 sm:$0xff]  }
 0x249   :  { %5887 = vmatprep.subr.bf16.mxu1 %v9012_v52  ;;  %v9079_v52 = vld [vmem:[%s12344_s3 + $0x280] ss:$28 sps:$4 sm:$0xff]  }
 0x24b   :  { %5630 = vmatpush1.bf16.msra.mxu0 %v9007_v53  ;;  %v9076_v53 = vld [vmem:[%s12344_s3 + $0xb8] ss:$28 sps:$4 sm:$0xff]  }
 0x24c   :  { %5888 = vmatpush1.bf16.msra.mxu1 %v9010_v57  ;;  %5631 = vmatprep.subr.bf16.mxu0 %v9015_v58  ;;  %v9080_v57 = vld [vmem:[%s12344_s3 + $0xc0] ss:$28 sps:$4 sm:$0xff]   ;;  %v9083_v58 = vld [vmem:[%s12344_s3 + $0xf4] ss:$28 sps:$4 sm:$0xff]  }
 0x24d   :  { %5889 = vmatprep.subr.bf16.mxu1 %v9018_v8  ;;  %v9084_v8 = vld [vmem:[%s12344_s3 + $0x2b8] ss:$28 sps:$4 sm:$0xff]  }
 0x24f   :  { %5632 = vmatpush1.bf16.msra.mxu0 %v9013_v11  ;;  %v9081_v11 = vld [vmem:[%s12344_s3 + $0xf0] ss:$28 sps:$4 sm:$0xff]  }
 0x250   :  { %5890 = vmatpush1.bf16.msra.mxu1 %v9016_v12  ;;  %5633 = vmatprep.subr.bf16.mxu0 %v9021_v14  ;;  %v9085_v12 = vld [vmem:[%s12344_s3 + $0xf8] ss:$28 sps:$4 sm:$0xff]   ;;  %v9088_v14 = vld [vmem:[%s12344_s3 + $0x12c] ss:$28 sps:$4 sm:$0xff]  }
 0x251   :  { %5891 = vmatprep.subr.bf16.mxu1 %v9024_v60  ;;  %v9089_v60 = vld [vmem:[%s12344_s3 + $0x2f0] ss:$28 sps:$4 sm:$0xff]  }
 0x253   :  { %5634 = vmatpush1.bf16.msra.mxu0 %v9019_v15  ;;  %v9086_v15 = vld [vmem:[%s12344_s3 + $0x128] ss:$28 sps:$4 sm:$0xff]  }
 0x254   :  { %5892 = vmatpush1.bf16.msra.mxu1 %v9022_v63  ;;  %5635 = vmatprep.subr.bf16.mxu0 %v9027_v16  ;;  %v9090_v63 = vld [vmem:[%s12344_s3 + $0x130] ss:$28 sps:$4 sm:$0xff]   ;;  %v9093_v16 = vld [vmem:[%s12344_s3 + $0x164] ss:$28 sps:$4 sm:$0xff]  }
 0x255   :  { %5893 = vmatprep.subr.bf16.mxu1 %v9030_v18  ;;  %v9094_v18 = vld [vmem:[%s12344_s3 + $0x328] ss:$28 sps:$4 sm:$0xff]  }
 0x257   :  { %5636 = vmatpush1.bf16.msra.mxu0 %v9025_v62  ;;  %v9091_v62 = vld [vmem:[%s12344_s3 + $0x160] ss:$28 sps:$4 sm:$0xff]  }
 0x258   :  { %5894 = vmatpush1.bf16.msra.mxu1 %v9028_v20  ;;  %5637 = vmatprep.subr.bf16.mxu0 %v9033_v22  ;;  %v9095_v20 = vld [vmem:[%s12344_s3 + $0x168] ss:$28 sps:$4 sm:$0xff]   ;;  %v9098_v22 = vld [vmem:[%s12344_s3 + $0x19c] ss:$28 sps:$4 sm:$0xff]  }
 0x259   :  { %5895 = vmatprep.subr.bf16.mxu1 %v9036_v23  ;;  %v9099_v23 = vld [vmem:[%s12344_s3 + $0x360] ss:$28 sps:$4 sm:$0xff]  }
 0x25b   :  { %5638 = vmatpush1.bf16.msra.mxu0 %v9031_v24  ;;  %v9096_v24 = vld [vmem:[%s12344_s3 + $0x198] ss:$28 sps:$4 sm:$0xff]  }
 0x25c   :  { %5896 = vmatpush1.bf16.msra.mxu1 %v9034_v25  ;;  %5639 = vmatprep.subr.bf16.mxu0 %v9039_v7  ;;  %v9100_v25 = vld [vmem:[%s12344_s3 + $0x1a0] ss:$28 sps:$4 sm:$0xff]   ;;  %v9103_v7 = vld [vmem:[%s12344_s3 + $0x1d4] ss:$28 sps:$4 sm:$0xff]  }
 0x25d   :  { %5897 = vmatprep.subr.bf16.mxu1 %v9042_v6  ;;  %v9104_v6 = vld [vmem:[%s12344_s3 + $0x558] ss:$28 sps:$4 sm:$0xff]  }
 0x25f   :  { %5640 = vmatpush1.bf16.msra.mxu0 %v9037_v28  ;;  %v9101_v28 = vld [vmem:[%s12344_s3 + $0x1d0] ss:$28 sps:$4 sm:$0xff]  }
 0x260   :  { %5898 = vmatpush1.bf16.msra.mxu1 %v9040_v32  ;;  %5641 = vmatprep.subr.bf16.mxu0 %v9045_v29  ;;  %v9105_v32 = vld [vmem:[%s12344_s3 + $0x398] ss:$28 sps:$4 sm:$0xff]   ;;  %v9108_v29 = vld [vmem:[%s12344_s3 + $0x20c] ss:$28 sps:$4 sm:$0xff]  }
 0x261   :  { %5899 = vmatprep.subr.bf16.mxu1 %v9048_v30  ;;  %v9109_v30 = vld [vmem:[%s12344_s3 + $0x590] ss:$28 sps:$4 sm:$0xff]  }
 0x263   :  { %5642 = vmatpush1.bf16.msra.mxu0 %v9043_v33  ;;  %v9106_v33 = vld [vmem:[%s12344_s3 + $0x208] ss:$28 sps:$4 sm:$0xff]  }
 0x264   :  { %5900 = vmatpush1.bf16.msra.mxu1 %v9046_v13  ;;  %5643 = vmatprep.subr.bf16.mxu0 %v9051_v31  ;;  %v9110_v13 = vld [vmem:[%s12344_s3 + $0x3d0] ss:$28 sps:$4 sm:$0xff]   ;;  %v9113_v31 = vld [vmem:[%s12344_s3 + $0x244] ss:$28 sps:$4 sm:$0xff]  }
 0x265   :  { %5901 = vmatprep.subr.bf16.mxu1 %v9054_v34  ;;  %v9114_v34 = vld [vmem:[%s12344_s3 + $0x5c8] ss:$28 sps:$4 sm:$0xff]  }
 0x267   :  { %5644 = vmatpush1.bf16.msra.mxu0 %v9049_v37  ;;  %v9111_v37 = vld [vmem:[%s12344_s3 + $0x240] ss:$28 sps:$4 sm:$0xff]  }
 0x268   :  { %5902 = vmatpush1.bf16.msra.mxu1 %v9052_v2  ;;  %5645 = vmatprep.subr.bf16.mxu0 %v9057_v39  ;;  %v9115_v2 = vld [vmem:[%s12344_s3 + $0x408] ss:$28 sps:$4 sm:$0xff]   ;;  %v9118_v39 = vld [vmem:[%s12344_s3 + $0x27c] ss:$28 sps:$4 sm:$0xff]  }
 0x269   :  { %5903 = vmatprep.subr.bf16.mxu1 %v9060_v10  ;;  %v9119_v10 = vld [vmem:[%s12344_s3 + $0x600] ss:$28 sps:$4 sm:$0xff]  }
 0x26b   :  { %5646 = vmatpush1.bf16.msra.mxu0 %v9055_v40  ;;  %v9116_v40 = vld [vmem:[%s12344_s3 + $0x278] ss:$28 sps:$4 sm:$0xff]  }
 0x26c   :  { %5904 = vmatpush1.bf16.msra.mxu1 %v9058_v43  ;;  %5916 = vmatprep.subr.bf16.mxu0 %v9063_v5  ;;  %v9120_v43 = vld [vmem:[%s12344_s3 + $0x440] ss:$28 sps:$4 sm:$0xff]   ;;  %v9123_v5 = vld [vmem:[%s12344_s3 + $0x2b4] ss:$28 sps:$4 sm:$0xff]  }
 0x26d   :  { %8003 = vmatprep.subr.bf16.mxu1 %v9064_v44  ;;  %v9124_v44 = vld [vmem:[%s12344_s3 + $0x638] ss:$28 sps:$4 sm:$0xff]  }
 0x26e   :  { %5648 = vmatmul.mubr.bf16.vlgmr.msra.gmra.mrb[16].mxu0 %v10483_v36 }
 0x26f   :  { %5906 = vmatmul.mubr.bf16.vlgmr.msra.gmra.mrb[32].mxu1 %v10483_v36  ;;  %5917 = vmatpush1.bf16.msra.mxu0 %v9061_v45  ;;  %v9121_v45 = vld [vmem:[%s12344_s3 + $0x2b0] ss:$28 sps:$4 sm:$0xff]  }
 0x270   :  { %5948 = vmatprep.mubr.bf16.mxu0 %v10168_v1  ;;  %8004 = vmatpush3.bf16.msra.mxu1 %v9065_v35  ;;  %v9125_v35 = vld [vmem:[%s12344_s3 + $0x478] ss:$28 sps:$4 sm:$0xff]  }
 0x271   :  { %6206 = vmatprep.mubr.bf16.mxu1 %v10168_v1  ;;  %5918 = vmatprep.subr.bf16.mxu0 %v9068_v9  ;;  %v9078_v1 = vld [vmem:[%s12344_s3 + $0xbc] ss:$28 sps:$4 sm:$0xff]   ;;  %v9128_v9 = vld [vmem:[%s12344_s3 + $0x2ec] ss:$28 sps:$4 sm:$0xff]  }
 0x272   :  { %8005 = vmatprep.subr.bf16.mxu1 %v9069_v17  ;;  %v9129_v17 = vld [vmem:[%s12344_s3 + $0x670] ss:$28 sps:$4 sm:$0xff]  }
 0x273   :  { %5919 = vmatpush1.bf16.msra.mxu0 %v9066_v47  ;;  %v9126_v47 = vld [vmem:[%s12344_s3 + $0x2e8] ss:$28 sps:$4 sm:$0xff]  }
 0x274   :  { %8006 = vmatpush3.bf16.msra.mxu1 %v9070_v48  ;;  %5920 = vmatprep.subr.bf16.mxu0 %v9073_v49  ;;  %v9130_v48 = vld [vmem:[%s12344_s3 + $0x4b0] ss:$28 sps:$4 sm:$0xff]   ;;  %v9133_v49 = vld [vmem:[%s12344_s3 + $0x324] ss:$28 sps:$4 sm:$0xff]  }
 0x275   :  { %8007 = vmatprep.subr.bf16.mxu1 %v9074_v50  ;;  %v9134_v50 = vld [vmem:[%s12344_s3 + $0x6a8] ss:$28 sps:$4 sm:$0xff]  }
 0x277   :  { %5921 = vmatpush1.bf16.msra.mxu0 %v9071_v19  ;;  %v9131_v19 = vld [vmem:[%s12344_s3 + $0x320] ss:$28 sps:$4 sm:$0xff]  }
 0x278   :  { %8008 = vmatpush3.bf16.msra.mxu1 %v9075_v51  ;;  %5922 = vmatprep.subr.bf16.mxu0 %v9078_v1  ;;  %v9135_v51 = vld [vmem:[%s12344_s3 + $0x4e8] ss:$28 sps:$4 sm:$0xff]   ;;  %v9138_v1 = vld [vmem:[%s12344_s3 + $0x35c] ss:$28 sps:$4 sm:$0xff]  }
 0x279   :  { %8009 = vmatprep.subr.bf16.mxu1 %v9079_v52  ;;  %v9139_v52 = vld [vmem:[%s12344_s3 + $0x6e0] ss:$28 sps:$4 sm:$0xff]  }
 0x27b   :  { %5923 = vmatpush1.bf16.msra.mxu0 %v9076_v53  ;;  %v9136_v53 = vld [vmem:[%s12344_s3 + $0x358] ss:$28 sps:$4 sm:$0xff]  }
 0x27c   :  { %8010 = vmatpush3.bf16.msra.mxu1 %v9080_v57  ;;  %5924 = vmatprep.subr.bf16.mxu0 %v9083_v58  ;;  %v9140_v57 = vld [vmem:[%s12344_s3 + $0x520] ss:$28 sps:$4 sm:$0xff]   ;;  %v9143_v58 = vld [vmem:[%s12344_s3 + $0x394] ss:$28 sps:$4 sm:$0xff]  }
 0x27d   :  { %8011 = vmatprep.subr.bf16.mxu1 %v9084_v8  ;;  %v9144_v8 = vld [vmem:[%s12344_s3 + $0x8d8] ss:$28 sps:$4 sm:$0xff]  }
 0x27f   :  { %5925 = vmatpush1.bf16.msra.mxu0 %v9081_v11  ;;  %v9141_v11 = vld [vmem:[%s12344_s3 + $0x390] ss:$28 sps:$4 sm:$0xff]  }
 0x280   :  { %8012 = vmatpush3.bf16.msra.mxu1 %v9085_v12  ;;  %5926 = vmatprep.subr.bf16.mxu0 %v9088_v14  ;;  %v9145_v12 = vld [vmem:[%s12344_s3 + $0x718] ss:$28 sps:$4 sm:$0xff]   ;;  %v9148_v14 = vld [vmem:[%s12344_s3 + $0x3cc] ss:$28 sps:$4 sm:$0xff]  }
 0x281   :  { %8013 = vmatprep.subr.bf16.mxu1 %v9089_v60  ;;  %v9146_v60 = vld [vmem:[%s12344_s3 + $0x3c8] ss:$28 sps:$4 sm:$0xff]  }
 0x283   :  { %5927 = vmatpush1.bf16.msra.mxu0 %v9086_v15  ;;  %v9149_v15 = vld [vmem:[%s12344_s3 + $0x910] ss:$28 sps:$4 sm:$0xff]  }
 0x284   :  { %8014 = vmatpush3.bf16.msra.mxu1 %v9090_v63  ;;  %5928 = vmatprep.subr.bf16.mxu0 %v9093_v16  ;;  %v9150_v63 = vld [vmem:[%s12344_s3 + $0x750] ss:$28 sps:$4 sm:$0xff]   ;;  %v9154_v16 = vld [vmem:[%s12344_s3 + $0x948] ss:$28 sps:$4 sm:$0xff]  }
 0x285   :  { %8015 = vmatprep.subr.bf16.mxu1 %v9094_v18  ;;  %v9151_v18 = vld [vmem:[%s12344_s3 + $0x400] ss:$28 sps:$4 sm:$0xff]  }
 0x287   :  { %5929 = vmatpush1.bf16.msra.mxu0 %v9091_v62  ;;  %v9158_v62 = vld [vmem:[%s12344_s3 + $0x43c] ss:$28 sps:$4 sm:$0xff]  }
 0x288   :  { %8016 = vmatpush3.bf16.msra.mxu1 %v9095_v20  ;;  %5930 = vmatprep.subr.bf16.mxu0 %v9098_v22  ;;  %v9159_v20 = vld [vmem:[%s12344_s3 + $0x980] ss:$28 sps:$4 sm:$0xff]   ;;  %v9156_v22 = vld [vmem:[%s12344_s3 + $0x438] ss:$28 sps:$4 sm:$0xff]  }
 0x289   :  { %8017 = vmatprep.subr.bf16.mxu1 %v9099_v23  ;;  %v9160_v23 = vld [vmem:[%s12344_s3 + $0x7c0] ss:$28 sps:$4 sm:$0xff]  }
 0x28b   :  { %5931 = vmatpush1.bf16.msra.mxu0 %v9096_v24  ;;  %v9163_v24 = vld [vmem:[%s12344_s3 + $0x474] ss:$28 sps:$4 sm:$0xff]  }
 0x28c   :  { %8018 = vmatpush3.bf16.msra.mxu1 %v9100_v25  ;;  %5932 = vmatprep.subr.bf16.mxu0 %v9103_v7  ;;  %v9164_v25 = vld [vmem:[%s12344_s3 + $0x9b8] ss:$28 sps:$4 sm:$0xff]   ;;  %v9161_v7 = vld [vmem:[%s12344_s3 + $0x470] ss:$28 sps:$4 sm:$0xff]  }
 0x28d   :  { %8025 = vmatprep.subr.bf16.mxu1 %v9104_v6  ;;  %v9165_v6 = vld [vmem:[%s12344_s3 + $0x7f8] ss:$28 sps:$4 sm:$0xff]  }
 0x28f   :  { %6207 = vmatmul.mubr.bf16.vlgmr.msra.gmra.mrb[36].mxu1 %v10156_v61  ;;  %5933 = vmatpush1.bf16.msra.mxu0 %v9101_v28  ;;  %v9168_v28 = vld [vmem:[%s12344_s3 + $0x4ac] ss:$28 sps:$4 sm:$0xff]  }
 0x290   :  { %8026 = vmatpush3.bf16.msra.mxu1 %v9105_v32  ;;  %6247 = vmatprep.mubr.bf16.mxu1 %v10417_v46  ;;  %v9169_v32 = vld [vmem:[%s12344_s3 + $0x9f0] ss:$28 sps:$4 sm:$0xff]  }
 0x291   :  { %5934 = vmatprep.subr.bf16.mxu0 %v9108_v29  ;;  %8027 = vmatprep.subr.bf16.mxu1 %v9109_v30  ;;  %v9166_v29 = vld [vmem:[%s12344_s3 + $0x4a8] ss:$28 sps:$4 sm:$0xff]   ;;  %v9170_v30 = vld [vmem:[%s12344_s3 + $0x830] ss:$28 sps:$4 sm:$0xff]  }
 0x293   :  { %5935 = vmatpush1.bf16.msra.mxu0 %v9106_v33  ;;  %v9173_v33 = vld [vmem:[%s12344_s3 + $0x4e4] ss:$28 sps:$4 sm:$0xff]  }
 0x294   :  { %8028 = vmatpush3.bf16.msra.mxu1 %v9110_v13  ;;  %5936 = vmatprep.subr.bf16.mxu0 %v9113_v31  ;;  %v9174_v13 = vld [vmem:[%s12344_s3 + $0xa28] ss:$28 sps:$4 sm:$0xff]   ;;  %v9171_v31 = vld [vmem:[%s12344_s3 + $0x4e0] ss:$28 sps:$4 sm:$0xff]  }
 0x295   :  { %8029 = vmatprep.subr.bf16.mxu1 %v9114_v34  ;;  %v9175_v34 = vld [vmem:[%s12344_s3 + $0x868] ss:$28 sps:$4 sm:$0xff]  }
 0x297   :  { %5937 = vmatpush1.bf16.msra.mxu0 %v9111_v37  ;;  %v9178_v37 = vld [vmem:[%s12344_s3 + $0x51c] ss:$28 sps:$4 sm:$0xff]  }
 0x298   :  { %8030 = vmatpush3.bf16.msra.mxu1 %v9115_v2  ;;  %5938 = vmatprep.subr.bf16.mxu0 %v9118_v39  ;;  %v9179_v2 = vld [vmem:[%s12344_s3 + $0xa60] ss:$28 sps:$4 sm:$0xff]   ;;  %v9176_v39 = vld [vmem:[%s12344_s3 + $0x518] ss:$28 sps:$4 sm:$0xff]  }
 0x299   :  { %8031 = vmatprep.subr.bf16.mxu1 %v9119_v10  ;;  %v9180_v10 = vld [vmem:[%s12344_s3 + $0x8a0] ss:$28 sps:$4 sm:$0xff]  }
 0x29b   :  { %5939 = vmatpush1.bf16.msra.mxu0 %v9116_v40  ;;  %v9183_v40 = vld [vmem:[%s12344_s3 + $0x554] ss:$28 sps:$4 sm:$0xff]  }
 0x29c   :  { %8032 = vmatpush3.bf16.msra.mxu1 %v9120_v43  ;;  %5940 = vmatprep.subr.bf16.mxu0 %v9123_v5  ;;  %v9184_v43 = vld [vmem:[%s12344_s3 + $0xc58] ss:$28 sps:$4 sm:$0xff]   ;;  %v9181_v5 = vld [vmem:[%s12344_s3 + $0x550] ss:$28 sps:$4 sm:$0xff]  }
 0x29d   :  { %8033 = vmatprep.subr.bf16.mxu1 %v9124_v44  ;;  %v9185_v44 = vld [vmem:[%s12344_s3 + $0xa98] ss:$28 sps:$4 sm:$0xff]  }
 0x29f   :  { %5941 = vmatpush1.bf16.msra.mxu0 %v9121_v45  ;;  %v9186_v45 = vld [vmem:[%s12344_s3 + $0x588] ss:$28 sps:$4 sm:$0xff]  }
 0x2a0   :  { %8034 = vmatpush3.bf16.msra.mxu1 %v9125_v35  ;;  %5942 = vmatprep.subr.bf16.mxu0 %v9128_v9  ;;  %v9188_v35 = vld [vmem:[%s12344_s3 + $0x58c] ss:$28 sps:$4 sm:$0xff]  }
 0x2a1   :  { %8035 = vmatprep.subr.bf16.mxu1 %v9129_v17  ;;  %v9189_v9 = vld [vmem:[%s12344_s3 + $0xc90] ss:$28 sps:$4 sm:$0xff]  }
 0x2a2   :  { %v9190_v17 = vld [vmem:[%s12344_s3 + $0xad0] ss:$28 sps:$4 sm:$0xff]  }
 0x2a3   :  { %5943 = vmatpush1.bf16.msra.mxu0 %v9126_v47  ;;  %v9193_v47 = vld [vmem:[%s12344_s3 + $0x5c4] ss:$28 sps:$4 sm:$0xff]  }
 0x2a4   :  { %8036 = vmatpush3.bf16.msra.mxu1 %v9130_v48  ;;  %5944 = vmatprep.subr.bf16.mxu0 %v9133_v49  ;;  %v9191_v48 = vld [vmem:[%s12344_s3 + $0x5c0] ss:$28 sps:$4 sm:$0xff]   ;;  %v9194_v49 = vld [vmem:[%s12344_s3 + $0xcc8] ss:$28 sps:$4 sm:$0xff]  }
 0x2a5   :  { %8037 = vmatprep.subr.bf16.mxu1 %v9134_v50  ;;  %v9195_v50 = vld [vmem:[%s12344_s3 + $0xb08] ss:$28 sps:$4 sm:$0xff]  }
 0x2a7   :  { %5945 = vmatpush1.bf16.msra.mxu0 %v9131_v19  ;;  %v9198_v19 = vld [vmem:[%s12344_s3 + $0x5fc] ss:$28 sps:$4 sm:$0xff]  }
 0x2a8   :  { %8038 = vmatpush3.bf16.msra.mxu1 %v9135_v51  ;;  %5946 = vmatprep.subr.bf16.mxu0 %v9138_v1  ;;  %v9196_v51 = vld [vmem:[%s12344_s3 + $0x5f8] ss:$28 sps:$4 sm:$0xff]   ;;  %v9199_v1 = vld [vmem:[%s12344_s3 + $0xd00] ss:$28 sps:$4 sm:$0xff]  }
 0x2a9   :  { %8039 = vmatprep.subr.bf16.mxu1 %v9139_v52  ;;  %v9200_v52 = vld [vmem:[%s12344_s3 + $0xb40] ss:$28 sps:$4 sm:$0xff]  }
 0x2ab   :  { %5947 = vmatpush1.bf16.msra.mxu0 %v9136_v53  ;;  %v9203_v53 = vld [vmem:[%s12344_s3 + $0x634] ss:$28 sps:$4 sm:$0xff]  }
 0x2ac   :  { %8040 = vmatpush3.bf16.msra.mxu1 %v9140_v57  ;;  %5959 = vmatprep.subr.bf16.mxu0 %v9143_v58  ;;  %v9201_v57 = vld [vmem:[%s12344_s3 + $0x630] ss:$28 sps:$4 sm:$0xff]   ;;  %v9204_v58 = vld [vmem:[%s12344_s3 + $0xd38] ss:$28 sps:$4 sm:$0xff]  }
 0x2ad   :  { %8047 = vmatprep.subr.bf16.mxu1 %v9144_v8  ;;  %v9205_v8 = vld [vmem:[%s12344_s3 + $0xb78] ss:$28 sps:$4 sm:$0xff]  }
 0x2ae   :  { %5949 = vmatmul.mubr.bf16.vlgmr.msra.gmra.mrb[20].mxu0 %v10156_v61  ;;  %v9153_v61 = vld [vmem:[%s12344_s3 + $0x404] ss:$28 sps:$4 sm:$0xff]  }
 0x2af   :  { %6248 = vmatmul.mubr.bf16.vlgmr.msra.gmra.mrb[40].mxu1 %v10410_v42  ;;  %5960 = vmatpush1.bf16.msra.mxu0 %v9141_v11  ;;  %v9208_v11 = vld [vmem:[%s12344_s3 + $0x66c] ss:$28 sps:$4 sm:$0xff]  }
 0x2b0   :  { %5991 = vmatprep.mubr.bf16.mxu0 %v10417_v46  ;;  %8048 = vmatpush3.bf16.msra.mxu1 %v9145_v12  ;;  %v9155_v46 = vld [vmem:[%s12344_s3 + $0x788] ss:$28 sps:$4 sm:$0xff]  }
 0x2b1   :  { %6288 = vmatprep.mubr.bf16.mxu1 %v10206_v55  ;;  %5961 = vmatprep.subr.bf16.mxu0 %v9148_v14  ;;  %v9206_v12 = vld [vmem:[%s12344_s3 + $0x668] ss:$28 sps:$4 sm:$0xff]   ;;  %v9209_v14 = vld [vmem:[%s12344_s3 + $0xd70] ss:$28 sps:$4 sm:$0xff]  }
 0x2b2   :  { %8049 = vmatprep.subr.bf16.mxu1 %v9149_v15  ;;  %v9213_v15 = vld [vmem:[%s12344_s3 + $0x6a4] ss:$28 sps:$4 sm:$0xff]  }
 0x2b3   :  { %5962 = vmatpush1.bf16.msra.mxu0 %v9146_v60  ;;  %v9210_v60 = vld [vmem:[%s12344_s3 + $0xbb0] ss:$28 sps:$4 sm:$0xff]  }
 0x2b4   :  { %8050 = vmatpush3.bf16.msra.mxu1 %v9150_v63  ;;  %5963 = vmatprep.subr.bf16.mxu0 %v9153_v61  ;;  %v9214_v63 = vld [vmem:[%s12344_s3 + $0xda8] ss:$28 sps:$4 sm:$0xff]   ;;  %v9211_v61 = vld [vmem:[%s12344_s3 + $0x6a0] ss:$28 sps:$4 sm:$0xff]  }
 0x2b5   :  { %8051 = vmatprep.subr.bf16.mxu1 %v9154_v16  ;;  %v9215_v16 = vld [vmem:[%s12344_s3 + $0xbe8] ss:$28 sps:$4 sm:$0xff]  }
 0x2b7   :  { %5964 = vmatpush1.bf16.msra.mxu0 %v9151_v18  ;;  %v9218_v18 = vld [vmem:[%s12344_s3 + $0x6dc] ss:$28 sps:$4 sm:$0xff]  }
 0x2b8   :  { %8052 = vmatpush3.bf16.msra.mxu1 %v9155_v46  ;;  %5965 = vmatprep.subr.bf16.mxu0 %v9158_v62  ;;  %v9219_v46 = vld [vmem:[%s12344_s3 + $0xde0] ss:$28 sps:$4 sm:$0xff]   ;;  %v9216_v62 = vld [vmem:[%s12344_s3 + $0x6d8] ss:$28 sps:$4 sm:$0xff]  }
 0x2b9   :  { %8053 = vmatprep.subr.bf16.mxu1 %v9159_v20  ;;  %v9220_v20 = vld [vmem:[%s12344_s3 + $0xc20] ss:$28 sps:$4 sm:$0xff]  }
 0x2bb   :  { %5966 = vmatpush1.bf16.msra.mxu0 %v9156_v22  ;;  %v9223_v22 = vld [vmem:[%s12344_s3 + $0x714] ss:$28 sps:$4 sm:$0xff]  }
 0x2bc   :  { %8054 = vmatpush3.bf16.msra.mxu1 %v9160_v23  ;;  %5967 = vmatprep.subr.bf16.mxu0 %v9163_v24  ;;  %v9224_v23 = vld [vmem:[%s12344_s3 + $0xfd8] ss:$28 sps:$4 sm:$0xff]   ;;  %v9221_v24 = vld [vmem:[%s12344_s3 + $0x710] ss:$28 sps:$4 sm:$0xff]  }
 0x2bd   :  { %8055 = vmatprep.subr.bf16.mxu1 %v9164_v25  ;;  %v9225_v25 = vld [vmem:[%s12344_s3 + $0xe18] ss:$28 sps:$4 sm:$0xff]  }
 0x2bf   :  { %5968 = vmatpush1.bf16.msra.mxu0 %v9161_v7  ;;  %v9228_v7 = vld [vmem:[%s12344_s3 + $0x74c] ss:$28 sps:$4 sm:$0xff]  }
 0x2c0   :  { %8056 = vmatpush3.bf16.msra.mxu1 %v9165_v6  ;;  %5969 = vmatprep.subr.bf16.mxu0 %v9168_v28  ;;  %v9229_v6 = vld [vmem:[%s12344_s3 + $0x1010] ss:$28 sps:$4 sm:$0xff]   ;;  %v9226_v28 = vld [vmem:[%s12344_s3 + $0x748] ss:$28 sps:$4 sm:$0xff]  }
 0x2c1   :  { %8057 = vmatprep.subr.bf16.mxu1 %v9169_v32  ;;  %v9230_v32 = vld [vmem:[%s12344_s3 + $0xe50] ss:$28 sps:$4 sm:$0xff]  }
 0x2c3   :  { %5970 = vmatpush1.bf16.msra.mxu0 %v9166_v29  ;;  %v9234_v29 = vld [vmem:[%s12344_s3 + $0x1048] ss:$28 sps:$4 sm:$0xff]  }
 0x2c4   :  { %8058 = vmatpush3.bf16.msra.mxu1 %v9170_v30  ;;  %5971 = vmatprep.subr.bf16.mxu0 %v9173_v33  ;;  %v9235_v30 = vld [vmem:[%s12344_s3 + $0xe88] ss:$28 sps:$4 sm:$0xff]   ;;  %v9238_v33 = vld [vmem:[%s12344_s3 + $0x7bc] ss:$28 sps:$4 sm:$0xff]  }
 0x2c5   :  { %8059 = vmatprep.subr.bf16.mxu1 %v9174_v13  ;;  %v9239_v13 = vld [vmem:[%s12344_s3 + $0x1080] ss:$28 sps:$4 sm:$0xff]  }
 0x2c7   :  { %5972 = vmatpush1.bf16.msra.mxu0 %v9171_v31  ;;  %v9236_v31 = vld [vmem:[%s12344_s3 + $0x7b8] ss:$28 sps:$4 sm:$0xff]  }
 0x2c8   :  { %8060 = vmatpush3.bf16.msra.mxu1 %v9175_v34  ;;  %5973 = vmatprep.subr.bf16.mxu0 %v9178_v37  ;;  %v9240_v34 = vld [vmem:[%s12344_s3 + $0xec0] ss:$28 sps:$4 sm:$0xff]   ;;  %v9243_v37 = vld [vmem:[%s12344_s3 + $0x7f4] ss:$28 sps:$4 sm:$0xff]  }
 0x2c9   :  { %8061 = vmatprep.subr.bf16.mxu1 %v9179_v2  ;;  %v9244_v2 = vld [vmem:[%s12344_s3 + $0x10b8] ss:$28 sps:$4 sm:$0xff]  }
 0x2cb   :  { %5974 = vmatpush1.bf16.msra.mxu0 %v9176_v39  ;;  %v9241_v39 = vld [vmem:[%s12344_s3 + $0x7f0] ss:$28 sps:$4 sm:$0xff]  }
 0x2cc   :  { %8062 = vmatpush3.bf16.msra.mxu1 %v9180_v10  ;;  %5975 = vmatprep.subr.bf16.mxu0 %v9183_v40  ;;  %v9245_v10 = vld [vmem:[%s12344_s3 + $0xef8] ss:$28 sps:$4 sm:$0xff]   ;;  %v9248_v40 = vld [vmem:[%s12344_s3 + $0x82c] ss:$28 sps:$4 sm:$0xff]  }
 0x2cd   :  { %8069 = vmatprep.subr.bf16.mxu1 %v9184_v43  ;;  %v9249_v43 = vld [vmem:[%s12344_s3 + $0x10f0] ss:$28 sps:$4 sm:$0xff]  }
 0x2cf   :  { %6289 = vmatmul.mubr.bf16.vlgmr.msra.gmra.mrb[44].mxu1 %v10202_v41  ;;  %5976 = vmatpush1.bf16.msra.mxu0 %v9181_v5  ;;  %v9246_v5 = vld [vmem:[%s12344_s3 + $0x828] ss:$28 sps:$4 sm:$0xff]  }
 0x2d0   :  { %8070 = vmatpush3.bf16.msra.mxu1 %v9185_v44  ;;  %6329 = vmatprep.mubr.bf16.mxu1 %v10459_v21  ;;  %v9250_v44 = vld [vmem:[%s12344_s3 + $0xf30] ss:$28 sps:$4 sm:$0xff]  }
 0x2d1   :  { %5977 = vmatprep.subr.bf16.mxu0 %v9188_v35  ;;  %8071 = vmatprep.subr.bf16.mxu1 %v9189_v9  ;;  %v9254_v35 = vld [vmem:[%s12344_s3 + $0x1128] ss:$28 sps:$4 sm:$0xff]   ;;  %v9251_v9 = vld [vmem:[%s12344_s3 + $0x860] ss:$28 sps:$4 sm:$0xff]  }
 0x2d3   :  { %5978 = vmatpush1.bf16.msra.mxu0 %v9186_v45  ;;  %v9253_v45 = vld [vmem:[%s12344_s3 + $0x864] ss:$28 sps:$4 sm:$0xff]  }
 0x2d4   :  { %8072 = vmatpush3.bf16.msra.mxu1 %v9190_v17  ;;  %5979 = vmatprep.subr.bf16.mxu0 %v9193_v47  ;;  %v9255_v17 = vld [vmem:[%s12344_s3 + $0xf68] ss:$28 sps:$4 sm:$0xff]   ;;  %v9258_v47 = vld [vmem:[%s12344_s3 + $0x89c] ss:$28 sps:$4 sm:$0xff]  }
 0x2d5   :  { %8073 = vmatprep.subr.bf16.mxu1 %v9194_v49  ;;  %v9256_v49 = vld [vmem:[%s12344_s3 + $0x898] ss:$28 sps:$4 sm:$0xff]  }
 0x2d7   :  { %5980 = vmatpush1.bf16.msra.mxu0 %v9191_v48  ;;  %v9259_v48 = vld [vmem:[%s12344_s3 + $0x1160] ss:$28 sps:$4 sm:$0xff]  }
 0x2d8   :  { %8074 = vmatpush3.bf16.msra.mxu1 %v9195_v50  ;;  %5981 = vmatprep.subr.bf16.mxu0 %v9198_v19  ;;  %v9260_v50 = vld [vmem:[%s12344_s3 + $0xfa0] ss:$28 sps:$4 sm:$0xff]   ;;  %v9263_v19 = vld [vmem:[%s12344_s3 + $0x8d4] ss:$28 sps:$4 sm:$0xff]  }
 0x2d9   :  { %8075 = vmatprep.subr.bf16.mxu1 %v9199_v1  ;;  %v9261_v1 = vld [vmem:[%s12344_s3 + $0x8d0] ss:$28 sps:$4 sm:$0xff]  }
 0x2db   :  { %5982 = vmatpush1.bf16.msra.mxu0 %v9196_v51  ;;  %v9264_v51 = vld [vmem:[%s12344_s3 + $0x1358] ss:$28 sps:$4 sm:$0xff]  }
 0x2dc   :  { %8076 = vmatpush3.bf16.msra.mxu1 %v9200_v52  ;;  %5983 = vmatprep.subr.bf16.mxu0 %v9203_v53  ;;  %v9265_v52 = vld [vmem:[%s12344_s3 + $0x1198] ss:$28 sps:$4 sm:$0xff]   ;;  %v9268_v53 = vld [vmem:[%s12344_s3 + $0x90c] ss:$28 sps:$4 sm:$0xff]  }
 0x2dd   :  { %8077 = vmatprep.subr.bf16.mxu1 %v9204_v58  ;;  %v9266_v58 = vld [vmem:[%s12344_s3 + $0x908] ss:$28 sps:$4 sm:$0xff]  }
 0x2df   :  { %5984 = vmatpush1.bf16.msra.mxu0 %v9201_v57  ;;  %v9269_v57 = vld [vmem:[%s12344_s3 + $0x1390] ss:$28 sps:$4 sm:$0xff]  }
 0x2e0   :  { %8078 = vmatpush3.bf16.msra.mxu1 %v9205_v8  ;;  %5985 = vmatprep.subr.bf16.mxu0 %v9208_v11  ;;  %v9270_v8 = vld [vmem:[%s12344_s3 + $0x11d0] ss:$28 sps:$4 sm:$0xff]   ;;  %v9273_v11 = vld [vmem:[%s12344_s3 + $0x944] ss:$28 sps:$4 sm:$0xff]  }
 0x2e1   :  { %8079 = vmatprep.subr.bf16.mxu1 %v9209_v14  ;;  %v9271_v14 = vld [vmem:[%s12344_s3 + $0x940] ss:$28 sps:$4 sm:$0xff]  }
 0x2e3   :  { %5986 = vmatpush1.bf16.msra.mxu0 %v9206_v12  ;;  %v9274_v12 = vld [vmem:[%s12344_s3 + $0x13c8] ss:$28 sps:$4 sm:$0xff]  }
 0x2e4   :  { %8080 = vmatpush3.bf16.msra.mxu1 %v9210_v60  ;;  %5987 = vmatprep.subr.bf16.mxu0 %v9213_v15  ;;  %v9275_v60 = vld [vmem:[%s12344_s3 + $0x1208] ss:$28 sps:$4 sm:$0xff]   ;;  %v9278_v15 = vld [vmem:[%s12344_s3 + $0x97c] ss:$28 sps:$4 sm:$0xff]  }
 0x2e5   :  { %8081 = vmatprep.subr.bf16.mxu1 %v9214_v63  ;;  %v9279_v63 = vld [vmem:[%s12344_s3 + $0x1400] ss:$28 sps:$4 sm:$0xff]  }
 0x2e7   :  { %5988 = vmatpush1.bf16.msra.mxu0 %v9211_v61  ;;  %v9276_v61 = vld [vmem:[%s12344_s3 + $0x978] ss:$28 sps:$4 sm:$0xff]  }
 0x2e8   :  { %8082 = vmatpush3.bf16.msra.mxu1 %v9215_v16  ;;  %5989 = vmatprep.subr.bf16.mxu0 %v9218_v18  ;;  %v9280_v16 = vld [vmem:[%s12344_s3 + $0x1240] ss:$28 sps:$4 sm:$0xff]   ;;  %v9283_v18 = vld [vmem:[%s12344_s3 + $0x9b4] ss:$28 sps:$4 sm:$0xff]  }
 0x2e9   :  { %8083 = vmatprep.subr.bf16.mxu1 %v9219_v46  ;;  %v9284_v46 = vld [vmem:[%s12344_s3 + $0x1438] ss:$28 sps:$4 sm:$0xff]  }
 0x2eb   :  { %5990 = vmatpush1.bf16.msra.mxu0 %v9216_v62  ;;  %v9281_v62 = vld [vmem:[%s12344_s3 + $0x9b0] ss:$28 sps:$4 sm:$0xff]  }
 0x2ec   :  { %8084 = vmatpush3.bf16.msra.mxu1 %v9220_v20  ;;  %6002 = vmatprep.subr.bf16.mxu0 %v9223_v22  ;;  %v9285_v20 = vld [vmem:[%s12344_s3 + $0x1278] ss:$28 sps:$4 sm:$0xff]   ;;  %v9288_v22 = vld [vmem:[%s12344_s3 + $0x9ec] ss:$28 sps:$4 sm:$0xff]  }
 0x2ed   :  { %8091 = vmatprep.subr.bf16.mxu1 %v9224_v23  ;;  %v9289_v23 = vld [vmem:[%s12344_s3 + $0x1470] ss:$28 sps:$4 sm:$0xff]  }
 0x2ee   :  { %5992 = vmatmul.mubr.bf16.vlgmr.msra.gmra.mrb[20].mxu0 %v10410_v42  ;;  %v9233_v42 = vld [vmem:[%s12344_s3 + $0x784] ss:$28 sps:$4 sm:$0xff]  }
 0x2ef   :  { %6330 = vmatmul.mubr.bf16.vlgmr.msra.gmra.mrb[48].mxu1 %v10454_v0  ;;  %6003 = vmatpush1.bf16.msra.mxu0 %v9221_v24  ;;  %v9286_v24 = vld [vmem:[%s12344_s3 + $0x9e8] ss:$28 sps:$4 sm:$0xff]  }
 0x2f0   :  { %6034 = vmatprep.mubr.bf16.mxu0 %v10206_v55  ;;  %8092 = vmatpush3.bf16.msra.mxu1 %v9225_v25  ;;  %v9231_v55 = vld [vmem:[%s12344_s3 + $0x780] ss:$28 sps:$4 sm:$0xff]   ;;  %v9290_v25 = vld [vmem:[%s12344_s3 + $0x12b0] ss:$28 sps:$4 sm:$0xff]  }
 0x2f1   :  { %6370 = vmatprep.mubr.bf16.mxu1 %v10236_v56  ;;  %6004 = vmatprep.subr.bf16.mxu0 %v9228_v7  ;;  %v9293_v7 = vld [vmem:[%s12344_s3 + $0xa24] ss:$28 sps:$4 sm:$0xff]  }
 0x2f2   :  { %8093 = vmatprep.subr.bf16.mxu1 %v9229_v6  ;;  %v9294_v6 = vld [vmem:[%s12344_s3 + $0x14a8] ss:$28 sps:$4 sm:$0xff]  }
 0x2f3   :  { %6005 = vmatpush1.bf16.msra.mxu0 %v9226_v28  ;;  %v9291_v28 = vld [vmem:[%s12344_s3 + $0xa20] ss:$28 sps:$4 sm:$0xff]  }
 0x2f4   :  { %8094 = vmatpush3.bf16.msra.mxu1 %v9230_v32  ;;  %6006 = vmatprep.subr.bf16.mxu0 %v9233_v42  ;;  %v9295_v32 = vld [vmem:[%s12344_s3 + $0x12e8] ss:$28 sps:$4 sm:$0xff]   ;;  %v9298_v42 = vld [vmem:[%s12344_s3 + $0xa5c] ss:$28 sps:$4 sm:$0xff]  }
 0x2f5   :  { %8095 = vmatprep.subr.bf16.mxu1 %v9234_v29  ;;  %v9299_v29 = vld [vmem:[%s12344_s3 + $0x14e0] ss:$28 sps:$4 sm:$0xff]  }
 0x2f7   :  { %6007 = vmatpush1.bf16.msra.mxu0 %v9231_v55  ;;  %v9296_v55 = vld [vmem:[%s12344_s3 + $0xa58] ss:$28 sps:$4 sm:$0xff]  }
 0x2f8   :  { %8096 = vmatpush3.bf16.msra.mxu1 %v9235_v30  ;;  %6008 = vmatprep.subr.bf16.mxu0 %v9238_v33  ;;  %v9300_v30 = vld [vmem:[%s12344_s3 + $0x1320] ss:$28 sps:$4 sm:$0xff]   ;;  %v9303_v33 = vld [vmem:[%s12344_s3 + $0xa94] ss:$28 sps:$4 sm:$0xff]  }
 0x2f9   :  { %8097 = vmatprep.subr.bf16.mxu1 %v9239_v13  ;;  %v9304_v13 = vld [vmem:[%s12346_s5 + $0x40] sm:$0xff]  }
 0x2fb   :  { %6009 = vmatpush1.bf16.msra.mxu0 %v9236_v31  ;;  %v9301_v31 = vld [vmem:[%s12344_s3 + $0xa90] ss:$28 sps:$4 sm:$0xff]  }
 0x2fc   :  { %8098 = vmatpush3.bf16.msra.mxu1 %v9240_v34  ;;  %6010 = vmatprep.subr.bf16.mxu0 %v9243_v37  ;;  %v9305_v34 = vld [vmem:[%s12346_s5] sm:$0xff]   ;;  %v9308_v37 = vld [vmem:[%s12344_s3 + $0xacc] ss:$28 sps:$4 sm:$0xff]  }
 0x2fd   :  { %8099 = vmatprep.subr.bf16.mxu1 %v9244_v2  ;;  %v9309_v2 = vld [vmem:[%s12346_s5 + $0x48] sm:$0xff]  }
 0x2ff   :  { %6011 = vmatpush1.bf16.msra.mxu0 %v9241_v39  ;;  %v9306_v39 = vld [vmem:[%s12344_s3 + $0xac8] ss:$28 sps:$4 sm:$0xff]  }
 0x300   :  { %8100 = vmatpush3.bf16.msra.mxu1 %v9245_v10  ;;  %6012 = vmatprep.subr.bf16.mxu0 %v9248_v40  ;;  %v9310_v10 = vld [vmem:[%s12346_s5 + $0x8] sm:$0xff]   ;;  %v9313_v40 = vld [vmem:[%s12344_s3 + $0xb04] ss:$28 sps:$4 sm:$0xff]  }
 0x301   :  { %8101 = vmatprep.subr.bf16.mxu1 %v9249_v43  ;;  %v9315_v43 = vld [vmem:[%s12346_s5 + $0x10] sm:$0xff]  }
 0x303   :  { %6013 = vmatpush1.bf16.msra.mxu0 %v9246_v5  ;;  %v9318_v5 = vld [vmem:[%s12344_s3 + $0xb3c] ss:$28 sps:$4 sm:$0xff]  }
 0x304   :  { %8102 = vmatpush3.bf16.msra.mxu1 %v9250_v44  ;;  %6014 = vmatprep.subr.bf16.mxu0 %v9253_v45  ;;  %v9319_v44 = vld [vmem:[%s12346_s5 + $0x58] sm:$0xff]  }
 0x305   :  { %8103 = vmatprep.subr.bf16.mxu1 %v9254_v35  ;;  %v9316_v45 = vld [vmem:[%s12344_s3 + $0xb38] ss:$28 sps:$4 sm:$0xff]  }
 0x306   :  { %v9320_v35 = vld [vmem:[%s12346_s5 + $0x18] sm:$0xff]  }
 0x307   :  { %6015 = vmatpush1.bf16.msra.mxu0 %v9251_v9  ;;  %v9323_v9 = vld [vmem:[%s12344_s3 + $0xb74] ss:$28 sps:$4 sm:$0xff]  }
 0x308   :  { %8104 = vmatpush3.bf16.msra.mxu1 %v9255_v17  ;;  %6016 = vmatprep.subr.bf16.mxu0 %v9258_v47  ;;  %v9324_v17 = vld [vmem:[%s12346_s5 + $0x60] sm:$0xff]   ;;  %v9321_v47 = vld [vmem:[%s12344_s3 + $0xb70] ss:$28 sps:$4 sm:$0xff]  }
 0x309   :  { %8105 = vmatprep.subr.bf16.mxu1 %v9259_v48  ;;  %v11879_v48 = vld [vmem:[%s12347_s4] ss:$2 sm:$0xff] }
 0x30b   :  { %6017 = vmatpush1.bf16.msra.mxu0 %v9256_v49  ;;  %v9325_v49 = vld [vmem:[%s12346_s5 + $0x20] sm:$0xff]  }
 0x30c   :  { %8106 = vmatpush3.bf16.msra.mxu1 %v9260_v50  ;;  %6018 = vmatprep.subr.bf16.mxu0 %v9263_v19  ;;  %v9328_v50 = vld [vmem:[%s12344_s3 + $0xbac] ss:$28 sps:$4 sm:$0xff]  }
 0x30d   :  { %8113 = vmatprep.subr.bf16.mxu1 %v9264_v51  ;;  %v9329_v19 = vld [vmem:[%s12346_s5 + $0x68] sm:$0xff]   ;;  %v6427_v51 = vrot.slane %v11879_v48, %v10098_v3 }
 0x30f   :  { %6371 = vmatmul.mubr.bf16.vlgmr.msra.gmra.mrb[52].mxu1 %v10234_v54  ;;  %6019 = vmatpush1.bf16.msra.mxu0 %v9261_v1  ;;  %v11895_v1 = vld [vmem:[%s12347_s4 + $0x1] ss:$2 sm:$0xff] }
 0x310   :  { %8114 = vmatpush3.bf16.msra.mxu1 %v9265_v52  ;;  %6411 = vmatprep.mubr.bf16.mxu1 %v10491_v38  ;;  %v6435_v52 = vrot.slane %v11879_v48, %v10299_v26 }
 0x311   :  { %6020 = vmatprep.subr.bf16.mxu0 %v9268_v53  ;;  %8115 = vmatprep.subr.bf16.mxu1 %v9269_v57  ;;  %v6431_v53 = vrot.slane %v11879_v48, %v10101_v4  ;;  %v9326_v57 = vld [vmem:[%s12344_s3 + $0xba8] ss:$28 sps:$4 sm:$0xff]  }
 0x313   :  { %6021 = vmatpush1.bf16.msra.mxu0 %v9266_v58  ;;  %v6439_v58 = vrot.slane %v11879_v48, %v10302_v27 }
 0x314   :  { %8116 = vmatpush3.bf16.msra.mxu1 %v9270_v8  ;;  %6022 = vmatprep.subr.bf16.mxu0 %v9273_v11  ;;  %v9330_v8 = vld [vmem:[%s12346_s5 + $0x28] sm:$0xff]   ;;  %v9333_v11 = vld [vmem:[%s12344_s3 + $0xbe4] ss:$28 sps:$4 sm:$0xff]  }
 0x315   :  { %8117 = vmatprep.subr.bf16.mxu1 %v9274_v12 }
 0x317   :  { %6023 = vmatpush1.bf16.msra.mxu0 %v9271_v14  ;;  %v9334_v14 = vld [vmem:[%s12346_s5 + $0x70] sm:$0xff]  }
 0x318   :  { %8118 = vmatpush3.bf16.msra.mxu1 %v9275_v60  ;;  %6024 = vmatprep.subr.bf16.mxu0 %v9278_v15  ;;  %v6470_v15 = vrot.slane %v11895_v1, %v10098_v3  ;;  %v6482_v3 = vrot.slane %v11895_v1, %v10302_v27  ;;  %v9339_v27 = vld [vmem:[%s12346_s5 + $0x78] sm:$0xff]  }
 0x319   :  { %8119 = vmatprep.subr.bf16.mxu1 %v9279_v63 }
 0x31b   :  { %6025 = vmatpush1.bf16.msra.mxu0 %v9276_v61 }
 0x31c   :  { %8120 = vmatpush3.bf16.msra.mxu1 %v9280_v16  ;;  %6026 = vmatprep.subr.bf16.mxu0 %v9283_v18  ;;  %v6478_v18 = vrot.slane %v11895_v1, %v10299_v26  ;;  %v9338_v26 = vld [vmem:[%s12344_s3 + $0xc1c] ss:$28 sps:$4 sm:$0xff]  }
 0x31d   :  { %8121 = vmatprep.subr.bf16.mxu1 %v9284_v46 }
 0x31f   :  { %6027 = vmatpush1.bf16.msra.mxu0 %v9281_v62  ;;  %v6474_v62 = vrot.slane %v11895_v1, %v10101_v4  ;;  %v9335_v4 = vld [vmem:[%s12346_s5 + $0x30] sm:$0xff]  }
 0x320   :  { %8122 = vmatpush3.bf16.msra.mxu1 %v9285_v20  ;;  %6028 = vmatprep.subr.bf16.mxu0 %v9288_v22 }
 0x321   :  { %8123 = vmatprep.subr.bf16.mxu1 %v9289_v23  ;;  %v9331_v23 = vld [vmem:[%s12344_s3 + $0xbe0] ss:$28 sps:$4 sm:$0xff]  }
 0x323   :  { %6029 = vmatpush1.bf16.msra.mxu0 %v9286_v24 }
 0x324   :  { %8124 = vmatpush3.bf16.msra.mxu1 %v9290_v25  ;;  %6030 = vmatprep.subr.bf16.mxu0 %v9293_v7 }
 0x325   :  { %8125 = vmatprep.subr.bf16.mxu1 %v9294_v6 }
 0x327   :  { %6031 = vmatpush1.bf16.msra.mxu0 %v9291_v28 }
 0x328   :  { %8126 = vmatpush3.bf16.msra.mxu1 %v9295_v32  ;;  %6032 = vmatprep.subr.bf16.mxu0 %v9298_v42 }
 0x329   :  { %8127 = vmatprep.subr.bf16.mxu1 %v9299_v29 }
 0x32b   :  { %6033 = vmatpush1.bf16.msra.mxu0 %v9296_v55 }
 0x32c   :  { %8128 = vmatpush3.bf16.msra.mxu1 %v9300_v30  ;;  %6045 = vmatprep.subr.bf16.mxu0 %v9303_v33 }
 0x32d   :  { %8135 = vmatprep.subr.bf16.mxu1 %v9304_v13 }
 0x32e   :  { %6035 = vmatmul.mubr.bf16.vlgmr.msra.gmra.mrb[20].mxu0 %v10202_v41  ;;  %v9314_v41 = vld [vmem:[%s12346_s5 + $0x50] sm:$0xff]  }
 0x32f   :  { %6412 = vmatmul.mubr.bf16.vlgmr.msra.gmra.mrb[56].mxu1 %v10483_v36  ;;  %6046 = vmatpush1.bf16.msra.mxu0 %v9301_v31 }
 0x330   :  { %6077 = vmatprep.mubr.bf16.mxu0 %v10459_v21  ;;  %8136 = vmatpush3.bf16.msra.mxu1 %v9305_v34  ;;  %v9311_v21 = vld [vmem:[%s12344_s3 + $0xb00] ss:$28 sps:$4 sm:$0xff]  }
 0x331   :  { %6047 = vmatprep.subr.bf16.mxu0 %v9308_v37  ;;  %8137 = vmatprep.subr.bf16.mxu1 %v9309_v2  ;;  %v9336_v37 = vld [vmem:[%s12344_s3 + $0xc18] ss:$28 sps:$4 sm:$0xff]  }
 0x333   :  { %6048 = vmatpush1.bf16.msra.mxu0 %v9306_v39 }
 0x334   :  { %8138 = vmatpush3.bf16.msra.mxu1 %v9310_v10  ;;  %6049 = vmatprep.subr.bf16.mxu0 %v9313_v40  ;;  %v9340_v40 = vld [vmem:[%s12346_s5 + $0x38] sm:$0xff]  }
 0x335   :  { %8139 = vmatprep.subr.bf16.mxu1 %v9314_v41  ;;  %v9343_v41 = vld [vmem:[%s12344_s3 + $0xc54] ss:$28 sps:$4 sm:$0xff]  }
 0x337   :  { %6050 = vmatpush1.bf16.msra.mxu0 %v9311_v21 }
 0x338   :  { %8140 = vmatpush3.bf16.msra.mxu1 %v9315_v43  ;;  %6051 = vmatprep.subr.bf16.mxu0 %v9318_v5  ;;  %v9344_v5 = vld [vmem:[%s12346_s5 + $0xc0] sm:$0xff]  }
 0x339   :  { %8141 = vmatprep.subr.bf16.mxu1 %v9319_v44 }
 0x33b   :  { %6052 = vmatpush1.bf16.msra.mxu0 %v9316_v45 }
 0x33c   :  { %8142 = vmatpush3.bf16.msra.mxu1 %v9320_v35  ;;  %6053 = vmatprep.subr.bf16.mxu0 %v9323_v9  ;;  %v9341_v35 = vld [vmem:[%s12344_s3 + $0xc50] ss:$28 sps:$4 sm:$0xff]  }
 0x33d   :  { %8143 = vmatprep.subr.bf16.mxu1 %v9324_v17 }
 0x33f   :  { %6054 = vmatpush1.bf16.msra.mxu0 %v9321_v47  ;;  %v9348_v47 = vld [vmem:[%s12344_s3 + $0xc8c] ss:$28 sps:$4 sm:$0xff]  }
 0x340   :  { %8144 = vmatpush3.bf16.msra.mxu1 %v9325_v49  ;;  %6055 = vmatprep.subr.bf16.mxu0 %v9328_v50  ;;  %v9345_v50 = vld [vmem:[%s12346_s5 + $0x80] sm:$0xff]  }
 0x341   :  { %v5649_v12 = vpop.f32.mrb[16].mxu0  ;;  %8145 = vmatprep.subr.bf16.mxu1 %v9329_v19 }
 0x342   :  { %v6459_v60 = vmul.f32 %v6427_v51, %v5649_v12  ;;  %v5907_v63 = vpop.f32.mrb[32].mxu1  ;;  %v5651_v61 = vpop.f32.mrb[17].mxu0  ;;  %v9358_v12 = vld [vmem:[%s12344_s3 + $0xcfc] ss:$28 sps:$4 sm:$0xff]  }
 0x343   :  { %v6461_v16 = vmul.f32 %v6435_v52, %v5907_v63  ;;  %v6460_v46 = vmul.f32 %v6431_v53, %v5651_v61  ;;  %v5909_v20 = vpop.f32.mrb[33].mxu1  ;;  %v5653_v22 = vpop.f32.mrb[18].mxu0  ;;  %6056 = vmatpush1.bf16.msra.mxu0 %v9326_v57  ;;  %v9353_v57 = vld [vmem:[%s12344_s3 + $0xcc4] ss:$28 sps:$4 sm:$0xff]   ;;  %v9363_v63 = vld [vmem:[%s12344_s3 + $0xd34] ss:$28 sps:$4 sm:$0xff]  }
 0x344   :  { %v6462_v24 = vmul.f32 %v6439_v58, %v5909_v20  ;;  %v6509_v25 = vmul.f32 %v6427_v51, %v5653_v22  ;;  %v5911_v7 = vpop.f32.mrb[34].mxu1  ;;  %v5655_v6 = vpop.f32.mrb[19].mxu0  ;;  %8146 = vmatpush3.bf16.msra.mxu1 %v9330_v8  ;;  %6057 = vmatprep.subr.bf16.mxu0 %v9333_v11  ;;  %v6502_v29 = vadd.f32 %v6470_v15, %v6459_v60  ;;  %v9349_v51 = vld [vmem:[%s12346_s5 + $0xc8] sm:$0xff]   ;;  %v9354_v8 = vld [vmem:[%s12346_s5 + $0xd0] sm:$0xff]   ;;  %v9351_v11 = vld [vmem:[%s12344_s3 + $0xcc0] ss:$28 sps:$4 sm:$0xff]  }
 0x345   :  { %v6511_v28 = vmul.f32 %v6435_v52, %v5911_v7  ;;  %v6510_v32 = vmul.f32 %v6431_v53, %v5655_v6  ;;  %v5913_v42 = vpop.f32.mrb[35].mxu1  ;;  %8147 = vmatprep.subr.bf16.mxu1 %v9334_v14  ;;  %v11935_v33 = vadd.f32 %v6478_v18, %v6461_v16  ;;  %v6503_v13 = vadd.f32 %v6474_v62, %v6460_v46  ;;  %v9346_v53 = vld [vmem:[%s12344_s3 + $0xc88] ss:$28 sps:$4 sm:$0xff]   ;;  %v9355_v14 = vld [vmem:[%s12346_s5 + $0x90] sm:$0xff]   ;;  %v9359_v60 = vld [vmem:[%s12346_s5 + $0xd8] sm:$0xff]  }
 0x346   :  { %v6516_v55 = vadd.f32 %v6509_v25, %v6470_v15  ;;  %v6512_v30 = vmul.f32 %v6439_v58, %v5913_v42  ;;  %v6505_v2 = vadd.f32 %v6482_v3, %v6462_v24  ;;  %v9350_v58 = vld [vmem:[%s12346_s5 + $0x88] sm:$0xff]   ;;  %v9356_v15 = vld [vmem:[%s12344_s3 + $0xcf8] ss:$28 sps:$4 sm:$0xff]   ;;  %v9364_v16 = vld [vmem:[%s12346_s5 + $0xe0] sm:$0xff]  }
 0x347   :  { %v11937_v31 = vadd.f32 %v6511_v28, %v6478_v18  ;;  %v6517_v34 = vadd.f32 %v6510_v32, %v6474_v62  ;;  %6058 = vmatpush1.bf16.msra.mxu0 %v9331_v23  ;;  %v9360_v61 = vld [vmem:[%s12346_s5 + $0x98] sm:$0xff]   ;;  %v9361_v18 = vld [vmem:[%s12344_s3 + $0xd30] ss:$28 sps:$4 sm:$0xff]   ;;  %v9365_v62 = vld [vmem:[%s12346_s5 + $0xa0] sm:$0xff]  }
 0x348   :  { %v6523_v39 = vmax.f32 %v6502_v29, %v6516_v55  ;;  %v6519_v10 = vadd.f32 %v6512_v30, %v6482_v3  ;;  %8148 = vmatpush3.bf16.msra.mxu1 %v9335_v4  ;;  %6059 = vmatprep.subr.bf16.mxu0 %v9338_v26  ;;  %v9368_v46 = vld [vmem:[%s12344_s3 + $0xd6c] ss:$28 sps:$4 sm:$0xff]   ;;  %v9373_v23 = vld [vmem:[%s12344_s3 + $0xda4] ss:$28 sps:$4 sm:$0xff]   ;;  %v9374_v25 = vld [vmem:[%s12346_s5 + $0xf0] sm:$0xff]  }
 0x349   :  { %v6525_v21 = vmax.f32 %v11935_v33, %v11937_v31  ;;  %v6524_v43 = vmax.f32 %v6503_v13, %v6517_v34  ;;  %8149 = vmatprep.subr.bf16.mxu1 %v9339_v27  ;;  %v9369_v20 = vld [vmem:[%s12346_s5 + $0xe8] sm:$0xff]   ;;  %v9371_v6 = vld [vmem:[%s12344_s3 + $0xda0] ss:$28 sps:$4 sm:$0xff]   ;;  %v9375_v42 = vld [vmem:[%s12346_s5 + $0xb0] sm:$0xff]  }
 0x34a   :  { %v6530_v44 = vmax.f32 %v6523_v39, 0.0  ;;  %v6526_v45 = vmax.f32 %v6505_v2, %v6519_v10  ;;  %v9366_v22 = vld [vmem:[%s12344_s3 + $0xd68] ss:$28 sps:$4 sm:$0xff]   ;;  %v9378_v28 = vld [vmem:[%s12344_s3 + $0xddc] ss:$28 sps:$4 sm:$0xff]  }
 0x34b   :  { %6060 = vmatpush1.bf16.msra.mxu0 %v9336_v37  ;;  %v6531_v9 = vmax.f32 %v6524_v43, 0.0  ;;  %v9370_v24 = vld [vmem:[%s12346_s5 + $0xa8] sm:$0xff]   ;;  %v9379_v29 = vld [vmem:[%s12346_s5 + $0xf8] sm:$0xff]   ;;  %v9383_v30 = vld [vmem:[%s12344_s3 + $0xe14] ss:$28 sps:$4 sm:$0xff]   ;;  %v6532_v34 = vmax.f32 %v6525_v21, 0.0 }
 0x34c   :  { %8150 = vmatpush3.bf16.msra.mxu1 %v9340_v40  ;;  %6061 = vmatprep.subr.bf16.mxu0 %v9343_v41  ;;  %v6533_v17 = vmax.f32 %v6526_v45, 0.0  ;;  %v6537_v19 = vpack.c.bf16 %v6530_v44, %v6530_v44  ;;  %v9376_v55 = vld [vmem:[%s12344_s3 + $0xdd8] ss:$28 sps:$4 sm:$0xff]   ;;  %v9381_v37 = vld [vmem:[%s12344_s3 + $0xe10] ss:$28 sps:$4 sm:$0xff]  }
 0x34d   :  { %v6538_v49 = vpack.c.bf16 %v6531_v9, %v6531_v9  ;;  %8157 = vmatprep.subr.bf16.mxu1 %v9344_v5  ;;  %v9380_v13 = vld [vmem:[%s12346_s5 + $0xb8] sm:$0xff]   ;;  %v9386_v2 = vld [vmem:[%s12344_s3 + $0xe4c] ss:$28 sps:$4 sm:$0xff]   ;;  %v6539_v39 = vpack.c.bf16 %v6532_v34, %v6532_v34  ;;  %v9389_v31 = vld [vmem:[%s12344_s3 + $0xe84] ss:$28 sps:$4 sm:$0xff]  }
 0x34e   :  { %v6540_v52 = vpack.c.bf16 %v6533_v17, %v6533_v17  ;;  %v9384_v33 = vld [vmem:[%s12344_s3 + $0xe48] ss:$28 sps:$4 sm:$0xff]   ;;  %v9387_v10 = vld [vmem:[%s12344_s3 + $0xe80] ss:$28 sps:$4 sm:$0xff]   ;;  %v9395_v40 = vld [vmem:[%s12344_s3 + $0xef4] ss:$28 sps:$4 sm:$0xff]  }
 0x34f   :  { %6062 = vmatpush1.bf16.msra.mxu0 %v9341_v35  ;;  %7031 = vmatprep.mubr.bf16.mxu1 %v6538_v49  ;;  %v9393_v41 = vld [vmem:[%s12344_s3 + $0xef0] ss:$28 sps:$4 sm:$0xff]   ;;  %v9396_v43 = vld [vmem:[%s12344_s3 + $0xf28] ss:$28 sps:$4 sm:$0xff]   ;;  %v9399_v35 = vld [vmem:[%s12344_s3 + $0xf60] ss:$28 sps:$4 sm:$0xff]  }
 0x350   :  { %7032 = vmatmul.mubr.bf16.vlgmr.msra.gmra.mrb[60].mxu1 %v6537_v19  ;;  %6063 = vmatprep.subr.bf16.mxu0 %v9348_v47  ;;  %v9398_v21 = vld [vmem:[%s12344_s3 + $0xf2c] ss:$28 sps:$4 sm:$0xff]   ;;  %v9401_v5 = vld [vmem:[%s12344_s3 + $0xf64] ss:$28 sps:$4 sm:$0xff]   ;;  %v9404_v47 = vld [vmem:[%s12344_s3 + $0xf9c] ss:$28 sps:$4 sm:$0xff]  }
 0x351   :  { %8158 = vmatpush3.bf16.msra.mxu1 %v9345_v50  ;;  %7071 = vmatprep.mubr.bf16.mxu1 %v6540_v52  ;;  %v9444_v34 = vld [vmem:[%s12344_s3 + $0x12a8] ss:$28 sps:$4 sm:$0xff]  }
 0x352   :  { %8159 = vmatprep.subr.bf16.mxu1 %v9349_v51  ;;  %v9402_v51 = vld [vmem:[%s12344_s3 + $0xf98] ss:$28 sps:$4 sm:$0xff]  }
 0x353   :  { %6064 = vmatpush1.bf16.msra.mxu0 %v9346_v53  ;;  %v9407_v53 = vld [vmem:[%s12344_s3 + $0xfd4] ss:$28 sps:$4 sm:$0xff]  }
 0x354   :  { %6065 = vmatprep.subr.bf16.mxu0 %v9353_v57  ;;  %v9405_v57 = vld [vmem:[%s12344_s3 + $0xfd0] ss:$28 sps:$4 sm:$0xff]  }
 0x355   :  { %8160 = vmatpush3.bf16.msra.mxu1 %v9350_v58  ;;  %v9410_v58 = vld [vmem:[%s12344_s3 + $0x100c] ss:$28 sps:$4 sm:$0xff]  }
 0x356   :  { %8161 = vmatprep.subr.bf16.mxu1 %v9354_v8  ;;  %v9408_v8 = vld [vmem:[%s12344_s3 + $0x1008] ss:$28 sps:$4 sm:$0xff]  }
 0x357   :  { %6066 = vmatpush1.bf16.msra.mxu0 %v9351_v11  ;;  %v9413_v11 = vld [vmem:[%s12344_s3 + $0x1044] ss:$28 sps:$4 sm:$0xff]  }
 0x358   :  { %6067 = vmatprep.subr.bf16.mxu0 %v9358_v12  ;;  %v9411_v12 = vld [vmem:[%s12344_s3 + $0x1040] ss:$28 sps:$4 sm:$0xff]  }
 0x359   :  { %8162 = vmatpush3.bf16.msra.mxu1 %v9355_v14  ;;  %v9416_v14 = vld [vmem:[%s12344_s3 + $0x107c] ss:$28 sps:$4 sm:$0xff]  }
 0x35a   :  { %8163 = vmatprep.subr.bf16.mxu1 %v9359_v60  ;;  %v9414_v60 = vld [vmem:[%s12344_s3 + $0x1078] ss:$28 sps:$4 sm:$0xff]  }
 0x35b   :  { %6068 = vmatpush1.bf16.msra.mxu0 %v9356_v15  ;;  %v9419_v15 = vld [vmem:[%s12344_s3 + $0x10b4] ss:$28 sps:$4 sm:$0xff]  }
 0x35c   :  { %6069 = vmatprep.subr.bf16.mxu0 %v9363_v63  ;;  %v9417_v63 = vld [vmem:[%s12344_s3 + $0x10b0] ss:$28 sps:$4 sm:$0xff]  }
 0x35d   :  { %8164 = vmatpush3.bf16.msra.mxu1 %v9360_v61  ;;  %v9422_v61 = vld [vmem:[%s12344_s3 + $0x10ec] ss:$28 sps:$4 sm:$0xff]  }
 0x35e   :  { %8165 = vmatprep.subr.bf16.mxu1 %v9364_v16  ;;  %v9420_v16 = vld [vmem:[%s12344_s3 + $0x10e8] ss:$28 sps:$4 sm:$0xff]  }
 0x35f   :  { %6070 = vmatpush1.bf16.msra.mxu0 %v9361_v18  ;;  %v9425_v18 = vld [vmem:[%s12344_s3 + $0x1124] ss:$28 sps:$4 sm:$0xff]  }
 0x360   :  { %6071 = vmatprep.subr.bf16.mxu0 %v9368_v46 }
 0x361   :  { %8166 = vmatpush3.bf16.msra.mxu1 %v9365_v62 }
 0x362   :  { %v8019_v3 = vpop.f32.mrb[36].mxu1  ;;  %8167 = vmatprep.subr.bf16.mxu1 %v9369_v20  ;;  %v9423_v20 = vld [vmem:[%s12344_s3 + $0x1120] ss:$28 sps:$4 sm:$0xff]  }
 0x363   :  { %v8020_v7 = vpop.f32.mrb[37].mxu1  ;;  %6072 = vmatpush1.bf16.msra.mxu0 %v9366_v22 }
 0x364   :  { %v8021_v4 = vadd.f32 %v8020_v7, %v8019_v3  ;;  %v8022_v26 = vpop.f32.mrb[38].mxu1  ;;  %6073 = vmatprep.subr.bf16.mxu0 %v9373_v23 }
 0x365   :  { %v8023_v32 = vpop.f32.mrb[39].mxu1  ;;  %8168 = vmatpush3.bf16.msra.mxu1 %v9370_v24  ;;  %v9428_v24 = vld [vmem:[%s12344_s3 + $0x115c] ss:$28 sps:$4 sm:$0xff]  }
 0x366   :  { %v8024_v27 = vadd.f32 %v8023_v32, %v8022_v26  ;;  %8169 = vmatprep.subr.bf16.mxu1 %v9374_v25  ;;  %v9431_v26 = vld [vmem:[%s12344_s3 + $0x1194] ss:$28 sps:$4 sm:$0xff]   ;;  %v9434_v32 = vld [vmem:[%s12344_s3 + $0x11cc] ss:$28 sps:$4 sm:$0xff]  }
 0x367   :  { %6074 = vmatpush1.bf16.msra.mxu0 %v9371_v6  ;;  %v9426_v6 = vld [vmem:[%s12344_s3 + $0x1158] ss:$28 sps:$4 sm:$0xff]  }
 0x368   :  { %6075 = vmatprep.subr.bf16.mxu0 %v9378_v28  ;;  %v9429_v28 = vld [vmem:[%s12344_s3 + $0x1190] ss:$28 sps:$4 sm:$0xff]  }
 0x369   :  { %8170 = vmatpush3.bf16.msra.mxu1 %v9375_v42  ;;  %v9432_v42 = vld [vmem:[%s12344_s3 + $0x11c8] ss:$28 sps:$4 sm:$0xff]  }
 0x36a   :  { %8171 = vmatprep.subr.bf16.mxu1 %v9379_v29  ;;  %v9435_v29 = vld [vmem:[%s12344_s3 + $0x1200] ss:$28 sps:$4 sm:$0xff]  }
 0x36b   :  { %6076 = vmatpush1.bf16.msra.mxu0 %v9376_v55  ;;  %v9443_v55 = vld [vmem:[%s12344_s3 + $0x1274] ss:$28 sps:$4 sm:$0xff]  }
 0x36c   :  { %6088 = vmatprep.subr.bf16.mxu0 %v9383_v30  ;;  %v9441_v30 = vld [vmem:[%s12344_s3 + $0x1270] ss:$28 sps:$4 sm:$0xff]  }
 0x36d   :  { %8172 = vmatpush3.bf16.msra.mxu1 %v9380_v13  ;;  %v9446_v13 = vld [vmem:[%s12344_s3 + $0x12ac] ss:$28 sps:$4 sm:$0xff]  }
 0x36e   :  { %6078 = vmatmul.mubr.bf16.vlgmr.msra.gmra.mrb[20].mxu0 %v10454_v0  ;;  %v9390_v0 = vld [vmem:[%s12344_s3 + $0xeb8] ss:$28 sps:$4 sm:$0xff]  }
 0x36f   :  { %6089 = vmatpush1.bf16.msra.mxu0 %v9381_v37  ;;  %6120 = vmatprep.mubr.bf16.mxu0 %v10236_v56  ;;  %v9392_v56 = vld [vmem:[%s12344_s3 + $0xebc] ss:$28 sps:$4 sm:$0xff]   ;;  %v9449_v37 = vld [vmem:[%s12344_s3 + $0x12e4] ss:$28 sps:$4 sm:$0xff]  }
 0x370   :  { %7072 = vmatmul.mubr.bf16.vlgmr.msra.gmra.mrb[64].mxu1 %v6539_v39  ;;  %6090 = vmatprep.subr.bf16.mxu0 %v9386_v2 }
 0x373   :  { %6091 = vmatpush1.bf16.msra.mxu0 %v9384_v33  ;;  %v9447_v33 = vld [vmem:[%s12344_s3 + $0x12e0] ss:$28 sps:$4 sm:$0xff]  }
 0x374   :  { %6092 = vmatprep.subr.bf16.mxu0 %v9389_v31 }
 0x377   :  { %6093 = vmatpush1.bf16.msra.mxu0 %v9387_v10 }
 0x378   :  { %6094 = vmatprep.subr.bf16.mxu0 %v9392_v56  ;;  %v9452_v56 = vld [vmem:[%s12344_s3 + $0x131c] ss:$28 sps:$4 sm:$0xff]  }
 0x37b   :  { %6095 = vmatpush1.bf16.msra.mxu0 %v9390_v0 }
 0x37c   :  { %6096 = vmatprep.subr.bf16.mxu0 %v9395_v40 }
 0x37f   :  { %6097 = vmatpush1.bf16.msra.mxu0 %v9393_v41 }
 0x380   :  { %6098 = vmatprep.subr.bf16.mxu0 %v9398_v21  ;;  %v9450_v21 = vld [vmem:[%s12344_s3 + $0x1318] ss:$28 sps:$4 sm:$0xff]  }
 0x382   :  { %v8041_v44 = vpop.f32.mrb[40].mxu1 }
 0x383   :  { %v8042_v45 = vpop.f32.mrb[41].mxu1  ;;  %6099 = vmatpush1.bf16.msra.mxu0 %v9396_v43  ;;  %v9477_v43 = vld [vmem:[%s12346_s5 + $0x140] sm:$0xff]  }
 0x384   :  { %v8043_v9 = vadd.f32 %v8042_v45, %v8041_v44  ;;  %v8044_v17 = vpop.f32.mrb[42].mxu1  ;;  %6100 = vmatprep.subr.bf16.mxu0 %v9401_v5  ;;  %v9478_v5 = vld [vmem:[%s12346_s5 + $0x100] sm:$0xff]   ;;  %v9479_v44 = vld [vmem:[%s12346_s5 + $0x148] sm:$0xff]   ;;  %8179 = vmatprep.subr.bf16.mxu1 %v9477_v43 }
 0x385   :  { %v8045_v49 = vpop.f32.mrb[43].mxu1  ;;  %8180 = vmatpush3.bf16.msra.mxu1 %v9478_v5 }
 0x386   :  { %v6250_v50 = vadd.f32 %v8043_v9, %v8021_v4  ;;  %v8046_v19 = vadd.f32 %v8045_v49, %v8044_v17  ;;  %v9480_v9 = vld [vmem:[%s12346_s5 + $0x108] sm:$0xff]   ;;  %8181 = vmatprep.subr.bf16.mxu1 %v9479_v44 }
 0x387   :  { %6101 = vmatpush1.bf16.msra.mxu0 %v9399_v35  ;;  %v9455_v35 = vld [vmem:[%s12344_s3 + $0x1354] ss:$28 sps:$4 sm:$0xff]   ;;  %v9458_v49 = vld [vmem:[%s12344_s3 + $0x138c] ss:$28 sps:$4 sm:$0xff]  }
 0x388   :  { %v6253_v52 = vadd.f32 %v8046_v19, %v8024_v27  ;;  %6102 = vmatprep.subr.bf16.mxu0 %v9404_v47  ;;  %v9437_v27 = vld [vmem:[%s12344_s3 + $0x1204] ss:$28 sps:$4 sm:$0xff]   ;;  %v9453_v17 = vld [vmem:[%s12344_s3 + $0x1350] ss:$28 sps:$4 sm:$0xff]  }
 0x389   :  { %v9481_v47 = vld [vmem:[%s12346_s5 + $0x150] sm:$0xff]   ;;  %8182 = vmatpush3.bf16.msra.mxu1 %v9480_v9  ;;  %v9456_v19 = vld [vmem:[%s12344_s3 + $0x1388] ss:$28 sps:$4 sm:$0xff]  }
 0x38a   :  { %8183 = vmatprep.subr.bf16.mxu1 %v9481_v47  ;;  %v9489_v9 = vld [vmem:[%s12346_s5 + $0x170] sm:$0xff]   ;;  %v9491_v47 = vld [vmem:[%s12346_s5 + $0x178] sm:$0xff]  }
 0x38b   :  { %6103 = vmatpush1.bf16.msra.mxu0 %v9402_v51  ;;  %v9483_v51 = vld [vmem:[%s12346_s5 + $0x158] sm:$0xff]  }
 0x38c   :  { %6104 = vmatprep.subr.bf16.mxu0 %v9407_v53  ;;  %v9484_v53 = vld [vmem:[%s12346_s5 + $0x118] sm:$0xff]  }
 0x38f   :  { %6105 = vmatpush1.bf16.msra.mxu0 %v9405_v57  ;;  %v9459_v57 = vld [vmem:[%s12344_s3 + $0x13c0] ss:$28 sps:$4 sm:$0xff]  }
 0x390   :  { %6106 = vmatprep.subr.bf16.mxu0 %v9410_v58  ;;  %v9485_v58 = vld [vmem:[%s12346_s5 + $0x160] sm:$0xff]  }
 0x393   :  { %6107 = vmatpush1.bf16.msra.mxu0 %v9408_v8  ;;  %v9464_v8 = vld [vmem:[%s12344_s3 + $0x13fc] ss:$28 sps:$4 sm:$0xff]  }
 0x394   :  { %6108 = vmatprep.subr.bf16.mxu0 %v9413_v11  ;;  %v9486_v11 = vld [vmem:[%s12346_s5 + $0x120] sm:$0xff]  }
 0x397   :  { %6109 = vmatpush1.bf16.msra.mxu0 %v9411_v12  ;;  %v9462_v12 = vld [vmem:[%s12344_s3 + $0x13f8] ss:$28 sps:$4 sm:$0xff]  }
 0x398   :  { %6110 = vmatprep.subr.bf16.mxu0 %v9416_v14  ;;  %v9467_v14 = vld [vmem:[%s12344_s3 + $0x1434] ss:$28 sps:$4 sm:$0xff]  }
 0x39b   :  { %6111 = vmatpush1.bf16.msra.mxu0 %v9414_v60  ;;  %v9465_v60 = vld [vmem:[%s12344_s3 + $0x1430] ss:$28 sps:$4 sm:$0xff]  }
 0x39c   :  { %6112 = vmatprep.subr.bf16.mxu0 %v9419_v15  ;;  %v9470_v15 = vld [vmem:[%s12344_s3 + $0x146c] ss:$28 sps:$4 sm:$0xff]  }
 0x39f   :  { %6113 = vmatpush1.bf16.msra.mxu0 %v9417_v63  ;;  %v9468_v63 = vld [vmem:[%s12344_s3 + $0x1468] ss:$28 sps:$4 sm:$0xff]  }
 0x3a0   :  { %6114 = vmatprep.subr.bf16.mxu0 %v9422_v61  ;;  %v9473_v61 = vld [vmem:[%s12344_s3 + $0x14a4] ss:$28 sps:$4 sm:$0xff]  }
 0x3a2   :  { %v8063_v46 = vpop.f32.mrb[44].mxu1 }
 0x3a3   :  { %v8064_v62 = vpop.f32.mrb[45].mxu1  ;;  %6115 = vmatpush1.bf16.msra.mxu0 %v9420_v16 }
 0x3a4   :  { %v8065_v22 = vadd.f32 %v8064_v62, %v8063_v46  ;;  %v8066_v23 = vpop.f32.mrb[46].mxu1  ;;  %6116 = vmatprep.subr.bf16.mxu0 %v9425_v18  ;;  %v9471_v46 = vld [vmem:[%s12344_s3 + $0x14a0] ss:$28 sps:$4 sm:$0xff]  }
 0x3a5   :  { %v8067_v3 = vpop.f32.mrb[47].mxu1 }
 0x3a6   :  { %v6291_v25 = vadd.f32 %v8065_v22, %v6250_v50  ;;  %v8068_v7 = vadd.f32 %v8067_v3, %v8066_v23  ;;  %v9482_v50 = vld [vmem:[%s12346_s5 + $0x110] sm:$0xff]   ;;  %v9476_v22 = vld [vmem:[%s12344_s3 + $0x14dc] ss:$28 sps:$4 sm:$0xff]  }
 0x3a7   :  { %6117 = vmatpush1.bf16.msra.mxu0 %v9423_v20  ;;  %8184 = vmatpush3.bf16.msra.mxu1 %v9482_v50  ;;  %v9502_v50 = vmov 0.0  }
 0x3a8   :  { %v6294_v4 = vadd.f32 %v8068_v7, %v6253_v52  ;;  %6118 = vmatprep.subr.bf16.mxu0 %v9428_v24  ;;  %v9461_v52 = vld [vmem:[%s12344_s3 + $0x13c4] ss:$28 sps:$4 sm:$0xff]   ;;  %8185 = vmatprep.subr.bf16.mxu1 %v9483_v51  ;;  %v6446_v51 = vsub.s32 5, %v10090_v59 }
 0x3ab   :  { %6119 = vmatpush1.bf16.msra.mxu0 %v9426_v6  ;;  %8186 = vmatpush3.bf16.msra.mxu1 %v9484_v53  ;;  %v6450_v6 = vsub.s32 6, %v10090_v59  ;;  %v6447_v53 = vrot.slane %v11879_v48, %v6446_v51 }
 0x3ac   :  { %6131 = vmatprep.subr.bf16.mxu0 %v9431_v26  ;;  %8187 = vmatprep.subr.bf16.mxu1 %v9485_v58 }
 0x3ae   :  { %6121 = vmatmul.mubr.bf16.vlgmr.msra.gmra.mrb[20].mxu0 %v10234_v54  ;;  %v9440_v54 = vld [vmem:[%s12344_s3 + $0x123c] ss:$28 sps:$4 sm:$0xff]  }
 0x3af   :  { %6132 = vmatpush1.bf16.msra.mxu0 %v9429_v28  ;;  %6163 = vmatprep.mubr.bf16.mxu0 %v10491_v38  ;;  %v9438_v38 = vld [vmem:[%s12344_s3 + $0x1238] ss:$28 sps:$4 sm:$0xff]  }
 0x3b0   :  { %6133 = vmatprep.subr.bf16.mxu0 %v9434_v32  ;;  %8188 = vmatpush3.bf16.msra.mxu1 %v9486_v11  ;;  %v6451_v32 = vrot.slane %v11879_v48, %v6450_v6 }
 0x3b3   :  { %6134 = vmatpush1.bf16.msra.mxu0 %v9432_v42 }
 0x3b4   :  { %6135 = vmatprep.subr.bf16.mxu0 %v9437_v27 }
 0x3b7   :  { %6136 = vmatpush1.bf16.msra.mxu0 %v9435_v29 }
 0x3b8   :  { %6137 = vmatprep.subr.bf16.mxu0 %v9440_v54 }
 0x3bb   :  { %6138 = vmatpush1.bf16.msra.mxu0 %v9438_v38 }
 0x3bc   :  { %6139 = vmatprep.subr.bf16.mxu0 %v9443_v55  ;;  %v6494_v55 = vrot.slane %v11895_v1, %v6450_v6  ;;  %v9497_v6 = vld [vmem:[%s12346_s5 + $0x1a0] sm:$0xff]  }
 0x3bf   :  { %6140 = vmatpush1.bf16.msra.mxu0 %v9441_v30 }
 0x3c0   :  { %6141 = vmatprep.subr.bf16.mxu0 %v9446_v13 }
 0x3c2   :  { %v8085_v2 = vpop.f32.mrb[48].mxu1 }
 0x3c3   :  { %v8086_v39 = vpop.f32.mrb[49].mxu1  ;;  %6142 = vmatpush1.bf16.msra.mxu0 %v9444_v34 }
 0x3c4   :  { %v8087_v31 = vadd.f32 %v8086_v39, %v8085_v2  ;;  %v8088_v10 = vpop.f32.mrb[50].mxu1  ;;  %6143 = vmatprep.subr.bf16.mxu0 %v9449_v37 }
 0x3c5   :  { %v8089_v0 = vpop.f32.mrb[51].mxu1 }
 0x3c6   :  { %v6332_v40 = vadd.f32 %v8087_v31, %v6291_v25  ;;  %v8090_v41 = vadd.f32 %v8089_v0, %v8088_v10  ;;  %v9474_v25 = vld [vmem:[%s12344_s3 + $0x14d8] ss:$28 sps:$4 sm:$0xff]  }
 0x3c7   :  { %6144 = vmatpush1.bf16.msra.mxu0 %v9447_v33 }
 0x3c8   :  { %v6335_v45 = vadd.f32 %v8090_v41, %v6294_v4  ;;  %6145 = vmatprep.subr.bf16.mxu0 %v9452_v56  ;;  %v7946_v56 = vld [vmem:[%s12348_s6] ss:$0 sm:$0xff] }
 0x3cb   :  { %6146 = vmatpush1.bf16.msra.mxu0 %v9450_v21  ;;  %v9488_v21 = vld [vmem:[%s12346_s5 + $0x128] sm:$0xff]  }
 0x3cc   :  { %6147 = vmatprep.subr.bf16.mxu0 %v9455_v35 }
 0x3cf   :  { %6148 = vmatpush1.bf16.msra.mxu0 %v9453_v17  ;;  %v9490_v17 = vld [vmem:[%s12346_s5 + $0x130] sm:$0xff]  }
 0x3d0   :  { %6149 = vmatprep.subr.bf16.mxu0 %v9458_v49  ;;  %v9492_v49 = vld [vmem:[%s12346_s5 + $0x138] sm:$0xff]  }
 0x3d3   :  { %6150 = vmatpush1.bf16.msra.mxu0 %v9456_v19  ;;  %v6442_v19 = vsub.s32 4, %v10090_v59 }
 0x3d4   :  { %6151 = vmatprep.subr.bf16.mxu0 %v9461_v52 }
 0x3d5   :  { %v6443_v52 = vrot.slane %v11879_v48, %v6442_v19 }
 0x3d7   :  { %6152 = vmatpush1.bf16.msra.mxu0 %v9459_v57 }
 0x3d8   :  { %6153 = vmatprep.subr.bf16.mxu0 %v9464_v8  ;;  %v6486_v8 = vrot.slane %v11895_v1, %v6442_v19 }
 0x3db   :  { %6154 = vmatpush1.bf16.msra.mxu0 %v9462_v12 }
 0x3dc   :  { %6155 = vmatprep.subr.bf16.mxu0 %v9467_v14  ;;  %v6490_v14 = vrot.slane %v11895_v1, %v6446_v51  ;;  %v9494_v1 = vld [vmem:[%s12346_s5 + $0x188] sm:$0xff]  }
 0x3df   :  { %6156 = vmatpush1.bf16.msra.mxu0 %v9465_v60 }
 0x3e0   :  { %6157 = vmatprep.subr.bf16.mxu0 %v9470_v15 }
 0x3e2   :  { %v8107_v16 = vpop.f32.mrb[52].mxu1 }
 0x3e3   :  { %v8108_v18 = vpop.f32.mrb[53].mxu1  ;;  %6158 = vmatpush1.bf16.msra.mxu0 %v9468_v63 }
 0x3e4   :  { %v8109_v62 = vadd.f32 %v8108_v18, %v8107_v16  ;;  %v8110_v20 = vpop.f32.mrb[54].mxu1  ;;  %6159 = vmatprep.subr.bf16.mxu0 %v9473_v61 }
 0x3e5   :  { %v8111_v23 = vpop.f32.mrb[55].mxu1 }
 0x3e6   :  { %v6373_v24 = vadd.f32 %v8109_v62, %v6332_v40  ;;  %v8112_v3 = vadd.f32 %v8111_v23, %v8110_v20  ;;  %v9487_v40 = vld [vmem:[%s12346_s5 + $0x168] sm:$0xff]  }
 0x3e7   :  { %6160 = vmatpush1.bf16.msra.mxu0 %v9471_v46  ;;  %8189 = vmatprep.subr.bf16.mxu1 %v9487_v40 }
 0x3e8   :  { %v6376_v7 = vadd.f32 %v8112_v3, %v6335_v45  ;;  %6161 = vmatprep.subr.bf16.mxu0 %v9476_v22  ;;  %8190 = vmatpush3.bf16.msra.mxu1 %v9488_v21 }
 0x3e9   :  { %8191 = vmatprep.subr.bf16.mxu1 %v9489_v9 }
 0x3eb   :  { %6162 = vmatpush1.bf16.msra.mxu0 %v9474_v25  ;;  %v9495_v25 = vld [vmem:[%s12346_s5 + $0x190] sm:$0xff]  }
 0x3ec   :  { %8192 = vmatpush3.bf16.msra.mxu1 %v9490_v17 }
 0x3ed   :  { %8193 = vmatprep.subr.bf16.mxu1 %v9491_v47 }
 0x3ee   :  { %6164 = vmatmul.mubr.bf16.vlgmr.msra.gmra.mrb[20].mxu0 %v10483_v36 }
 0x3f0   :  { %8194 = vmatpush3.bf16.msra.mxu1 %v9492_v49 }
 0x3f1   :  { %8210 = vmatprep.subr.bf16.mxu1 %v9502_v50 }
 0x402   :  { %v8129_v4 = vpop.f32.mrb[56].mxu1 }
 0x403   :  { %v8130_v26 = vpop.f32.mrb[57].mxu1 }
 0x404   :  { %v8131_v28 = vadd.f32 %v8130_v26, %v8129_v4  ;;  %v8132_v42 = vpop.f32.mrb[58].mxu1  ;;  %v9498_v4 = vld [vmem:[%s12346_s5 + $0x1a8] sm:$0xff]   ;;  %v9499_v26 = vld [vmem:[%s12346_s5 + $0x1b0] sm:$0xff]  }
 0x405   :  { %v8133_v27 = vpop.f32.mrb[59].mxu1 }
 0x406   :  { %v6414_v29 = vadd.f32 %v8131_v28, %v6373_v24  ;;  %v8134_v54 = vadd.f32 %v8133_v27, %v8132_v42  ;;  %v9493_v24 = vld [vmem:[%s12346_s5 + $0x180] sm:$0xff]   ;;  %v9500_v28 = vld [vmem:[%s12346_s5 + $0x1b8] sm:$0xff]  }
 0x408   :  { %v6465_v38 = vmul.f32 %v6451_v32, %v6414_v29  ;;  %v6417_v30 = vadd.f32 %v8134_v54, %v6376_v7  ;;  %v9496_v7 = vld [vmem:[%s12346_s5 + $0x198] sm:$0xff]  }
 0x40a   :  { %v6515_v13 = vmul.f32 %v6451_v32, %v6417_v30  ;;  %v12276_v34 = vadd.f32 %v6494_v55, %v6465_v38 }
 0x40c   :  { %v12278_v37 = vadd.f32 %v6515_v13, %v6494_v55 }
 0x40e   :  { %v6529_v36 = vmax.f32 %v12276_v34, %v12278_v37 }
 0x410   :  { %v6536_v32 = vmax.f32 %v6529_v36, 0.0 }
 0x412   :  { %v6543_v42 = vpack.c.bf16 %v6536_v32, %v6536_v32 }
 0x423   :  { %v8151_v2 = vpop.f32.mrb[60].mxu1 }
 0x424   :  { %v8152_v39 = vpop.f32.mrb[61].mxu1 }
 0x425   :  { %v8153_v33 = vadd.f32 %v8152_v39, %v8151_v2  ;;  %v8154_v31 = vpop.f32.mrb[62].mxu1 }
 0x426   :  { %v8155_v10 = vpop.f32.mrb[63].mxu1 }
 0x427   :  { %v7034_v43 = vadd.f32 %v8153_v33, %v7946_v56 }
 0x443   :  { %v8173_v0 = vpop.f32.mrb[64].mxu1 }
 0x444   :  { %v8174_v41 = vpop.f32.mrb[65].mxu1 }
 0x445   :  { %v8175_v5 = vadd.f32 %v8174_v41, %v8173_v0  ;;  %v8176_v44 = vpop.f32.mrb[66].mxu1 }
 0x446   :  { %v8177_v45 = vpop.f32.mrb[67].mxu1 }
 0x447   :  { %v12291_v35 = vadd.f32 %v8175_v5, %v7034_v43 }
 0x4c1   :  { %v6165_v57 = vpop.f32.mrb[20].mxu0 }
 0x4c2   :  { %v6463_v58 = vmul.f32 %v6443_v52, %v6165_v57  ;;  %v6167_v11 = vpop.f32.mrb[21].mxu0 }
 0x4c3   :  { %v6464_v12 = vmul.f32 %v6447_v53, %v6167_v11  ;;  %v6169_v60 = vpop.f32.mrb[22].mxu0 }
 0x4c4   :  { %v6513_v15 = vmul.f32 %v6443_v52, %v6169_v60  ;;  %v6171_v63 = vpop.f32.mrb[23].mxu0  ;;  %v6506_v16 = vadd.f32 %v6486_v8, %v6463_v58 }
 0x4c5   :  { %v6514_v61 = vmul.f32 %v6447_v53, %v6171_v63  ;;  %v6507_v46 = vadd.f32 %v6490_v14, %v6464_v12 }
 0x4c6   :  { %v6520_v18 = vadd.f32 %v6513_v15, %v6486_v8 }
 0x4c7   :  { %v6521_v59 = vadd.f32 %v6514_v61, %v6490_v14 }
 0x4c8   :  { %v6527_v62 = vmax.f32 %v6506_v16, %v6520_v18 }
 0x4c9   :  { %v6528_v20 = vmax.f32 %v6507_v46, %v6521_v59 }
 0x4ca   :  { %v6534_v22 = vmax.f32 %v6527_v62, 0.0 }
 0x4cb   :  { %v6535_v48 = vmax.f32 %v6528_v20, 0.0 }
 0x4cc   :  { %v6541_v3 = vpack.c.bf16 %v6534_v22, %v6534_v22 }
 0x4cd   :  { %v6542_v23 = vpack.c.bf16 %v6535_v48, %v6535_v48 }
 0x4cf   :  { %7111 = vmatprep.mubr.bf16.mxu1 %v6542_v23 }
 0x4d0   :  { %7112 = vmatmul.mubr.bf16.vlgmr.msra.gmra.mrb[68].mxu1 %v6541_v3 }
 0x4d1   :  { %8211 = vmatpush3.bf16.msra.mxu1 %v9493_v24  ;;  %8226 = vmatprep.mubr.msk.bf16.mxu1 %vm9503_vm0, %v9502_v50 }
 0x4d2   :  { %8212 = vmatprep.subr.bf16.mxu1 %v9502_v50 }
 0x4d5   :  { %8213 = vmatpush3.bf16.msra.mxu1 %v9494_v1 }
 0x4d6   :  { %8214 = vmatprep.subr.bf16.mxu1 %v9502_v50 }
 0x4d9   :  { %8215 = vmatpush3.bf16.msra.mxu1 %v9495_v25 }
 0x4da   :  { %8216 = vmatprep.subr.bf16.mxu1 %v9502_v50 }
 0x4dd   :  { %8217 = vmatpush3.bf16.msra.mxu1 %v9496_v7 }
 0x4de   :  { %8218 = vmatprep.subr.bf16.mxu1 %v9502_v50 }
 0x4e1   :  { %8219 = vmatpush3.bf16.msra.mxu1 %v9497_v6 }
 0x4e2   :  { %8220 = vmatprep.subr.bf16.mxu1 %v9502_v50 }
 0x4e5   :  { %8221 = vmatpush3.bf16.msra.mxu1 %v9498_v4 }
 0x4e6   :  { %8222 = vmatprep.subr.bf16.mxu1 %v9502_v50 }
 0x4e9   :  { %8223 = vmatpush3.bf16.msra.mxu1 %v9499_v26 }
 0x4ea   :  { %8224 = vmatprep.subr.bf16.mxu1 %v9502_v50 }
 0x4ed   :  { %8225 = vmatpush3.bf16.msra.mxu1 %v9500_v28 }
 0x4f0   :  { %8227 = vmatmul.mubr.bf16.vlgmr.msra.gmra.mrb[72].mxu1 %v6543_v42 }
 0x5a3   :  { %v8195_v27 = vpop.f32.mrb[68].mxu1 }
 0x5a4   :  { %v8196_v29 = vpop.f32.mrb[69].mxu1 }
 0x5a5   :  { %v8197_v54 = vadd.f32 %v8196_v29, %v8195_v27  ;;  %v8198_v38 = vpop.f32.mrb[70].mxu1 }
 0x5a6   :  { %v8199_v55 = vpop.f32.mrb[71].mxu1 }
 0x5a7   :  { %v7114_v30 = vadd.f32 %v8197_v54, %v12291_v35 }
 0x5c3   :  { %v7153_v13 = vpop.f32.mrb[72].mxu1 }
 0x5c4   :  { %v7154_v2 = vadd.f32 %v7153_v13, %v7114_v30  ;;  %v8228_v39 = vpop.f32.mrb[73].mxu1 }
 0x5c5   :  { %v7156_v33 = vpop.f32.mrb[74].mxu1 }
 0x5c6   :  { %7159 = vst [vmem:[%s12349_s7] sm:$0xff] %v7154_v2  ;;  %v8229_v34 = vpop.f32.mrb[75].mxu1 }

</bundles_post_ra>
